<compile_context>
chip_gen: v7x
topology: tpu7x:2x2x1
jax: 0.10.0
libtpu: 0.0.40
codegen_flags: <defaults>
</compile_context>

<pallas_src>
import re

import jax
import jax.numpy as jnp
from jax import lax
from jax.experimental import pallas as pl
from jax.experimental.pallas import tpu as pltpu


def _gelu_tanh(v):
    # tanh-form GELU (|gelu_tanh - gelu_erf| <~ 5e-4); tanh runs on the EUP.
    c0 = 0.7978845608028654   # sqrt(2/pi)
    c1 = 0.044715
    return 0.5 * v * (1.0 + jnp.tanh(c0 * (v + c1 * v * v * v)))


def _tpu_generation():
    """Best-effort TPU generation from device_kind ('TPU v5 lite' -> 5)."""
    try:
        kind = jax.devices()[0].device_kind.lower()
        m = re.search(r"(\d+)", kind)
        if m:
            return int(m.group(1))
    except Exception:
        pass
    return 6


def _vmem_capacity_bytes(gen):
    try:
        cap = int(pltpu.get_tpu_info().vmem_capacity_bytes)
        if cap > 0:
            return cap
    except Exception:
        pass
    # v7x has 64 MiB per TensorCore; v4/v5e/v6e have 128 MiB.
    return (64 if gen >= 7 else 128) * 1024 * 1024


def _choose_tile_h(H, W_pad, C, HD, store_isz, comp_isz, budget_bytes):
    """Pick the number of image rows per grid step from a VMEM budget."""
    C2 = 2 * HD
    # Weights (conservatively assume the default double-buffering).
    fixed = 2 * (C * C2 * 2 + 9 * C2 * comp_isz + HD * C * 2)
    # Per image row: 3 pre-shifted hidden planes (store dtype), ~3 live
    # (row, 2HD) temporaries in the tap/gate region (compute dtype), and the
    # double-buffered x (bf16) / out (f32) pipeline blocks.
    per_row = W_pad * (3 * C2 * store_isz + 3 * C2 * comp_isz
                       + 2 * C * 2 + 2 * C * 4)
    halo = 2 * W_pad * (3 * C2 * store_isz + 2 * C * 2)
    avail = budget_bytes - fixed - halo
    tile_h = max(1, avail // max(per_row, 1))
    return int(max(1, min(tile_h, H)))


def _make_kernel(tile_h, W_pad, HD, compute_dtype):
    Lt = (tile_h + 2) * W_pad     # padded token count of the hidden scratch (with halo rows)
    Lout = tile_h * W_pad         # padded token count of the output slab (interior rows)
    f32 = jnp.float32

    def kernel(x_ref, w_in_ref, w_dw_ref, w_out_ref, o_ref, pad_ref):
        # ---- project_in: both gate branches fused into ONE MXU matmul.
        # x pad columns are zero and bias=False, so the pad columns of y are
        # exactly zero -> no edge masks anywhere in the dconv.
        x = x_ref[0, 0]                                                     # (Lt, C) bf16
        y = jnp.dot(x, w_in_ref[...], preferred_element_type=f32)          # (Lt, 2HD) f32

        # ---- pre-shift once per dx: 2 XLU rolls total (was 6 per-tap rolls).
        # Rolls are done on the f32 matmul result (avoids packed-bf16 sublane
        # rolls); the three planes are stored as bf16, halving vst bytes and
        # scratch size.  The circular wrap only ever lands on tokens that are
        # zero pad columns or output pad columns stripped in the wrapper.
        pad_ref[0] = y.astype(pad_ref.dtype)                                    # dx =  0
        pad_ref[1] = pltpu.roll(y, shift=1, axis=0).astype(pad_ref.dtype)       # dx = -1
        pad_ref[2] = pltpu.roll(y, shift=Lt - 1, axis=0).astype(pad_ref.dtype)  # dx = +1

        # ---- depthwise 3x3 conv (stride 1, padding 1), both branches fused.
        # Every tap is now a plain sublane-aligned scratch slice (W_pad % 8 == 0).
        # compute_dtype: bf16 on v6e/v7x (bf16 VPU/EUP), f32 on v5e.
        wdw = w_dw_ref[...]                                                 # (9, 2HD), hoisted
        plane = {0: 0, -1: 1, 1: 2}                                         # dx -> scratch plane
        d = None
        for dy in (-1, 0, 1):
            start = (1 + dy) * W_pad
            for dx in (-1, 0, 1):
                k = (dy + 1) * 3 + (dx + 1)                                 # PyTorch tap order
                t = pad_ref[plane[dx], start:start + Lout, :].astype(compute_dtype)
                contrib = t * wdw[k:k + 1, :]
                d = contrib if d is None else d + contrib                   # init from 1st tap

        # ---- gating: gelu(x1) * x2  (chunk(2) along channels), EUP-resident tanh.
        g = _gelu_tanh(d[:, :HD]) * d[:, HD:]                               # (Lout, HD)

        # ---- project_out: 1x1 conv == channel matmul (bf16 in, f32 acc).
        out = jnp.dot(g.astype(jnp.bfloat16), w_out_ref[...],
                      preferred_element_type=f32)                           # (Lout, C) f32
        o_ref[0, 0] = out.astype(o_ref.dtype)

    return kernel


def feedforward_pallas(x_nchw, w_proj_in, w_dw, w_proj_out, tile_h=None):
    """FeedForward forward pass. x_nchw: (N, C, H, W) float32.
    w_proj_in: (2*hidden, C, 1, 1); w_dw: (2*hidden, 1, 3, 3); w_proj_out: (C, hidden, 1, 1)."""
    N, C, H, W = x_nchw.shape
    C2 = w_proj_in.shape[0]
    HD = C2 // 2
    assert w_dw.shape == (C2, 1, 3, 3) and w_proj_out.shape == (C, HD, 1, 1)

    gen = _tpu_generation()
    compute_dtype = jnp.bfloat16 if gen >= 6 else jnp.float32   # no bf16 VPU/EUP on v5e
    store_dtype = jnp.bfloat16                                   # hidden scratch (A/B candidate on v5e)

    # Minimal row padding: >= 1 trailing zero column (enough for the dx shifts)
    # and W_pad % 8 == 0 so every dy slice is sublane-aligned.
    W_pad = ((W + 1 + 7) // 8) * 8
    assert W_pad % 8 == 0 and W_pad >= W + 1, "dx shifts require >=1 zero pad column"

    vmem_cap = _vmem_capacity_bytes(gen)
    vmem_limit = int(0.75 * vmem_cap)          # generation-aware scoped-VMEM budget

    comp_isz = jnp.dtype(compute_dtype).itemsize
    store_isz = jnp.dtype(store_dtype).itemsize
    if tile_h is None:
        tile_h = _choose_tile_h(H, W_pad, C, HD, store_isz, comp_isz, vmem_limit // 2)
    tile_h = int(max(1, min(tile_h, H)))
    nT = -(-H // tile_h)                       # ceil
    H_pad = nT * tile_h

    Lt = (tile_h + 2) * W_pad
    Lout = tile_h * W_pad

    # NCHW -> zero-padded NHWC, then per-tile row windows with a duplicated
    # 1-row halo (pure layout plumbing in XLA).  Halo rows of interior tiles
    # carry real neighbor data, so project_in must (and does) run on them.
    x_nhwc = jnp.transpose(x_nchw, (0, 2, 3, 1))
    x_p = jnp.pad(x_nhwc, ((0, 0), (1, 1 + H_pad - H), (0, W_pad - W), (0, 0)))
    x_tiles = jnp.stack(
        [x_p[:, t * tile_h: t * tile_h + tile_h + 2] for t in range(nT)], axis=1)
    x_tok = x_tiles.reshape(N, nT, Lt, C).astype(jnp.bfloat16)

    # Conv weights -> matmul weights (channels-last); bf16 for MXU inputs,
    # depthwise taps in the per-generation compute dtype.
    w_in_mat = jnp.transpose(w_proj_in[:, :, 0, 0], (1, 0)).astype(jnp.bfloat16)       # (C, 2HD)
    w_dw_mat = jnp.transpose(w_dw[:, 0].reshape(C2, 9), (1, 0)).astype(compute_dtype)  # (9, 2HD)
    w_out_mat = jnp.transpose(w_proj_out[:, :, 0, 0], (1, 0)).astype(jnp.bfloat16)     # (HD, C)

    kernel = _make_kernel(tile_h, W_pad, HD, compute_dtype)

    out_tok = pl.pallas_call(
        kernel,
        out_shape=jax.ShapeDtypeStruct((N, nT, Lout, C), x_nchw.dtype),
        grid_spec=pltpu.PrefetchScalarGridSpec(
            num_scalar_prefetch=0,
            grid=(N, nT),
            in_specs=[
                # If the x DMA ever becomes exposed after tiling, bump this
                # spec to pipeline_mode=pl.Buffered(3).
                pl.BlockSpec((1, 1, Lt, C), lambda n, t: (n, t, 0, 0)),
                # Constant index maps: the pipeliner keeps the weights resident
                # (no per-step re-DMA); their VMEM footprint is negligible.
                pl.BlockSpec((C, C2), lambda n, t: (0, 0)),
                pl.BlockSpec((9, C2), lambda n, t: (0, 0)),
                pl.BlockSpec((HD, C), lambda n, t: (0, 0)),
            ],
            out_specs=pl.BlockSpec((1, 1, Lout, C), lambda n, t: (n, t, 0, 0)),
            scratch_shapes=[pltpu.VMEM((3, Lt, C2), store_dtype)],
        ),
        compiler_params=pltpu.CompilerParams(
            dimension_semantics=("parallel", "parallel"),
            vmem_limit_bytes=vmem_limit,
        ),
    )(x_tok, w_in_mat, w_dw_mat, w_out_mat)

    # Strip pad columns / pad rows, back to NCHW.
    out = out_tok.reshape(N, nT, tile_h, W_pad, C)[:, :, :, :W, :]
    out = out.reshape(N, H_pad, W, C)[:, :H]
    return jnp.transpose(out, (0, 3, 1, 2))


def feedforward_reference(x_nchw, w_proj_in, w_dw, w_proj_out):
    """Pure-JAX reference matching the PyTorch module semantics (erf GELU)."""
    C2 = w_proj_in.shape[0]
    dn = ("NCHW", "OIHW", "NCHW")
    y = lax.conv_general_dilated(x_nchw, w_proj_in, (1, 1), "VALID",
                                 dimension_numbers=dn,
                                 precision=lax.Precision.HIGHEST)
    y = lax.conv_general_dilated(y, w_dw, (1, 1), ((1, 1), (1, 1)),
                                 dimension_numbers=dn,
                                 feature_group_count=C2,
                                 precision=lax.Precision.HIGHEST)
    x1, x2 = jnp.split(y, 2, axis=1)
    g = jax.nn.gelu(x1, approximate=False) * x2
    return lax.conv_general_dilated(g, w_proj_out, (1, 1), "VALID",
                                    dimension_numbers=dn,
                                    precision=lax.Precision.HIGHEST)


if __name__ == "__main__":
    dim, expand_factor = 4, 4
    hidden = dim * expand_factor           # 16
    N, H, W = 2, 16, 16

    key = jax.random.PRNGKey(0)
    kx, k1, k2, k3 = jax.random.split(key, 4)
    x = jax.random.normal(kx, (N, dim, H, W), dtype=jnp.float32)
    # Deterministic synthetic parameters (module shapes, bias=False everywhere).
    w_proj_in = 0.3 * jax.random.normal(k1, (2 * hidden, dim, 1, 1), dtype=jnp.float32)
    w_dw = 0.3 * jax.random.normal(k2, (2 * hidden, 1, 3, 3), dtype=jnp.float32)
    w_proj_out = 0.3 * jax.random.normal(k3, (dim, hidden, 1, 1), dtype=jnp.float32)

    ref = feedforward_reference(x, w_proj_in, w_dw, w_proj_out)

    # (a) auto tile size (single tile at this small H), and
    # (b) forced tile_h=6 to exercise multi-tile halos + the H-padding path.
    for th in (None, 6):
        out = feedforward_pallas(x, w_proj_in, w_dw, w_proj_out, tile_h=th)
        out = jax.block_until_ready(out)
        assert out.shape == ref.shape == (N, dim, H, W)
        # Tolerance covers bf16 matmul inputs, bf16 dconv/gating (v6e/v7x) and
        # tanh-form GELU vs exact erf GELU.
        max_err = float(jnp.max(jnp.abs(out - ref)))
        assert max_err < 5e-2, f"tile_h={th}: mismatch vs reference, max abs err = {max_err}"
    print("KERNEL_OK")
</pallas_src>

<mosaic_0001>
module attributes {stable_mosaic.version = 11 : i64} {
  func.func @kernel(%arg0: i32, %arg1: i32, %arg2: memref<1x1x432x4xbf16, #tpu.memory_space<vmem>>, %arg3: memref<4x32xbf16, #tpu.memory_space<vmem>>, %arg4: memref<9x32xbf16, #tpu.memory_space<vmem>>, %arg5: memref<16x4xbf16, #tpu.memory_space<vmem>>, %arg6: memref<1x1x384x4xf32, #tpu.memory_space<vmem>>, %arg7: memref<3x432x32xbf16, #tpu.memory_space<vmem>>) attributes {dimension_semantics = [#tpu.dimension_semantics<parallel>, #tpu.dimension_semantics<parallel>], iteration_bounds = array<i64: 2, 1>, scalar_prefetch = 0 : i64, scratch_operands = 1 : i64, tpu.core_type = #tpu.core_type<tc>, window_params = [{transform_indices = @transform_0, window_bounds = array<i64: 1, 1, 432, 4>}, {pipeline_mode = #tpu.pipeline_mode<synchronous>, transform_indices = @transform_1, window_bounds = array<i64: 4, 32>}, {pipeline_mode = #tpu.pipeline_mode<synchronous>, transform_indices = @transform_2, window_bounds = array<i64: 9, 32>}, {pipeline_mode = #tpu.pipeline_mode<synchronous>, transform_indices = @transform_3, window_bounds = array<i64: 16, 4>}, {transform_indices = @transform_4, window_bounds = array<i64: 1, 1, 384, 4>}]} {
    %c0 = arith.constant 0 : index
    %c0_0 = arith.constant 0 : index
    %c0_1 = arith.constant 0 : index
    %c0_2 = arith.constant 0 : index
    %0 = vector.load %arg2[%c0, %c0_0, %c0_1, %c0_2] : memref<1x1x432x4xbf16, #tpu.memory_space<vmem>>, vector<1x1x432x4xbf16>
    %1 = vector.shape_cast %0 : vector<1x1x432x4xbf16> to vector<432x4xbf16>
    %c0_3 = arith.constant 0 : index
    %c0_4 = arith.constant 0 : index
    %2 = vector.load %arg3[%c0_3, %c0_4] : memref<4x32xbf16, #tpu.memory_space<vmem>>, vector<4x32xbf16>
    %cst = arith.constant dense<0.000000e+00> : vector<432x32xf32>
    %3 = tpu.matmul %1, %2, %cst {dimension_numbers = #tpu.dot_dimension_numbers<[1], [0], [0], [1], [0, 0, 1, 1], [], []>} : vector<432x4xbf16>, vector<4x32xbf16>, vector<432x32xf32> -> vector<432x32xf32>
    %4 = arith.truncf %3 : vector<432x32xf32> to vector<432x32xbf16>
    %c0_5 = arith.constant 0 : index
    %c0_6 = arith.constant 0 : index
    %c0_7 = arith.constant 0 : index
    %5 = vector.load %arg7[%c0_5, %c0_6, %c0_7] : memref<3x432x32xbf16, #tpu.memory_space<vmem>>, vector<1x432x32xbf16>
    %6 = vector.shape_cast %5 : vector<1x432x32xbf16> to vector<432x32xbf16>
    %7 = vector.shape_cast %4 : vector<432x32xbf16> to vector<1x432x32xbf16>
    tpu.vector_store %arg7[%c0_5, %c0_6, %c0_7], %7 {strides = array<i32>} : memref<3x432x32xbf16, #tpu.memory_space<vmem>>, vector<1x432x32xbf16>,
    %c1_i32 = arith.constant 1 : i32
    %8 = tpu.dynamic_rotate %3 by %c1_i32 dim 0 : vector<432x32xf32>, i32 -> vector<432x32xf32>
    %9 = arith.truncf %8 : vector<432x32xf32> to vector<432x32xbf16>
    %c1 = arith.constant 1 : index
    %c0_8 = arith.constant 0 : index
    %c0_9 = arith.constant 0 : index
    %10 = vector.load %arg7[%c1, %c0_8, %c0_9] : memref<3x432x32xbf16, #tpu.memory_space<vmem>>, vector<1x432x32xbf16>
    %11 = vector.shape_cast %10 : vector<1x432x32xbf16> to vector<432x32xbf16>
    %12 = vector.shape_cast %9 : vector<432x32xbf16> to vector<1x432x32xbf16>
    tpu.vector_store %arg7[%c1, %c0_8, %c0_9], %12 {strides = array<i32>} : memref<3x432x32xbf16, #tpu.memory_space<vmem>>, vector<1x432x32xbf16>,
    %c431_i32 = arith.constant 431 : i32
    %13 = tpu.dynamic_rotate %3 by %c431_i32 dim 0 : vector<432x32xf32>, i32 -> vector<432x32xf32>
    %14 = arith.truncf %13 : vector<432x32xf32> to vector<432x32xbf16>
    %c2 = arith.constant 2 : index
    %c0_10 = arith.constant 0 : index
    %c0_11 = arith.constant 0 : index
    %15 = vector.load %arg7[%c2, %c0_10, %c0_11] : memref<3x432x32xbf16, #tpu.memory_space<vmem>>, vector<1x432x32xbf16>
    %16 = vector.shape_cast %15 : vector<1x432x32xbf16> to vector<432x32xbf16>
    %17 = vector.shape_cast %14 : vector<432x32xbf16> to vector<1x432x32xbf16>
    tpu.vector_store %arg7[%c2, %c0_10, %c0_11], %17 {strides = array<i32>} : memref<3x432x32xbf16, #tpu.memory_space<vmem>>, vector<1x432x32xbf16>,
    %c0_12 = arith.constant 0 : index
    %c0_13 = arith.constant 0 : index
    %18 = vector.load %arg4[%c0_12, %c0_13] : memref<9x32xbf16, #tpu.memory_space<vmem>>, vector<9x32xbf16>
    %c1_14 = arith.constant 1 : index
    %c0_15 = arith.constant 0 : index
    %c0_16 = arith.constant 0 : index
    %19 = vector.load %arg7[%c1_14, %c0_15, %c0_16] : memref<3x432x32xbf16, #tpu.memory_space<vmem>>, vector<1x384x32xbf16>
    %20 = vector.shape_cast %19 : vector<1x384x32xbf16> to vector<384x32xbf16>
    %21 = vector.extract_strided_slice %18 {offsets = [0, 0], sizes = [1, 32], strides = [1, 1]} : vector<9x32xbf16> to vector<1x32xbf16>
    %22 = vector.broadcast %21 : vector<1x32xbf16> to vector<384x32xbf16>
    %23 = arith.mulf %20, %22 : vector<384x32xbf16>
    %c0_17 = arith.constant 0 : index
    %c0_18 = arith.constant 0 : index
    %c0_19 = arith.constant 0 : index
    %24 = vector.load %arg7[%c0_17, %c0_18, %c0_19] : memref<3x432x32xbf16, #tpu.memory_space<vmem>>, vector<1x384x32xbf16>
    %25 = vector.shape_cast %24 : vector<1x384x32xbf16> to vector<384x32xbf16>
    %26 = vector.extract_strided_slice %18 {offsets = [1, 0], sizes = [1, 32], strides = [1, 1]} : vector<9x32xbf16> to vector<1x32xbf16>
    %27 = vector.broadcast %26 : vector<1x32xbf16> to vector<384x32xbf16>
    %28 = arith.mulf %25, %27 : vector<384x32xbf16>
    %29 = arith.addf %23, %28 : vector<384x32xbf16>
    %c2_20 = arith.constant 2 : index
    %c0_21 = arith.constant 0 : index
    %c0_22 = arith.constant 0 : index
    %30 = vector.load %arg7[%c2_20, %c0_21, %c0_22] : memref<3x432x32xbf16, #tpu.memory_space<vmem>>, vector<1x384x32xbf16>
    %31 = vector.shape_cast %30 : vector<1x384x32xbf16> to vector<384x32xbf16>
    %32 = vector.extract_strided_slice %18 {offsets = [2, 0], sizes = [1, 32], strides = [1, 1]} : vector<9x32xbf16> to vector<1x32xbf16>
    %33 = vector.broadcast %32 : vector<1x32xbf16> to vector<384x32xbf16>
    %34 = arith.mulf %31, %33 : vector<384x32xbf16>
    %35 = arith.addf %29, %34 : vector<384x32xbf16>
    %c1_23 = arith.constant 1 : index
    %c24 = arith.constant 24 : index
    %c0_24 = arith.constant 0 : index
    %36 = vector.load %arg7[%c1_23, %c24, %c0_24] : memref<3x432x32xbf16, #tpu.memory_space<vmem>>, vector<1x384x32xbf16>
    %37 = vector.shape_cast %36 : vector<1x384x32xbf16> to vector<384x32xbf16>
    %38 = vector.extract_strided_slice %18 {offsets = [3, 0], sizes = [1, 32], strides = [1, 1]} : vector<9x32xbf16> to vector<1x32xbf16>
    %39 = vector.broadcast %38 : vector<1x32xbf16> to vector<384x32xbf16>
    %40 = arith.mulf %37, %39 : vector<384x32xbf16>
    %41 = arith.addf %35, %40 : vector<384x32xbf16>
    %c0_25 = arith.constant 0 : index
    %c24_26 = arith.constant 24 : index
    %c0_27 = arith.constant 0 : index
    %42 = vector.load %arg7[%c0_25, %c24_26, %c0_27] : memref<3x432x32xbf16, #tpu.memory_space<vmem>>, vector<1x384x32xbf16>
    %43 = vector.shape_cast %42 : vector<1x384x32xbf16> to vector<384x32xbf16>
    %44 = vector.extract_strided_slice %18 {offsets = [4, 0], sizes = [1, 32], strides = [1, 1]} : vector<9x32xbf16> to vector<1x32xbf16>
    %45 = vector.broadcast %44 : vector<1x32xbf16> to vector<384x32xbf16>
    %46 = arith.mulf %43, %45 : vector<384x32xbf16>
    %47 = arith.addf %41, %46 : vector<384x32xbf16>
    %c2_28 = arith.constant 2 : index
    %c24_29 = arith.constant 24 : index
    %c0_30 = arith.constant 0 : index
    %48 = vector.load %arg7[%c2_28, %c24_29, %c0_30] : memref<3x432x32xbf16, #tpu.memory_space<vmem>>, vector<1x384x32xbf16>
    %49 = vector.shape_cast %48 : vector<1x384x32xbf16> to vector<384x32xbf16>
    %50 = vector.extract_strided_slice %18 {offsets = [5, 0], sizes = [1, 32], strides = [1, 1]} : vector<9x32xbf16> to vector<1x32xbf16>
    %51 = vector.broadcast %50 : vector<1x32xbf16> to vector<384x32xbf16>
    %52 = arith.mulf %49, %51 : vector<384x32xbf16>
    %53 = arith.addf %47, %52 : vector<384x32xbf16>
    %c1_31 = arith.constant 1 : index
    %c48 = arith.constant 48 : index
    %c0_32 = arith.constant 0 : index
    %54 = vector.load %arg7[%c1_31, %c48, %c0_32] : memref<3x432x32xbf16, #tpu.memory_space<vmem>>, vector<1x384x32xbf16>
    %55 = vector.shape_cast %54 : vector<1x384x32xbf16> to vector<384x32xbf16>
    %56 = vector.extract_strided_slice %18 {offsets = [6, 0], sizes = [1, 32], strides = [1, 1]} : vector<9x32xbf16> to vector<1x32xbf16>
    %57 = vector.broadcast %56 : vector<1x32xbf16> to vector<384x32xbf16>
    %58 = arith.mulf %55, %57 : vector<384x32xbf16>
    %59 = arith.addf %53, %58 : vector<384x32xbf16>
    %c0_33 = arith.constant 0 : index
    %c48_34 = arith.constant 48 : index
    %c0_35 = arith.constant 0 : index
    %60 = vector.load %arg7[%c0_33, %c48_34, %c0_35] : memref<3x432x32xbf16, #tpu.memory_space<vmem>>, vector<1x384x32xbf16>
    %61 = vector.shape_cast %60 : vector<1x384x32xbf16> to vector<384x32xbf16>
    %62 = vector.extract_strided_slice %18 {offsets = [7, 0], sizes = [1, 32], strides = [1, 1]} : vector<9x32xbf16> to vector<1x32xbf16>
    %63 = vector.broadcast %62 : vector<1x32xbf16> to vector<384x32xbf16>
    %64 = arith.mulf %61, %63 : vector<384x32xbf16>
    %65 = arith.addf %59, %64 : vector<384x32xbf16>
    %c2_36 = arith.constant 2 : index
    %c48_37 = arith.constant 48 : index
    %c0_38 = arith.constant 0 : index
    %66 = vector.load %arg7[%c2_36, %c48_37, %c0_38] : memref<3x432x32xbf16, #tpu.memory_space<vmem>>, vector<1x384x32xbf16>
    %67 = vector.shape_cast %66 : vector<1x384x32xbf16> to vector<384x32xbf16>
    %68 = vector.extract_strided_slice %18 {offsets = [8, 0], sizes = [1, 32], strides = [1, 1]} : vector<9x32xbf16> to vector<1x32xbf16>
    %69 = vector.broadcast %68 : vector<1x32xbf16> to vector<384x32xbf16>
    %70 = arith.mulf %67, %69 : vector<384x32xbf16>
    %71 = arith.addf %65, %70 : vector<384x32xbf16>
    %72 = vector.extract_strided_slice %71 {offsets = [0, 0], sizes = [384, 16], strides = [1, 1]} : vector<384x32xbf16> to vector<384x16xbf16>
    %cst_39 = arith.constant 5.000000e-01 : bf16
    %73 = vector.broadcast %cst_39 : bf16 to vector<384x16xbf16>
    %74 = arith.mulf %73, %72 : vector<384x16xbf16>
    %cst_40 = arith.constant 4.467770e-02 : bf16
    %75 = vector.broadcast %cst_40 : bf16 to vector<384x16xbf16>
    %76 = arith.mulf %75, %72 : vector<384x16xbf16>
    %77 = arith.mulf %76, %72 : vector<384x16xbf16>
    %78 = arith.mulf %77, %72 : vector<384x16xbf16>
    %79 = arith.addf %72, %78 : vector<384x16xbf16>
    %cst_41 = arith.constant 7.968750e-01 : bf16
    %80 = vector.broadcast %cst_41 : bf16 to vector<384x16xbf16>
    %81 = arith.mulf %80, %79 : vector<384x16xbf16>
    %82 = math.tanh %81 : vector<384x16xbf16>
    %cst_42 = arith.constant 1.000000e+00 : bf16
    %83 = vector.broadcast %cst_42 : bf16 to vector<384x16xbf16>
    %84 = arith.addf %83, %82 : vector<384x16xbf16>
    %85 = arith.mulf %74, %84 : vector<384x16xbf16>
    %86 = vector.extract_strided_slice %71 {offsets = [0, 16], sizes = [384, 16], strides = [1, 1]} : vector<384x32xbf16> to vector<384x16xbf16>
    %87 = arith.mulf %85, %86 : vector<384x16xbf16>
    %c0_43 = arith.constant 0 : index
    %c0_44 = arith.constant 0 : index
    %88 = vector.load %arg5[%c0_43, %c0_44] : memref<16x4xbf16, #tpu.memory_space<vmem>>, vector<16x4xbf16>
    %cst_45 = arith.constant dense<0.000000e+00> : vector<384x4xf32>
    %89 = tpu.matmul %87, %88, %cst_45 {dimension_numbers = #tpu.dot_dimension_numbers<[1], [0], [0], [1], [0, 0, 1, 1], [], []>} : vector<384x16xbf16>, vector<16x4xbf16>, vector<384x4xf32> -> vector<384x4xf32>
    %c0_46 = arith.constant 0 : index
    %c0_47 = arith.constant 0 : index
    %c0_48 = arith.constant 0 : index
    %c0_49 = arith.constant 0 : index
    %90 = vector.load %arg6[%c0_46, %c0_47, %c0_48, %c0_49] : memref<1x1x384x4xf32, #tpu.memory_space<vmem>>, vector<1x1x384x4xf32>
    %91 = vector.shape_cast %90 : vector<1x1x384x4xf32> to vector<384x4xf32>
    %92 = vector.shape_cast %89 : vector<384x4xf32> to vector<1x1x384x4xf32>
    tpu.vector_store %arg6[%c0_46, %c0_47, %c0_48, %c0_49], %92 {strides = array<i32>} : memref<1x1x384x4xf32, #tpu.memory_space<vmem>>, vector<1x1x384x4xf32>,
    return
  }
  func.func @transform_0(%arg0: i32, %arg1: i32) -> (i32, i32, i32, i32) {
    %c0_i32 = arith.constant 0 : i32
    %c0_i32_0 = arith.constant 0 : i32
    %c0_i32_1 = arith.constant 0 : i32
    return %arg0, %arg1, %c0_i32, %c0_i32_0 : i32, i32, i32, i32
  }
  func.func @transform_1(%arg0: i32, %arg1: i32) -> (i32, i32) {
    %c0_i32 = arith.constant 0 : i32
    %c0_i32_0 = arith.constant 0 : i32
    %c0_i32_1 = arith.constant 0 : i32
    return %c0_i32, %c0_i32_0 : i32, i32
  }
  func.func @transform_2(%arg0: i32, %arg1: i32) -> (i32, i32) {
    %c0_i32 = arith.constant 0 : i32
    %c0_i32_0 = arith.constant 0 : i32
    %c0_i32_1 = arith.constant 0 : i32
    return %c0_i32, %c0_i32_0 : i32, i32
  }
  func.func @transform_3(%arg0: i32, %arg1: i32) -> (i32, i32) {
    %c0_i32 = arith.constant 0 : i32
    %c0_i32_0 = arith.constant 0 : i32
    %c0_i32_1 = arith.constant 0 : i32
    return %c0_i32, %c0_i32_0 : i32, i32
  }
  func.func @transform_4(%arg0: i32, %arg1: i32) -> (i32, i32, i32, i32) {
    %c0_i32 = arith.constant 0 : i32
    %c0_i32_0 = arith.constant 0 : i32
    %c0_i32_1 = arith.constant 0 : i32
    return %arg0, %arg1, %c0_i32, %c0_i32_0 : i32, i32, i32, i32
  }
}

</mosaic_0001>

<bundles_post_ra>
// kernel: tpu_custom_call.1
= control target key start
LH: loop header
LB: loop body
LE: loop exit
PB: predicated region body
PF: predicated region fallthrough
CT: control target
= control target key end

     0   :  { %9 = vsyncpa [#allocation4], 0  ;;  %s5535_s0 = inlined_call_operand.hbm [shape: bf16[2,1,432,4], index: 0, kind: input, shape index: {}]   ;;  %s5536_s1 = inlined_call_operand.hbm [shape: bf16[4,32], index: 1, kind: input, shape index: {}]   ;;  %s5537_s2 = inlined_call_operand.hbm [shape: bf16[9,32], index: 2, kind: input, shape index: {}]   ;;  %s5538_s3 = inlined_call_operand.hbm [shape: bf16[16,4], index: 3, kind: input, shape index: {}]   ;;  %s5539_s4 = inlined_call_operand.hbm [shape: f32[2,1,384,4], index: 4, kind: output, shape index: {}]  }
   0x1   :  { %11 = vsyncpa [#allocation4 + $0x1], 0 }
   0x2   :  { %12 = vsyncpa [#allocation7], 0 }
   0x3   :  { %13 = vsyncpa [#allocation10], 0 }
   0x4   :  { %14 = vsyncpa [#allocation5], 0 }
   0x5   :  { %16 = vsyncpa [#allocation5 + $0x1], 0  ;;  %s3586_s15 = smov 0   ;;  %s3588_s16 = smov 0  }
   0x6   :  { %s3590_s17 = smov 0   ;;  %s3592_s18 = smov 0  }
   0x7   :  { %s3594_s19 = smov 0   ;;  %s3596_s20 = smov 0  }
   0x8 LB: > { %s2853_s21 = sadd.s32 4294967295, %s3547_s20   ;;  %s2854_s22 = sadd.s32 4294967294, %s3547_s20   ;;  %s3547_s20 = sphi %s3596_s20, %s22_s20   ;;  %s3543_s19 = sphi %s3594_s19, %s5591_s19   ;;  %s3539_s18 = sphi %s3592_s18, %s5590_s18   ;;  %s3535_s17 = sphi %s3590_s17, %s5589_s17   ;;  %s3531_s16 = sphi %s3588_s16, %s5588_s16   ;;  %s3527_s15 = sphi %s3586_s15, %s5587_s15  }
   0x9   : > { %p56_p0 = scmp.ne.s32.totalorder %s3531_s16, %s3527_s15  ;;  %p3620_p1 = scmp.eq.s32.totalorder %s2853_s21, 0 }
   0xa   : > { %p3624_p2 = scmp.eq.s32.totalorder %s2853_s21, 1  ;;  %p151_p3 = scmp.eq.s32.totalorder %s2854_s22, 1 }
   0xb   : > { %s5554_s23 = scalar_select %p3620_p1, 1, 0 }
   0xc   : > { %s5555_s24 = scalar_select %p3624_p2, 1, 0 }
   0xd   : > { %p3630_p4 = por %p3620_p1, %p56_p0  ;;  %p2855_p5 = scmp.ge.s32.totalorder %s3547_s20, 1 }
   0xe   : > { %p3635_p6 = por %p151_p3, %p56_p0  ;;  %p158_p7 = scmp.lt.s32.totalorder %s3547_s20, 3 }
   0xf   : > { %s5556_s25 = scalar_select %p3630_p4, 1, 0 }
  0x10   : > { %s5557_s26 = scalar_select %p3635_p6, 1, 0 }
  0x11   : > { %p3640_p8 = pnand %p2855_p5, %p158_p7  ;;  %s3549_s28 = smov [#allocation6]  }
  0x12   : > { %s171_s29 = sshll.u32 %s3549_s28, 4  ;;  %s3550_s30 = smov [#allocation8]   ;;  %s172_s29 = int_to_ptr.vmem [resolvable:$true] %s171_s29 }
  0x13   : > { %s5558_s27 = scalar_select %p3640_p8, 1, 0 }
  0x14   : > { %p3183_p10 = pneg %p3640_p8  ;;  %s181_s5 = sshll.u32 %s3550_s30, 4  ;;  %s3653_s5 = int_to_ptr.vmem [resolvable:$true] %s181_s5 }
  0x15   : > { %s3551_s7 = smov [#allocation9]   ;;  %s3343_s11 = scalar_lea.hbm %s5536_s1, 32 }
  0x16   : > { %p3649_p11 = pnand %p3183_p10, %p3620_p1  ;;  %s3655_s8 = sshll.u32 %s3551_s7, 4  ;;  %s195_s8 = int_to_ptr.vmem [resolvable:$true] %s3655_s8 }
  0x17   : > { %p3344_p12 = scmp.ne.s32.totalorder %s5536_s1, %s3343_s11  ;;  %p3350_p5 = scmp.lt.u32.totalorder %s3343_s11, %s5536_s1 }
  0x18   : > { %p3665_p13 = pneg %p3649_p11 }
  0x1a   : > { %p3346_p0 = pnand %p3665_p13, %p3344_p12 }
  0x1c   : > { %p3347_p3 = pneg %p3346_p0 }
  0x1e   : > { %p3352_p7 = pnand %p3350_p5, %p3347_p3 }
  0x20   : > { %3355 = shalt.err (!%p3352_p7)
}
  0x21   : > { %s3356_s28 = scalar_lea.vmem %s172_s29, 32  ;;  %p3364_p1 = scmp.lt.s32.totalorder %s172_s29, %s172_s29 }
  0x22   : > { %p3357_p10 = scmp.ne.s32.totalorder %s172_s29, %s3356_s28  ;;  %p3365_p4 = scmp.lt.s32.totalorder %s3356_s28, %s3356_s28 }
  0x24   : > { %p3359_p9 = pnand %p3357_p10, %p3665_p13  ;;  %p3366_p8 = por %p3365_p4, %p3364_p1 }
  0x26   : > { %p3360_p6 = pneg %p3359_p9 }
  0x28   : > { %p3367_p2 = pnand %p3366_p8, %p3360_p6 }
  0x2a   : > { %3370 = shalt.err (!%p3367_p2)
}
  0x2b   : > { %3186 = dma.hbm_to_vmem [thread:$0]  (!%p3649_p11), %s5536_s1, 32, %s172_s29, [#allocation7]  }
  0x2c   : > { %s3371_s11 = scalar_lea.hbm %s5537_s2, 128 }
  0x2d   : > { %p3372_p9 = scmp.ne.s32.totalorder %s5537_s2, %s3371_s11  ;;  %p3378_p2 = scmp.lt.u32.totalorder %s3371_s11, %s5537_s2 }
  0x2f   : > { %p3374_p12 = pnand %p3372_p9, %p3665_p13 }
  0x31   : > { %p3375_p1 = pneg %p3374_p12 }
  0x33   : > { %p3380_p4 = pnand %p3378_p2, %p3375_p1 }
  0x35   : > { %3383 = shalt.err (!%p3380_p4)
}
  0x36   : > { %s3384_s29 = scalar_lea.vmem %s3653_s5, 128  ;;  %p3392_p3 = scmp.lt.s32.totalorder %s3653_s5, %s3653_s5 }
  0x37   : > { %p3385_p6 = scmp.ne.s32.totalorder %s3653_s5, %s3384_s29  ;;  %p3393_p5 = scmp.lt.s32.totalorder %s3384_s29, %s3384_s29 }
  0x39   : > { %p3387_p8 = pnand %p3385_p6, %p3665_p13  ;;  %p3394_p7 = por %p3393_p5, %p3392_p3 }
  0x3b   : > { %p3388_p0 = pneg %p3387_p8 }
  0x3d   : > { %p3395_p10 = pnand %p3394_p7, %p3388_p0 }
  0x3f   : > { %3398 = shalt.err (!%p3395_p10)
}
  0x40   : > { %s5544_s28 = smov 64   ;;  %s5545_s30 = smov 4  }
  0x41   : > { %3189 = dma.hbm_to_vmem [thread:$0]  (!%p3649_p11), %s5537_s2, 128, %s3653_s5, [#allocation7], %s5544_s28, %s5544_s28, %s5545_s30  }
  0x42   : > { %s3399_s12 = scalar_lea.hbm %s5538_s3, 128 }
  0x43   : > { %p3400_p9 = scmp.ne.s32.totalorder %s5538_s3, %s3399_s12  ;;  %p3406_p2 = scmp.lt.u32.totalorder %s3399_s12, %s5538_s3 }
  0x45   : > { %p3402_p12 = pnand %p3400_p9, %p3665_p13 }
  0x47   : > { %p3403_p1 = pneg %p3402_p12 }
  0x49   : > { %p3408_p4 = pnand %p3406_p2, %p3403_p1 }
  0x4b   : > { %3411 = shalt.err (!%p3408_p4)
}
  0x4c   : > { %s3412_s7 = scalar_lea.vmem %s195_s8, 128  ;;  %p3420_p3 = scmp.lt.s32.totalorder %s195_s8, %s195_s8 }
  0x4d   : > { %p3413_p6 = scmp.ne.s32.totalorder %s195_s8, %s3412_s7  ;;  %p3421_p5 = scmp.lt.s32.totalorder %s3412_s7, %s3412_s7 }
  0x4f   : > { %p3415_p8 = pnand %p3413_p6, %p3665_p13  ;;  %p3422_p7 = por %p3421_p5, %p3420_p3 }
  0x51   : > { %p3416_p0 = pneg %p3415_p8 }
  0x53   : > { %p3423_p10 = pnand %p3422_p7, %p3416_p0 }
  0x55   : > { %3426 = shalt.err (!%p3423_p10)
}
  0x56   : > { %3192 = dma.hbm_to_vmem [thread:$0]  (!%p3649_p11), %s5538_s3, 128, %s195_s8, [#allocation10], %s5544_s28, %s5544_s28, %s5545_s30  }
  0x57   : > { %s43_s14 = sadd.s32 1, %s3535_s17  ;;  %s34_s6 = sadd.s32 1, %s3543_s19 }
  0x58   : > { %p50_p13 = scmp.ne.s32.totalorder %s3535_s17, %s3531_s16  ;;  %p36_p9 = scmp.ge.s32.totalorder %s34_s6, 2 }
  0x59   : > { %p51_p12 = scmp.eq.s32.totalorder %s3547_s20, 0  ;;  %p5561_p1 = scmp.ne.s32.totalorder %s5555_s24, 0 }
  0x5a   : > { %p3204_p4 = scmp.lt.s32.totalorder %s3547_s20, 2  ;;  %s5593_s6 = smov (%p36_p9, %s34_s6), 0 }
  0x5b   : > { %p3736_p2 = por %p5561_p1, %p50_p13  ;;  %p52_p6 = por %p51_p12, %p50_p13 }
  0x5c   : > { %s208_s11 = sand.u32 1, %s3535_s17   ;;  %s38_s12 = ssub.s32 %s3543_s19, %s5593_s6 }
  0x5d   : > { %p41_p8 = scmp.eq.s32.totalorder %s38_s12, 0  ;;  %s3162_s8 = smul.u32 216, %s208_s11 }
  0x5e   : > { %s3163_s13 = smul.u32 3456, %s3543_s19  ;;  %p3747_p11 = pnand %p3204_p4, %p52_p6 }
  0x5f   : > { %s3752_s24 = scalar_select %p41_p8, %s3535_s17, %s43_s14  }
  0x60   : > { %s3757_s7 = scalar_lea.hbm %s5535_s0, %s3163_s13  ;;  %s212_s5 = scalar_lea.vmem [#allocation3], %s3162_s8 }
  0x61   : > { %s221_s9 = sshll.u32 %s212_s5, 4  ;;  %s3761_s12 = scalar_lea.sflag [#allocation4], %s208_s11  ;;  %s3759_s9 = int_to_ptr.vmem [resolvable:$true] %s221_s9 }
  0x62   : > { %s3427_s28 = scalar_lea.hbm %s3757_s7, 3456  ;;  %p3429_p3 = pneg %p3747_p11 }
  0x63   : > { %p3428_p0 = scmp.ne.s32.totalorder %s3757_s7, %s3427_s28  ;;  %s3432_s22 = scalar_lea.hbm %s5535_s0, 6912 }
  0x64   : > { %p3433_p10 = scmp.lt.u32.totalorder %s3757_s7, %s5535_s0  ;;  %p3434_p13 = scmp.lt.u32.totalorder %s3432_s22, %s3427_s28 }
  0x65   : > { %p3430_p5 = pnand %p3429_p3, %p3428_p0  ;;  %p3436_p12 = scmp.lt.u32.totalorder %s3427_s28, %s3757_s7 }
  0x66   : > { %p3435_p9 = por %p3434_p13, %p3433_p10 }
  0x67   : > { %p3431_p7 = pneg %p3430_p5 }
  0x68   : > { %p3437_p1 = por %p3436_p12, %p3435_p9 }
  0x6a   : > { %p3438_p4 = pnand %p3437_p1, %p3431_p7 }
  0x6c   : > { %3441 = shalt.err (!%p3438_p4)
}
  0x6d   : > { %s3442_s11 = scalar_lea.vmem %s3759_s9, 3456  ;;  %s3554_s8 = smov [#allocation3]  }
  0x6e   : > { %p3443_p6 = scmp.ne.s32.totalorder %s3759_s9, %s3442_s11  ;;  %s3447_s5 = sshll.u32 %s3554_s8, 4  ;;  %s3448_s5 = int_to_ptr.vmem [resolvable:$false] %s3447_s5 }
  0x6f   : > { %s3449_s30 = scalar_lea.vmem %s3448_s5, 6912  ;;  %p3450_p5 = scmp.lt.s32.totalorder %s3759_s9, %s3448_s5 }
  0x70   : > { %p3445_p8 = pnand %p3443_p6, %p3429_p3  ;;  %p3451_p10 = scmp.lt.s32.totalorder %s3449_s30, %s3442_s11 }
  0x72   : > { %p3446_p0 = pneg %p3445_p8  ;;  %p3452_p13 = por %p3451_p10, %p3450_p5 }
  0x74   : > { %p3453_p9 = pnand %p3452_p13, %p3446_p0 }
  0x76   : > { %3456 = shalt.err (!%p3453_p9)
}
  0x77   : > { %s5564_s28 = smov 4   ;;  %s5565_s14 = smov 64  }
  0x78   : > { %3196 = dma.hbm_to_vmem [thread:$0]  (!%p3747_p11), %s3757_s7, 3456, %s3759_s9, %s3761_s12, %s5565_s14, %s5565_s14, %s5564_s28  }
  0x79   : > { %p5566_p3 = scmp.ne.s32.totalorder %s5558_s27, 0 }
  0x7b   : > { %233 = sbr.rel (%p5566_p3) target bundleno = 941 (0x3ad), region = 36 }
  0x82   : > { %s3795_s13 = sand.u32 1, %s3531_s16   ;;  %p5567_p7 = scmp.ne.s32.totalorder %s5556_s25, 0 }
  0x83   : > { %s3164_s22 = smul.u32 216, %s3795_s13  ;;  %s236_s29 = scalar_lea.sflag [#allocation4], %s3795_s13 }
  0x85   : > { %s3799_s11 = scalar_lea.vmem [#allocation3], %s3164_s22 }
  0x86   : > { %3510 = dma.done.wait (%p5567_p7), %s236_s29, 3456  }
  0x87   : > { %3512 = vsyncadd (%p5567_p7), %s236_s29, 4294963840  ;;  %p5568_p11 = scmp.ne.s32.totalorder %s5554_s23, 0 }
  0x89   : > { %3514 = dma.done.wait (%p5568_p11), [#allocation7], 160  }
  0x8a   : > { %3516 = vsyncadd (%p5568_p11), [#allocation7], 4294967136 }
  0x8b   : > { %3518 = dma.done.wait (%p5568_p11), [#allocation10], 128  }
  0x8c   : > { %3520 = vsyncadd (%p5568_p11), [#allocation10], 4294967168  ;;  %v3555_v0 = vmov 0.0   ;;  %vm3556_vm0 = vmmov 0   ;;  %vm553_vm1 = vcmask 1041408   ;;  %v3267_v3 = vld [vmem:[%s3799_s11] sm:$0xff]   ;;  %v915_v30 = vlaneseq }
  0x8d   : > { %3000 = vmatprep.subr.bf16.mxu0 %v3555_v0  ;;  %3160 = vmatprep.subr.bf16.mxu1 %v3555_v0  ;;  %v335_v1 = vld [vmem:[#allocation6] sm:$0x3]  ;;  %vm471_vm2 = vcmask 31744   ;;  %v3268_v4 = vld [vmem:[%s3799_s11 + $0xa0] sm:$0xff]   ;;  %v3269_v5 = vld [vmem:[%s3799_s11 + $0x8] sm:$0xff]   ;;  %vm833_vm3 = vcmask 261120  }
  0x8e   : > { %3002 = vmatprep.mubr.msk.bf16.mxu0 %vm3556_vm0, %v3555_v0  ;;  %3082 = vmatprep.mubr.msk.bf16.mxu1 %vm3556_vm0, %v3555_v0  ;;  %v555_v2 = vsel %vm553_vm1, %v335_v1, 0  ;;  %v3270_v6 = vld [vmem:[%s3799_s11 + $0xa8] sm:$0xff]   ;;  %v3271_v7 = vld [vmem:[%s3799_s11 + $0x10] sm:$0xff]   ;;  %v3273_v9 = vld [vmem:[%s3799_s11 + $0x18] sm:$0xff]   ;;  %v3923_v31 = vshrl.u32 %v915_v30, 7  ;;  %vm1460_vm6 = vcmask 1043456  }
  0x8f   : > { %3001 = vmatpush3.bf16.msra.mxu0 %v555_v2  ;;  %3161 = vmatpush3.bf16.msra.mxu1 %v555_v2  ;;  %v3272_v8 = vld [vmem:[%s3799_s11 + $0xb0] sm:$0xff]   ;;  %v3274_v10 = vld [vmem:[%s3799_s11 + $0xb8] sm:$0xff]   ;;  %v3275_v11 = vld [vmem:[%s3799_s11 + $0x20] sm:$0xff]   ;;  %s3557_s23 = smov 112   ;;  %vm2375_vm7 = vcmask 130048   ;;  %s3165_s25 = smul.u32 384, %s3795_s13 }
  0x90   : > { %v3276_v12 = vld [vmem:[%s3799_s11 + $0xc0] sm:$0xff]   ;;  %v3277_v13 = vld [vmem:[%s3799_s11 + $0x28] sm:$0xff]   ;;  %v3279_v15 = vld [vmem:[%s3799_s11 + $0x30] sm:$0xff]   ;;  %vm917_vm4 = vcmp.lt.s32.totalorder %v3923_v31, 1  ;;  %vm1081_vm5 = vcmp.lt.s32.totalorder %v3923_v31, 7  ;;  %v3956_v62 = vsub.s32 0, %v3923_v31 }
  0x91   : > { %v3278_v14 = vld [vmem:[%s3799_s11 + $0xc8] sm:$0xff]   ;;  %v3280_v16 = vld [vmem:[%s3799_s11 + $0xd0] sm:$0xff]   ;;  %v3281_v17 = vld [vmem:[%s3799_s11 + $0x38] sm:$0xff]   ;;  %s5381_s27 = scalar_lea.vmem [#allocation11], %s3165_s25  ;;  %s3166_s21 = smul.u32 6144, %s3539_s18 }
  0x92   : > { %3003 = vmatmul.mubr.msk.bf16.vlgmr.msra.gmra.mrb[0].mxu0 %vm471_vm2, %v3267_v3  ;;  %3083 = vmatmul.mubr.msk.bf16.vlgmr.msra.gmra.mrb[0].mxu1 %vm471_vm2, %v3268_v4  ;;  %v3282_v18 = vld [vmem:[%s3799_s11 + $0x40] sm:$0xff]   ;;  %v3283_v19 = vld [vmem:[%s3799_s11 + $0x48] sm:$0xff]   ;;  %v3284_v20 = vld [vmem:[%s3799_s11 + $0x50] sm:$0xff]   ;;  %s2737_s7 = sshll.u32 %s5381_s27, 4  ;;  %s2722_s18 = scalar_lea.sflag [#allocation5], %s3795_s13  ;;  %s5482_s7 = int_to_ptr.vmem [resolvable:$true] %s2737_s7 }
  0x93   : > { %3006 = vmatprep.mubr.msk.bf16.mxu0 %vm3556_vm0, %v3555_v0  ;;  %3086 = vmatprep.mubr.msk.bf16.mxu1 %vm3556_vm0, %v3555_v0  ;;  %v3285_v21 = vld [vmem:[%s3799_s11 + $0x58] sm:$0xff]   ;;  %v3286_v22 = vld [vmem:[%s3799_s11 + $0x60] sm:$0xff]   ;;  %v3287_v23 = vld [vmem:[%s3799_s11 + $0x68] sm:$0xff]   ;;  %s5478_s8 = scalar_lea.hbm %s5539_s4, %s3166_s21  ;;  %s3457_s5 = scalar_lea.vmem %s5482_s7, 6144 }
  0x94   : > { %v3288_v24 = vld [vmem:[%s3799_s11 + $0x70] sm:$0xff]   ;;  %v3289_v25 = vld [vmem:[%s3799_s11 + $0x78] sm:$0xff]   ;;  %v3290_v26 = vld [vmem:[%s3799_s11 + $0x80] sm:$0xff]   ;;  %p3458_p12 = scmp.ne.s32.totalorder %s5482_s7, %s3457_s5  ;;  %s3558_s30 = smov [#allocation11]  }
  0x95   : > { %v3291_v27 = vld [vmem:[%s3799_s11 + $0x88] sm:$0xff]   ;;  %v3292_v28 = vld [vmem:[%s3799_s11 + $0x90] sm:$0xff]   ;;  %v3293_v29 = vld [vmem:[%s3799_s11 + $0x98] sm:$0xff]   ;;  %s3461_s28 = sshll.u32 %s3558_s30, 4  ;;  %s3462_s28 = int_to_ptr.vmem [resolvable:$false] %s3461_s28 }
  0x96   : > { %v1191_v47 = vld [vmem:[#allocation8] sm:$0xf]  ;;  %p3459_p1 = pnand %p3458_p12, %p3736_p2  ;;  %s3463_s14 = scalar_lea.vmem %s3462_s28, 12288 }
  0x97   : > { %v1272_v54 = vshrl.u32 %v1191_v47, 16  ;;  %v3962_v3 = vpack.i.b16 %v1191_v47, %v1191_v47  ;;  %p3464_p6 = scmp.lt.s32.totalorder %s5482_s7, %s3462_s28  ;;  %p3465_p8 = scmp.lt.s32.totalorder %s3463_s14, %s3457_s5 }
  0x98   : > { %p3460_p4 = pneg %p3459_p1 }
  0x99   : > { %v3964_v4 = vpack.i.b16 %v1272_v54, %v1272_v54  ;;  %p3466_p0 = por %p3465_p8, %p3464_p6 }
  0x9a   : > { %3007 = vmatmul.mubr.msk.bf16.gmra.mrb[4].mxu0 %vm471_vm2, %v3269_v5  ;;  %3087 = vmatmul.mubr.msk.bf16.gmra.mrb[4].mxu1 %vm471_vm2, %v3270_v6 }
  0x9b   : > { %3010 = vmatprep.mubr.msk.bf16.mxu0 %vm3556_vm0, %v3555_v0  ;;  %3090 = vmatprep.mubr.msk.bf16.mxu1 %vm3556_vm0, %v3555_v0  ;;  %p3467_p5 = pnand %p3466_p0, %p3460_p4 }
  0xa2   : > { %3011 = vmatmul.mubr.msk.bf16.gmra.mrb[8].mxu0 %vm471_vm2, %v3271_v7  ;;  %3091 = vmatmul.mubr.msk.bf16.gmra.mrb[8].mxu1 %vm471_vm2, %v3272_v8 }
  0xa3   : > { %3014 = vmatprep.mubr.msk.bf16.mxu0 %vm3556_vm0, %v3555_v0  ;;  %3094 = vmatprep.mubr.msk.bf16.mxu1 %vm3556_vm0, %v3555_v0 }
  0xaa   : > { %3015 = vmatmul.mubr.msk.bf16.gmra.mrb[12].mxu0 %vm471_vm2, %v3273_v9  ;;  %3095 = vmatmul.mubr.msk.bf16.gmra.mrb[12].mxu1 %vm471_vm2, %v3274_v10 }
  0xab   : > { %3018 = vmatprep.mubr.msk.bf16.mxu0 %vm3556_vm0, %v3555_v0  ;;  %3098 = vmatprep.mubr.msk.bf16.mxu1 %vm3556_vm0, %v3555_v0 }
  0xb2   : > { %3019 = vmatmul.mubr.msk.bf16.gmra.mrb[16].mxu0 %vm471_vm2, %v3275_v11  ;;  %3099 = vmatmul.mubr.msk.bf16.gmra.mrb[16].mxu1 %vm471_vm2, %v3276_v12 }
  0xb3   : > { %3022 = vmatprep.mubr.msk.bf16.mxu0 %vm3556_vm0, %v3555_v0  ;;  %3102 = vmatprep.mubr.msk.bf16.mxu1 %vm3556_vm0, %v3555_v0 }
  0xba   : > { %3023 = vmatmul.mubr.msk.bf16.gmra.mrb[20].mxu0 %vm471_vm2, %v3277_v13  ;;  %3103 = vmatmul.mubr.msk.bf16.gmra.mrb[20].mxu1 %vm471_vm2, %v3278_v14 }
  0xbb   : > { %3026 = vmatprep.mubr.msk.bf16.mxu0 %vm3556_vm0, %v3555_v0  ;;  %3106 = vmatprep.mubr.msk.bf16.mxu1 %vm3556_vm0, %v3555_v0 }
  0xc2   : > { %3027 = vmatmul.mubr.msk.bf16.gmra.mrb[24].mxu0 %vm471_vm2, %v3279_v15  ;;  %3107 = vmatmul.mubr.msk.bf16.gmra.mrb[24].mxu1 %vm471_vm2, %v3280_v16 }
  0xc3   : > { %3030 = vmatprep.mubr.msk.bf16.mxu0 %vm3556_vm0, %v3555_v0 }
  0xca   : > { %3031 = vmatmul.mubr.msk.bf16.gmra.mrb[28].mxu0 %vm471_vm2, %v3281_v17 }
  0xcb   : > { %3034 = vmatprep.mubr.msk.bf16.mxu0 %vm3556_vm0, %v3555_v0 }
  0xd2   : > { %3035 = vmatmul.mubr.msk.bf16.gmra.mrb[32].mxu0 %vm471_vm2, %v3282_v18 }
  0xd3   : > { %3038 = vmatprep.mubr.msk.bf16.mxu0 %vm3556_vm0, %v3555_v0 }
  0xda   : > { %3039 = vmatmul.mubr.msk.bf16.gmra.mrb[36].mxu0 %vm471_vm2, %v3283_v19 }
  0xdb   : > { %3042 = vmatprep.mubr.msk.bf16.mxu0 %vm3556_vm0, %v3555_v0 }
  0xe2   : > { %3043 = vmatmul.mubr.msk.bf16.gmra.mrb[40].mxu0 %vm471_vm2, %v3284_v20 }
  0xe3   : > { %3046 = vmatprep.mubr.msk.bf16.mxu0 %vm3556_vm0, %v3555_v0 }
  0xea   : > { %3047 = vmatmul.mubr.msk.bf16.gmra.mrb[44].mxu0 %vm471_vm2, %v3285_v21 }
  0xeb   : > { %3050 = vmatprep.mubr.msk.bf16.mxu0 %vm3556_vm0, %v3555_v0 }
  0xf2   : > { %3051 = vmatmul.mubr.msk.bf16.gmra.mrb[48].mxu0 %vm471_vm2, %v3286_v22  ;;  %v1563_v22 = vsub.s32 2, %v3923_v31 }
  0xf3   : > { %3054 = vmatprep.mubr.msk.bf16.mxu0 %vm3556_vm0, %v3555_v0 }
  0xfa   : > { %3055 = vmatmul.mubr.msk.bf16.gmra.mrb[52].mxu0 %vm471_vm2, %v3287_v23 }
  0xfb   : > { %3058 = vmatprep.mubr.msk.bf16.mxu0 %vm3556_vm0, %v3555_v0 }
 0x102   : > { %3059 = vmatmul.mubr.msk.bf16.gmra.mrb[56].mxu0 %vm471_vm2, %v3288_v24 }
 0x103   : > { %3062 = vmatprep.mubr.msk.bf16.mxu0 %vm3556_vm0, %v3555_v0 }
 0x10a   : > { %3063 = vmatmul.mubr.msk.bf16.gmra.mrb[60].mxu0 %vm471_vm2, %v3289_v25 }
 0x10b   : > { %3066 = vmatprep.mubr.msk.bf16.mxu0 %vm3556_vm0, %v3555_v0 }
 0x112   : > { %3067 = vmatmul.mubr.msk.bf16.gmra.mrb[64].mxu0 %vm471_vm2, %v3290_v26 }
 0x113   : > { %3070 = vmatprep.mubr.msk.bf16.mxu0 %vm3556_vm0, %v3555_v0 }
 0x11a   : > { %3071 = vmatmul.mubr.msk.bf16.gmra.mrb[68].mxu0 %vm471_vm2, %v3291_v27 }
 0x11b   : > { %3074 = vmatprep.mubr.msk.bf16.mxu0 %vm3556_vm0, %v3555_v0 }
 0x122   : > { %3075 = vmatmul.mubr.msk.bf16.gmra.mrb[72].mxu0 %vm471_vm2, %v3292_v28  ;;  %v1353_v28 = vsub.s32 1, %v3923_v31 }
 0x123   : > { %3078 = vmatprep.mubr.msk.bf16.mxu0 %vm3556_vm0, %v3555_v0 }
 0x12a   : > { %3079 = vmatmul.mubr.msk.bf16.gmra.mrb[76].mxu0 %vm471_vm2, %v3293_v29 }
 0x165   : > { %v3925_v32 = vpop.f32.mrb[0].mxu0  ;;  %v3927_v33 = vpop.f32.mrb[0].mxu1 }
 0x166   : > { %5569 = vst [vmem:[#allocation16_spill] sm:$0xff] %v3927_v33  ;;  %v3004_v34 = vpop.f32.mrb[1].mxu0  ;;  %v3084_v35 = vpop.f32.mrb[1].mxu1  ;;  %v5549_v36 = vrot.slane %v3925_v32, 7  ;;  %v5548_v37 = vrot.slane %v3925_v32, 1  ;;  %v5547_v39 = vrot.slane %v3927_v33, 7 }
 0x167   : > { %v594_v38 = vpop.f32.mrb[2].mxu0  ;;  %v754_v40 = vpop.f32.mrb[2].mxu1  ;;  %v5546_v51 = vrot.slane %v3927_v33, 1 }
 0x168   : > { %v806_v41 = vpack.c.bf16 %v594_v38, %v3925_v32  ;;  %v862_v42 = vrot.slane %v594_v38, 7  ;;  %v1028_v43 = vrot.slane %v594_v38, 1  ;;  %v3005_v44 = vpop.f32.mrb[3].mxu0  ;;  %v826_v45 = vpack.c.bf16 %v754_v40, %v3927_v33  ;;  %v3085_v46 = vpop.f32.mrb[3].mxu1 }
 0x169   : > { %v902_v48 = vrot.slane %v754_v40, 7  ;;  %v1068_v53 = vrot.slane %v754_v40, 1  ;;  %v3997_v44 = vrot.slane %v3964_v4, %v1353_v28  ;;  %v1870_v46 = vsub.s32 3, %v3923_v31 }
 0x16a   : > { %834 = vst.msk [vmem:[#allocation2] sm:$0xff] %vm833_vm3, %v806_v41  ;;  %v3941_v49 = vsel %vm917_vm4, %v5549_v36, %v862_v42  ;;  %v1134_v50 = vsel %vm1081_vm5, %v5548_v37, %v1028_v43  ;;  %854 = vst.msk [vmem:[#allocation2 + $0xa0] sm:$0xff] %vm833_vm3, %v826_v45  ;;  %v4000_v45 = vrot.slane %v3962_v3, %v1563_v22 }
 0x16b   : > { %v3953_v52 = vsel %vm917_vm4, %v5547_v39, %v902_v48  ;;  %v1094_v0 = vsel %vm1081_vm5, %v5546_v51, %v1068_v53 }
 0x16c   : > { %5570 = vst [vmem:[#allocation17_spill] sm:$0xff] %v3953_v52 }
 0x16d   : > { %v599_v55 = vpop.f32.mrb[4].mxu0  ;;  %v759_v56 = vpop.f32.mrb[4].mxu1 }
 0x16e   : > { %v863_v57 = vrot.slane %v599_v55, 7  ;;  %v1029_v58 = vrot.slane %v599_v55, 1  ;;  %v3008_v59 = vpop.f32.mrb[5].mxu0  ;;  %v903_v60 = vrot.slane %v759_v56, 7  ;;  %v3088_v61 = vpop.f32.mrb[5].mxu1  ;;  %v1069_v1 = vrot.slane %v759_v56, 1 }
 0x16f   : > { %v602_v63 = vpop.f32.mrb[6].mxu0  ;;  %v762_v2 = vpop.f32.mrb[6].mxu1 }
 0x170   : > { %v969_v5 = vsel %vm917_vm4, %v862_v42, %v863_v57  ;;  %v1133_v6 = vsel %vm1081_vm5, %v1028_v43, %v1029_v58  ;;  %v807_v7 = vpack.c.bf16 %v602_v63, %v599_v55  ;;  %v864_v8 = vrot.slane %v602_v63, 7  ;;  %v3009_v9 = vpop.f32.mrb[7].mxu0  ;;  %v3089_v10 = vpop.f32.mrb[7].mxu1 }
 0x171   : > { %v1136_v11 = vpack.c.bf16 %v1133_v6, %v1134_v50  ;;  %v1030_v12 = vrot.slane %v602_v63, 1  ;;  %v929_v13 = vsel %vm917_vm4, %v902_v48, %v903_v60  ;;  %v1093_v14 = vsel %vm1081_vm5, %v1068_v53, %v1069_v1 }
 0x172   : > { %835 = vst.msk [vmem:[#allocation2 + $0x8] sm:$0xff] %vm833_vm3, %v807_v7  ;;  %v968_v15 = vsel %vm917_vm4, %v863_v57, %v864_v8  ;;  %v1156_v16 = vpack.c.bf16 %v1093_v14, %v1094_v0  ;;  %v827_v17 = vpack.c.bf16 %v762_v2, %v759_v56  ;;  %v904_v18 = vrot.slane %v762_v2, 7  ;;  %v1192_v56 = vld [vmem:[#allocation8 + $0x4] sm:$0x1] }
 0x173   : > { %1164 = vst.msk [vmem:[#allocation2 + $0x1b0] sm:$0xff] %vm833_vm3, %v1136_v11  ;;  %v973_v19 = vpack.c.bf16 %v968_v15, %v969_v5  ;;  %v1132_v20 = vsel %vm1081_vm5, %v1029_v58, %v1030_v12  ;;  %v1070_v21 = vrot.slane %v762_v2, 1  ;;  %v3994_v43 = vrot.slane %v3964_v4, %v3956_v62 }
 0x174   : > { %1184 = vst.msk [vmem:[#allocation2 + $0x250] sm:$0xff] %vm833_vm3, %v1156_v16  ;;  %855 = vst.msk [vmem:[#allocation2 + $0xa8] sm:$0xff] %vm833_vm3, %v827_v17  ;;  %v928_v23 = vsel %vm917_vm4, %v903_v60, %v904_v18  ;;  %v1977_v7 = vpack.i.b16 %v1192_v56, %v1192_v56  ;;  %v4026_v9 = vrot.slane %v3962_v3, %v3956_v62 }
 0x175   : > { %1001 = vst.msk [vmem:[#allocation2 + $0xe0] sm:$0xff] %vm833_vm3, %v973_v19  ;;  %v607_v24 = vpop.f32.mrb[8].mxu0  ;;  %v993_v25 = vpack.c.bf16 %v928_v23, %v929_v13  ;;  %v1092_v26 = vsel %vm1081_vm5, %v1069_v1, %v1070_v21  ;;  %v767_v27 = vpop.f32.mrb[8].mxu1  ;;  %v4029_v10 = vrot.slane %v3962_v3, %v1353_v28  ;;  %v4032_v11 = vrot.slane %v3964_v4, %v1563_v22 }
 0x176   : > { %v865_v29 = vrot.slane %v607_v24, 7  ;;  %v1031_v30 = vrot.slane %v607_v24, 1  ;;  %v3012_v34 = vpop.f32.mrb[9].mxu0  ;;  %v905_v35 = vrot.slane %v767_v27, 7  ;;  %v1071_v38 = vrot.slane %v767_v27, 1  ;;  %v3092_v40 = vpop.f32.mrb[9].mxu1 }
 0x177   : > { %v610_v41 = vpop.f32.mrb[10].mxu0  ;;  %1021 = vst.msk [vmem:[#allocation2 + $0x180] sm:$0xff] %vm833_vm3, %v993_v25  ;;  %v3990_v42 = vpop.f32.mrb[10].mxu1  ;;  %v4040_v19 = vrot.slane %v3962_v3, %v1870_v46 }
 0x178   : > { %v967_v47 = vsel %vm917_vm4, %v864_v8, %v865_v29  ;;  %v1131_v48 = vsel %vm1081_vm5, %v1030_v12, %v1031_v30  ;;  %v808_v50 = vpack.c.bf16 %v610_v41, %v607_v24  ;;  %v866_v53 = vrot.slane %v610_v41, 7  ;;  %v3013_v54 = vpop.f32.mrb[11].mxu0  ;;  %v3093_v55 = vpop.f32.mrb[11].mxu1  ;;  %v4034_v12 = vld [vmem:[#allocation2] sm:$0xff] }
 0x179   : > { %v1137_v57 = vpack.c.bf16 %v1131_v48, %v1132_v20  ;;  %v1032_v58 = vrot.slane %v610_v41, 1  ;;  %v927_v59 = vsel %vm917_vm4, %v904_v18, %v905_v35  ;;  %v1091_v60 = vsel %vm1081_vm5, %v1070_v21, %v1071_v38  ;;  %v1558_v14 = vld [vmem:[#allocation2 + $0x8] sm:$0xf0] }
 0x17a   : > { %836 = vst.msk [vmem:[#allocation2 + $0x10] sm:$0xff] %vm833_vm3, %v808_v50  ;;  %v966_v61 = vsel %vm917_vm4, %v865_v29, %v866_v53  ;;  %v1157_v63 = vpack.c.bf16 %v1091_v60, %v1092_v26  ;;  %v828_v0 = vpack.c.bf16 %v3990_v42, %v767_v27  ;;  %v906_v1 = vrot.slane %v3990_v42, 7 }
 0x17b   : > { %1165 = vst.msk [vmem:[#allocation2 + $0x1b8] sm:$0xff] %vm833_vm3, %v1137_v57  ;;  %v974_v2 = vpack.c.bf16 %v966_v61, %v967_v47  ;;  %v1130_v5 = vsel %vm1081_vm5, %v1031_v30, %v1032_v58  ;;  %v1072_v6 = vrot.slane %v3990_v42, 1  ;;  %v4043_v20 = vrot.slane %v3964_v4, %v1870_v46  ;;  %v4057_v46 = vld [vmem:[#allocation2 + $0x1b0] sm:$0xff] }
 0x17c   : > { %1185 = vst.msk [vmem:[#allocation2 + $0x258] sm:$0xff] %vm833_vm3, %v1157_v63  ;;  %856 = vst.msk [vmem:[#allocation2 + $0xb0] sm:$0xff] %vm833_vm3, %v828_v0  ;;  %v926_v8 = vsel %vm917_vm4, %v905_v35, %v906_v1  ;;  %v1403_v13 = vld [vmem:[#allocation2 + $0xe0] sm:$0xf0]  ;;  %v4047_v29 = vrot.slane %v1977_v7, %v3956_v62  ;;  %v1565_v4 = vmul.bf16 %v4000_v45, %v1558_v14 }
 0x17d   : > { %1002 = vst.msk [vmem:[#allocation2 + $0xe8] sm:$0xff] %vm833_vm3, %v974_v2  ;;  %v615_v15 = vpop.f32.mrb[12].mxu0  ;;  %v994_v16 = vpack.c.bf16 %v926_v8, %v927_v59  ;;  %v1090_v17 = vsel %vm1081_vm5, %v1071_v38, %v1072_v6  ;;  %v775_v18 = vpop.f32.mrb[12].mxu1  ;;  %v1410_v30 = vmul.bf16 %v3997_v44, %v1403_v13  ;;  %v4063_v54 = vld [vmem:[#allocation2 + $0xe0] sm:$0xff] }
 0x17e   : > { %v867_v21 = vrot.slane %v615_v15, 7  ;;  %v1033_v22 = vrot.slane %v615_v15, 1  ;;  %v3016_v23 = vpop.f32.mrb[13].mxu0  ;;  %v907_v24 = vrot.slane %v775_v18, 7  ;;  %v1073_v25 = vrot.slane %v775_v18, 1  ;;  %v3096_v26 = vpop.f32.mrb[13].mxu1 }
 0x17f   : > { %1022 = vst.msk [vmem:[#allocation2 + $0x188] sm:$0xff] %vm833_vm3, %v994_v16  ;;  %v618_v27 = vpop.f32.mrb[14].mxu0  ;;  %v778_v28 = vpop.f32.mrb[14].mxu1  ;;  %v1225_v7 = vmul.bf16 %v4026_v9, %v4063_v54 }
 0x180   : > { %v965_v34 = vsel %vm917_vm4, %v866_v53, %v867_v21  ;;  %v1129_v35 = vsel %vm1081_vm5, %v1032_v58, %v1033_v22  ;;  %v809_v38 = vpack.c.bf16 %v618_v27, %v615_v15  ;;  %v868_v40 = vrot.slane %v618_v27, 7  ;;  %v3017_v41 = vpop.f32.mrb[15].mxu0  ;;  %v3097_v42 = vpop.f32.mrb[15].mxu1  ;;  %v1249_v53 = vld [vmem:[#allocation2 + $0x8] sm:$0xff] }
 0x181   : > { %v1138_v62 = vpack.c.bf16 %v1129_v35, %v1130_v5  ;;  %v1034_v47 = vrot.slane %v618_v27, 1  ;;  %v925_v48 = vsel %vm917_vm4, %v906_v1, %v907_v24  ;;  %v1089_v50 = vsel %vm1081_vm5, %v1072_v6, %v1073_v25  ;;  %v4068_v59 = vld [vmem:[#allocation2 + $0x10] sm:$0xff] }
 0x182   : > { %837 = vst.msk [vmem:[#allocation2 + $0x18] sm:$0xff] %vm833_vm3, %v809_v38  ;;  %v964_v55 = vsel %vm917_vm4, %v867_v21, %v868_v40  ;;  %v1158_v56 = vpack.c.bf16 %v1089_v50, %v1090_v17  ;;  %v829_v57 = vpack.c.bf16 %v778_v28, %v775_v18  ;;  %v908_v58 = vrot.slane %v778_v28, 7  ;;  %v1712_v6 = vld [vmem:[#allocation2 + $0x1b8] sm:$0xf0] }
 0x183   : > { %1166 = vst.msk [vmem:[#allocation2 + $0x1c0] sm:$0xff] %vm833_vm3, %v1138_v62  ;;  %v975_v60 = vpack.c.bf16 %v964_v55, %v965_v34  ;;  %v1128_v61 = vsel %vm1081_vm5, %v1033_v22, %v1034_v47  ;;  %v1074_v63 = vrot.slane %v778_v28, 1  ;;  %v4079_v5 = vrot.slane %v1410_v30, 4  ;;  %v4105_v54 = vld [vmem:[#allocation2 + $0x1b8] sm:$0xff] }
 0x184   : > { %1186 = vst.msk [vmem:[#allocation2 + $0x260] sm:$0xff] %vm833_vm3, %v1158_v56  ;;  %857 = vst.msk [vmem:[#allocation2 + $0xb8] sm:$0xff] %vm833_vm3, %v829_v57  ;;  %v924_v1 = vsel %vm917_vm4, %v907_v24, %v908_v58  ;;  %v1195_v2 = vld [vmem:[#allocation2 + $0xe8] sm:$0xff]  ;;  %v1280_v8 = vmul.bf16 %v3994_v43, %v1249_v53  ;;  %v1281_v17 = vmul.bf16 %v3994_v43, %v4068_v59  ;;  %v4089_v18 = vrot.slane %v1565_v4, 4 }
 0x185   : > { %1003 = vst.msk [vmem:[#allocation2 + $0xf0] sm:$0xff] %vm833_vm3, %v975_v60  ;;  %v995_v13 = vpack.c.bf16 %v924_v1, %v925_v48  ;;  %v1088_v14 = vsel %vm1081_vm5, %v1073_v25, %v1074_v63  ;;  %v623_v15 = vpop.f32.mrb[16].mxu0  ;;  %v783_v16 = vpop.f32.mrb[16].mxu1  ;;  %v1226_v34 = vmul.bf16 %v4026_v9, %v1195_v2  ;;  %v1411_v25 = vmul.bf16 %v3997_v44, %v1195_v2 }
 0x186   : > { %v869_v21 = vrot.slane %v623_v15, 7  ;;  %v1035_v22 = vrot.slane %v623_v15, 1  ;;  %v909_v23 = vrot.slane %v783_v16, 7  ;;  %v1075_v24 = vrot.slane %v783_v16, 1  ;;  %v3020_v26 = vpop.f32.mrb[17].mxu0  ;;  %v3100_v27 = vpop.f32.mrb[17].mxu1 }
 0x187   : > { %1023 = vst.msk [vmem:[#allocation2 + $0x190] sm:$0xff] %vm833_vm3, %v995_v13  ;;  %v626_v28 = vpop.f32.mrb[18].mxu0  ;;  %v786_v30 = vpop.f32.mrb[18].mxu1  ;;  %v1566_v35 = vmul.bf16 %v4000_v45, %v4068_v59  ;;  %v1719_v4 = vmul.bf16 %v4032_v11, %v1712_v6  ;;  %v4129_v26 = vrot.slane %v1411_v25, 4 }
 0x188   : > { %v963_v38 = vsel %vm917_vm4, %v868_v40, %v869_v21  ;;  %v1127_v41 = vsel %vm1081_vm5, %v1034_v47, %v1035_v22  ;;  %v923_v42 = vsel %vm917_vm4, %v908_v58, %v909_v23  ;;  %v1087_v62 = vsel %vm1081_vm5, %v1074_v63, %v1075_v24  ;;  %v3021_v48 = vpop.f32.mrb[19].mxu0  ;;  %v3101_v50 = vpop.f32.mrb[19].mxu1 }
 0x189   : > { %v1139_v53 = vpack.c.bf16 %v1127_v41, %v1128_v61  ;;  %v1159_v55 = vpack.c.bf16 %v1087_v62, %v1088_v14  ;;  %v810_v56 = vpack.c.bf16 %v626_v28, %v623_v15  ;;  %v870_v57 = vrot.slane %v626_v28, 7 }
 0x18a   : > { %v1036_v59 = vrot.slane %v626_v28, 1  ;;  %v830_v60 = vpack.c.bf16 %v786_v30, %v783_v16  ;;  %v910_v40 = vrot.slane %v786_v30, 7  ;;  %v1076_v1 = vrot.slane %v786_v30, 1  ;;  %v4125_v16 = vld [vmem:[#allocation2 + $0x18] sm:$0xff] }
 0x18b   : > { %1167 = vst.msk [vmem:[#allocation2 + $0x1c8] sm:$0xff] %vm833_vm3, %v1139_v53  ;;  %1187 = vst.msk [vmem:[#allocation2 + $0x268] sm:$0xff] %vm833_vm3, %v1159_v55  ;;  %v962_v47 = vsel %vm917_vm4, %v869_v21, %v870_v57  ;;  %v1305_v58 = vadd.bf16 %v1281_v17, %v1226_v34  ;;  %v4112_v63 = vadd.bf16 %v1280_v8, %v1225_v7  ;;  %v4127_v7 = vld [vmem:[#allocation2 + $0x1c0] sm:$0xff]  ;;  %v4133_v27 = vrot.slane %v1719_v4, 4 }
 0x18c   : > { %838 = vst.msk [vmem:[#allocation2 + $0x20] sm:$0xff] %vm833_vm3, %v810_v56  ;;  %v976_v2 = vpack.c.bf16 %v962_v47, %v963_v38  ;;  %v1126_v6 = vsel %vm1081_vm5, %v1035_v22, %v1036_v59  ;;  %858 = vst.msk [vmem:[#allocation2 + $0xc0] sm:$0xff] %vm833_vm3, %v830_v60  ;;  %v922_v13 = vsel %vm917_vm4, %v909_v23, %v910_v40  ;;  %v4123_v15 = vld [vmem:[#allocation2 + $0xf0] sm:$0xff]  ;;  %v4131_v22 = vrot.slane %v1566_v35, 4 }
 0x18d   : > { %v1086_v14 = vsel %vm1081_vm5, %v1075_v24, %v1076_v1  ;;  %v996_v8 = vpack.c.bf16 %v922_v13, %v923_v42  ;;  %v631_v17 = vpop.f32.mrb[20].mxu0  ;;  %v791_v21 = vpop.f32.mrb[20].mxu1  ;;  %v1357_v25 = vmul.bf16 %v4029_v10, %v4127_v7  ;;  %v1412_v35 = vmul.bf16 %v3997_v44, %v4123_v15 }
 0x18e   : > { %1004 = vst.msk [vmem:[#allocation2 + $0xf8] sm:$0xff] %vm833_vm3, %v976_v2  ;;  %v871_v23 = vrot.slane %v631_v17, 7  ;;  %v1037_v28 = vrot.slane %v631_v17, 1  ;;  %v911_v24 = vrot.slane %v791_v21, 7  ;;  %v1077_v30 = vrot.slane %v791_v21, 1  ;;  %v3024_v34 = vpop.f32.mrb[21].mxu0 }
 0x18f   : > { %v3104_v38 = vpop.f32.mrb[21].mxu1  ;;  %1024 = vst.msk [vmem:[#allocation2 + $0x198] sm:$0xff] %vm833_vm3, %v996_v8  ;;  %v634_v41 = vpop.f32.mrb[22].mxu0  ;;  %v1567_v4 = vmul.bf16 %v4000_v45, %v4125_v16  ;;  %v1282_v62 = vmul.bf16 %v3994_v43, %v4125_v16 }
 0x190   : > { %v794_v42 = vpop.f32.mrb[22].mxu1  ;;  %v961_v48 = vsel %vm917_vm4, %v870_v57, %v871_v23  ;;  %v1125_v50 = vsel %vm1081_vm5, %v1036_v59, %v1037_v28  ;;  %v921_v53 = vsel %vm917_vm4, %v910_v40, %v911_v24  ;;  %v1085_v55 = vsel %vm1081_vm5, %v1076_v1, %v1077_v30  ;;  %v3025_v56 = vpop.f32.mrb[23].mxu0 }
 0x191   : > { %v3105_v60 = vpop.f32.mrb[23].mxu1  ;;  %v1140_v47 = vpack.c.bf16 %v1125_v50, %v1126_v6  ;;  %v1160_v2 = vpack.c.bf16 %v1085_v55, %v1086_v14  ;;  %v811_v13 = vpack.c.bf16 %v634_v41, %v631_v17  ;;  %v872_v8 = vrot.slane %v634_v41, 7 }
 0x192   : > { %v1038_v34 = vrot.slane %v634_v41, 1  ;;  %v831_v38 = vpack.c.bf16 %v794_v42, %v791_v21  ;;  %v912_v51 = vrot.slane %v794_v42, 7  ;;  %v1078_v39 = vrot.slane %v794_v42, 1 }
 0x193   : > { %1168 = vst.msk [vmem:[#allocation2 + $0x1d0] sm:$0xff] %vm833_vm3, %v1140_v47  ;;  %1188 = vst.msk [vmem:[#allocation2 + $0x270] sm:$0xff] %vm833_vm3, %v1160_v2  ;;  %v960_v57 = vsel %vm917_vm4, %v871_v23, %v872_v8  ;;  %v4158_v59 = vadd.bf16 %v1357_v25, %v1305_v58  ;;  %v4160_v40 = vrot.slane %v1567_v4, 4  ;;  %v1227_v1 = vmul.bf16 %v4026_v9, %v4123_v15  ;;  %v4171_v23 = vld [vmem:[#allocation2 + $0x20] sm:$0xff]  ;;  %v4173_v58 = vld [vmem:[#allocation2 + $0x1c8] sm:$0xff] }
 0x194   : > { %839 = vst.msk [vmem:[#allocation2 + $0x28] sm:$0xff] %vm833_vm3, %v811_v13  ;;  %v977_v6 = vpack.c.bf16 %v960_v57, %v961_v48  ;;  %v1124_v14 = vsel %vm1081_vm5, %v1037_v28, %v1038_v34  ;;  %859 = vst.msk [vmem:[#allocation2 + $0xc8] sm:$0xff] %vm833_vm3, %v831_v38  ;;  %v920_v17 = vsel %vm917_vm4, %v911_v24, %v912_v51  ;;  %v4177_v48 = vrot.slane %v1412_v35, 4 }
 0x195   : > { %v1084_v21 = vsel %vm1081_vm5, %v1077_v30, %v1078_v39  ;;  %v997_v41 = vpack.c.bf16 %v920_v17, %v921_v53  ;;  %v639_v42 = vpop.f32.mrb[24].mxu0  ;;  %v799_v25 = vpop.f32.mrb[24].mxu1  ;;  %v4175_v4 = vld [vmem:[#allocation2 + $0xf8] sm:$0xff]  ;;  %v4182_v28 = vsel %vm1460_vm6, %v4079_v5, %v4129_v26  ;;  %v4187_v24 = vsel %vm1460_vm6, %v4089_v18, %v4131_v22 }
 0x196   : > { %1005 = vst.msk [vmem:[#allocation2 + $0x100] sm:$0xff] %vm833_vm3, %v977_v6  ;;  %v873_v30 = vrot.slane %v639_v42, 7  ;;  %v1039_v50 = vrot.slane %v639_v42, 1  ;;  %v913_v53 = vrot.slane %v799_v25, 7  ;;  %v1079_v55 = vrot.slane %v799_v25, 1  ;;  %v3028_v56 = vpop.f32.mrb[25].mxu0 }
 0x197   : > { %v3108_v60 = vpop.f32.mrb[25].mxu1  ;;  %1025 = vst.msk [vmem:[#allocation2 + $0x1a0] sm:$0xff] %vm833_vm3, %v997_v41  ;;  %v642_v35 = vpop.f32.mrb[26].mxu0  ;;  %v1413_v5 = vmul.bf16 %v3997_v44, %v4175_v4  ;;  %v1568_v2 = vmul.bf16 %v4000_v45, %v4171_v23  ;;  %v1721_v18 = vmul.bf16 %v4032_v11, %v4173_v58  ;;  %v4197_v13 = vadd.bf16 %v1282_v62, %v1227_v1 }
 0x198   : > { %v802_v47 = vpop.f32.mrb[26].mxu1  ;;  %v959_v38 = vsel %vm917_vm4, %v872_v8, %v873_v30  ;;  %v1123_v57 = vsel %vm1081_vm5, %v1038_v34, %v1039_v50  ;;  %v919_v6 = vsel %vm917_vm4, %v912_v51, %v913_v53  ;;  %v1083_v17 = vsel %vm1081_vm5, %v1078_v39, %v1079_v55  ;;  %v3029_v41 = vpop.f32.mrb[27].mxu0 }
 0x199   : > { %v3109_v56 = vpop.f32.mrb[27].mxu1  ;;  %v1141_v60 = vpack.c.bf16 %v1123_v57, %v1124_v14  ;;  %v1161_v61 = vpack.c.bf16 %v1083_v17, %v1084_v21  ;;  %v812_v0 = vpack.c.bf16 %v642_v35, %v639_v42  ;;  %v874_v3 = vrot.slane %v642_v35, 7 }
 0x19a   : > { %v1040_v62 = vrot.slane %v642_v35, 1  ;;  %v832_v1 = vpack.c.bf16 %v802_v47, %v799_v25  ;;  %v914_v37 = vrot.slane %v802_v47, 7  ;;  %v1080_v36 = vrot.slane %v802_v47, 1 }
 0x19b   : > { %1169 = vst.msk [vmem:[#allocation2 + $0x1d8] sm:$0xff] %vm833_vm3, %v1141_v60  ;;  %1189 = vst.msk [vmem:[#allocation2 + $0x278] sm:$0xff] %vm833_vm3, %v1161_v61  ;;  %v958_v51 = vsel %vm917_vm4, %v873_v30, %v874_v3  ;;  %v1466_v39 = vrot.slane %v1413_v5, 4  ;;  %v4212_v8 = vrot.slane %v1568_v2, 4  ;;  %v4214_v34 = vrot.slane %v1721_v18, 4  ;;  %v4225_v25 = vld [vmem:[#allocation2 + $0x28] sm:$0xff] }
 0x19c   : > { %840 = vst.msk [vmem:[#allocation2 + $0x30] sm:$0xff] %vm833_vm3, %v812_v0  ;;  %v978_v14 = vpack.c.bf16 %v958_v51, %v959_v38  ;;  %v1122_v21 = vsel %vm1081_vm5, %v1039_v50, %v1040_v62  ;;  %860 = vst.msk [vmem:[#allocation2 + $0xd0] sm:$0xff] %vm833_vm3, %v832_v1  ;;  %v918_v42 = vsel %vm917_vm4, %v913_v53, %v914_v37  ;;  %v5571_v61 = vrot.slane %v3925_v32, 7  ;;  %v4227_v30 = vld [vmem:[#allocation2 + $0x1d0] sm:$0xff] }
 0x19d   : > { %v998_v47 = vpack.c.bf16 %v918_v42, %v919_v6  ;;  %v1082_v50 = vsel %vm1081_vm5, %v1079_v55, %v1080_v36  ;;  %v5572_v5 = vrot.slane %v3925_v32, 1  ;;  %v647_v2 = vpop.f32.mrb[28].mxu0  ;;  %v4236_v18 = vld [vmem:[#allocation2 + $0x100] sm:$0xff]  ;;  %v1467_v55 = vsel %vm1460_vm6, %v4177_v48, %v1466_v39 }
 0x19e   : > { %v971_v0 = vsel %vm917_vm4, %v914_v37, %v5571_v61  ;;  %1006 = vst.msk [vmem:[#allocation2 + $0x108] sm:$0xff] %vm833_vm3, %v978_v14  ;;  %v875_v38 = vrot.slane %v647_v2, 7  ;;  %v1041_v57 = vrot.slane %v647_v2, 1  ;;  %v3032_v17 = vpop.f32.mrb[29].mxu0  ;;  %v1569_v6 = vmul.bf16 %v4000_v45, %v4225_v25 }
 0x19f   : > { %v972_v35 = vpack.c.bf16 %v3941_v49, %v971_v0  ;;  %v1135_v53 = vsel %vm1081_vm5, %v1080_v36, %v5572_v5  ;;  %v1358_v49 = vmul.bf16 %v4029_v10, %v4173_v58  ;;  %1026 = vst.msk [vmem:[#allocation2 + $0x1a8] sm:$0xff] %vm833_vm3, %v998_v47  ;;  %v650_v32 = vpop.f32.mrb[30].mxu0  ;;  %v1414_v36 = vmul.bf16 %v3997_v44, %v4236_v18 }
 0x1a0   : > { %v1162_v37 = vpack.c.bf16 %v1135_v53, %v1082_v50  ;;  %v1722_v41 = vmul.bf16 %v4032_v11, %v4227_v30  ;;  %v957_v56 = vsel %vm917_vm4, %v874_v3, %v875_v38  ;;  %v1121_v60 = vsel %vm1081_vm5, %v1040_v62, %v1041_v57  ;;  %v3033_v14 = vpop.f32.mrb[31].mxu0 }
 0x1a1   : > { %1000 = vst.msk [vmem:[#allocation2 + $0xd8] sm:$0xff] %vm833_vm3, %v972_v35  ;;  %v813_v1 = vpack.c.bf16 %v650_v32, %v647_v2  ;;  %v876_v51 = vrot.slane %v650_v32, 7  ;;  %v1142_v42 = vpack.c.bf16 %v1121_v60, %v1122_v21  ;;  %v1042_v61 = vrot.slane %v650_v32, 1 }
 0x1a2   : > { %1190 = vst.msk [vmem:[#allocation2 + $0x280] sm:$0xff] %vm833_vm3, %v1162_v37  ;;  %v4256_v0 = vrot.slane %v1414_v36, 4  ;;  %v1621_v35 = vsel %vm1460_vm6, %v4160_v40, %v4212_v8  ;;  %v1332_v3 = vld [vmem:[#allocation2 + $0x1d8] sm:$0xff]  ;;  %v1536_v50 = vadd.bf16 %v1467_v55, %v4158_v59  ;;  %v1774_v62 = vrot.slane %v1722_v41, 4 }
 0x1a3   : > { %841 = vst.msk [vmem:[#allocation2 + $0x38] sm:$0xff] %vm833_vm3, %v813_v1  ;;  %v956_v47 = vsel %vm917_vm4, %v875_v38, %v876_v51  ;;  %v1382_v5 = vadd.bf16 %v1358_v49, %v4197_v13  ;;  %1170 = vst.msk [vmem:[#allocation2 + $0x1e0] sm:$0xff] %vm833_vm3, %v1142_v42  ;;  %v1120_v53 = vsel %vm1081_vm5, %v1041_v57, %v1042_v61  ;;  %v4269_v2 = vrot.slane %v1569_v6, 4 }
 0x1a4   : > { %v979_v21 = vpack.c.bf16 %v956_v47, %v957_v56  ;;  %v1284_v38 = vmul.bf16 %v3994_v43, %v4225_v25  ;;  %v1690_v17 = vadd.bf16 %v1621_v35, %v1536_v50  ;;  %v1775_v59 = vsel %vm1460_vm6, %v4214_v34, %v1774_v62 }
 0x1a5   : > { %v1723_v13 = vmul.bf16 %v4032_v11, %v1332_v3  ;;  %v655_v49 = vpop.f32.mrb[32].mxu0  ;;  %v1229_v57 = vmul.bf16 %v4026_v9, %v4236_v18  ;;  %v1874_v32 = vmul.bf16 %v4040_v19, %v4236_v18  ;;  %v1928_v36 = vmul.bf16 %v4043_v20, %v4225_v25  ;;  %v4288_v14 = vld [vmem:[#allocation2 + $0x108] sm:$0xff]  ;;  %v1254_v18 = vld [vmem:[#allocation2 + $0x30] sm:$0xff] }
 0x1a6   : > { %1007 = vst.msk [vmem:[#allocation2 + $0x110] sm:$0xff] %vm833_vm3, %v979_v21  ;;  %v1469_v55 = vsel %vm1460_vm6, %v1466_v39, %v4256_v0  ;;  %v877_v6 = vrot.slane %v655_v49, 7  ;;  %v1043_v41 = vrot.slane %v655_v49, 1  ;;  %v3036_v56 = vpop.f32.mrb[33].mxu0  ;;  %v1844_v60 = vadd.bf16 %v1775_v59, %v1690_v17  ;;  %v3294_v39 = vld [vmem:[#allocation9] sm:$0xff]  }
 0x1a7   : > { %v1985_v1 = vmul.bf16 %v4047_v29, %v1332_v3  ;;  %v658_v42 = vpop.f32.mrb[34].mxu0  ;;  %v1360_v35 = vmul.bf16 %v4029_v10, %v1332_v3  ;;  %v4291_v47 = vrot.slane %v1723_v13, 4  ;;  %v1537_v50 = vadd.bf16 %v1469_v55, %v1382_v5  ;;  %3110 = vmatprep.subr.bf16.mxu1 %v3294_v39 }
 0x1a8   : > { %v1623_v25 = vsel %vm1460_vm6, %v4212_v8, %v4269_v2  ;;  %v955_v21 = vsel %vm917_vm4, %v876_v51, %v877_v6  ;;  %v1119_v17 = vsel %vm1081_vm5, %v1042_v61, %v1043_v41  ;;  %v814_v59 = vpack.c.bf16 %v658_v42, %v655_v49  ;;  %v3037_v37 = vpop.f32.mrb[35].mxu0  ;;  %v1193_v61 = vld [vmem:[#allocation2 + $0xd8] sm:$0xff]  ;;  %3111 = vmatpush3.bf16.msra.mxu1 %v3294_v39 }
 0x1a9   : > { %v878_v56 = vrot.slane %v658_v42, 7  ;;  %v1143_v52 = vpack.c.bf16 %v1119_v17, %v1120_v53  ;;  %v1044_v3 = vrot.slane %v658_v42, 1  ;;  %v1898_v13 = vadd.bf16 %v1874_v32, %v1844_v60 }
 0x1aa   : > { %v1230_v5 = vmul.bf16 %v4026_v9, %v4288_v14  ;;  %842 = vst.msk [vmem:[#allocation2 + $0x40] sm:$0xff] %vm833_vm3, %v814_v59  ;;  %v1308_v55 = vadd.bf16 %v1284_v38, %v1229_v57  ;;  %v1285_v51 = vmul.bf16 %v3994_v43, %v1254_v18  ;;  %v1691_v33 = vadd.bf16 %v1623_v25, %v1537_v50  ;;  %v4313_v42 = vld [vmem:[#allocation2 + $0x1e0] sm:$0xff] }
 0x1ab   : > { %v954_v8 = vsel %vm917_vm4, %v877_v6, %v878_v56  ;;  %1171 = vst.msk [vmem:[#allocation2 + $0x1e8] sm:$0xff] %vm833_vm3, %v1143_v52  ;;  %v1118_v37 = vsel %vm1081_vm5, %v1043_v41, %v1044_v3  ;;  %v1952_v49 = vadd.bf16 %v1928_v36, %v1898_v13  ;;  %v1777_v32 = vsel %vm1460_vm6, %v1774_v62, %v4291_v47 }
 0x1ac   : > { %v980_v53 = vpack.c.bf16 %v954_v8, %v955_v21  ;;  %v4311_v60 = vadd.bf16 %v1360_v35, %v1308_v55  ;;  %v1570_v38 = vmul.bf16 %v4000_v45, %v1254_v18  ;;  %v1845_v57 = vadd.bf16 %v1777_v32, %v1691_v33 }
 0x1ad   : > { %v1875_v6 = vmul.bf16 %v4040_v19, %v4288_v14  ;;  %v4319_v52 = vadd.bf16 %v1985_v1, %v1952_v49  ;;  %v663_v50 = vpop.f32.mrb[36].mxu0  ;;  %v4321_v41 = vadd.bf16 %v1285_v51, %v1230_v5  ;;  %v1415_v62 = vmul.bf16 %v3997_v44, %v4288_v14 }
 0x1ae   : > { %1008 = vst.msk [vmem:[#allocation2 + $0x118] sm:$0xff] %vm833_vm3, %v980_v53  ;;  %v1224_v36 = vmul.bf16 %v4026_v9, %v1193_v61  ;;  %v879_v35 = vrot.slane %v663_v50, 7  ;;  %v1045_v25 = vrot.slane %v663_v50, 1  ;;  %v3040_v39 = vpop.f32.mrb[37].mxu0  ;;  %v1929_v33 = vmul.bf16 %v4043_v20, %v1254_v18 }
 0x1af   : > { %v1899_v21 = vadd.bf16 %v1875_v6, %v1845_v57  ;;  %2275 = vrot.lane.b32.xlu1 %v4319_v52, %s3557_s23  ;;  %v666_v1 = vpop.f32.mrb[38].mxu0  ;;  %v1986_v17 = vmul.bf16 %v4047_v29, %v4313_v42  ;;  %v1724_v59 = vmul.bf16 %v4032_v11, %v4313_v42  ;;  %v5573_v14 = vmul.bf16 %v3994_v43, %v4034_v12 }
 0x1b0   : > { %v5574_v5 = vmul.bf16 %v4032_v11, %v4127_v7  ;;  %v953_v18 = vsel %vm917_vm4, %v878_v56, %v879_v35  ;;  %v1117_v55 = vsel %vm1081_vm5, %v1044_v3, %v1045_v25  ;;  %v815_v51 = vpack.c.bf16 %v666_v1, %v663_v50  ;;  %v3041_v53 = vpop.f32.mrb[39].mxu0 }
 0x1b1   : > { %v1303_v13 = vadd.bf16 %v5573_v14, %v1224_v36  ;;  %v880_v61 = vrot.slane %v666_v1, 7  ;;  %v1144_v49 = vpack.c.bf16 %v1117_v55, %v1118_v37  ;;  %v1046_v32 = vrot.slane %v666_v1, 1 }
 0x1b2   : > { %v1770_v8 = vrot.slane %v5574_v5, 4  ;;  %v1953_v57 = vadd.bf16 %v1929_v33, %v1899_v21  ;;  %v5575_v12 = vmul.bf16 %v4029_v10, %v4057_v46  ;;  %843 = vst.msk [vmem:[#allocation2 + $0x48] sm:$0xff] %vm833_vm3, %v815_v51  ;;  %v4349_v36 = vrot.slane %v1415_v62, 4 }
 0x1b3   : > { %v952_v7 = vsel %vm917_vm4, %v879_v35, %v880_v61  ;;  %v4351_v56 = vrot.slane %v1570_v38, 4  ;;  %v1361_v3 = vmul.bf16 %v4029_v10, %v4313_v42  ;;  %1172 = vst.msk [vmem:[#allocation2 + $0x1f0] sm:$0xff] %vm833_vm3, %v1144_v49  ;;  %v1116_v50 = vsel %vm1081_vm5, %v1045_v25, %v1046_v32 }
 0x1b4   : > { %v1379_v6 = vadd.bf16 %v5575_v12, %v1303_v13  ;;  %v981_v37 = vpack.c.bf16 %v952_v7, %v953_v18  ;;  %v4358_v46 = vadd.bf16 %v1986_v17, %v1953_v57  ;;  %v4361_v21 = vrot.slane %v1724_v59, 4 }
 0x1b5   : > { %v1872_v62 = vmul.bf16 %v4040_v19, %v4123_v15  ;;  %v5576_v38 = vmul.bf16 %v4029_v10, %v4105_v54  ;;  %v1465_v33 = vsel %vm1460_vm6, %v4129_v26, %v4177_v48  ;;  %v1771_v15 = vsel %vm1460_vm6, %v4133_v27, %v1770_v8 }
 0x1b6   : > { %v1534_v39 = vadd.bf16 %v4182_v28, %v1379_v6  ;;  %1009 = vst.msk [vmem:[#allocation2 + $0x120] sm:$0xff] %vm833_vm3, %v981_v37  ;;  %2277 = vrot.lane.b32.xlu1 %v4358_v46, %s3557_s23  ;;  %v671_v28 = vpop.f32.mrb[40].mxu0  ;;  %v1926_v1 = vmul.bf16 %v4043_v20, %v4125_v16  ;;  %v1983_v54 = vmul.bf16 %v4047_v29, %v4173_v58 }
 0x1b7   : > { %v1380_v35 = vadd.bf16 %v5576_v38, %v4112_v63  ;;  %v881_v63 = vrot.slane %v671_v28, 7  ;;  %v1047_v17 = vrot.slane %v671_v28, 1  ;;  %v3044_v26 = vpop.f32.mrb[41].mxu0  ;;  %v1228_v59 = vmul.bf16 %v4026_v9, %v4175_v4 }
 0x1b8   : > { %v1688_v25 = vadd.bf16 %v4187_v24, %v1534_v39  ;;  %v674_v13 = vpop.f32.mrb[42].mxu0  ;;  %v1619_v24 = vsel %vm1460_vm6, %v4131_v22, %v4160_v40  ;;  %v1773_v27 = vsel %vm1460_vm6, %v1770_v8, %v4214_v34  ;;  %v1283_v16 = vmul.bf16 %v3994_v43, %v4171_v23  ;;  %v4395_v22 = vld [vmem:[#allocation2 + $0x110] sm:$0xff]  ;;  %v4422_v26 = vld [vmem:[#allocation2 + $0x1e8] sm:$0xff] }
 0x1b9   : > { %v1535_v48 = vadd.bf16 %v1465_v33, %v1380_v35  ;;  %v951_v58 = vsel %vm917_vm4, %v880_v61, %v881_v63  ;;  %v1115_v5 = vsel %vm1081_vm5, %v1046_v32, %v1047_v17  ;;  %v816_v18 = vpack.c.bf16 %v674_v13, %v671_v28  ;;  %v3045_v51 = vpop.f32.mrb[43].mxu0 }
 0x1ba   : > { %v1842_v14 = vadd.bf16 %v1771_v15, %v1688_v25  ;;  %v882_v55 = vrot.slane %v674_v13, 7  ;;  %v1145_v53 = vpack.c.bf16 %v1115_v5, %v1116_v50  ;;  %v1048_v57 = vrot.slane %v674_v13, 1  ;;  %v1255_v50 = vld [vmem:[#allocation2 + $0x38] sm:$0xff] }
 0x1bb   : > { %v1689_v12 = vadd.bf16 %v1619_v24, %v1535_v48  ;;  %844 = vst.msk [vmem:[#allocation2 + $0x50] sm:$0xff] %vm833_vm3, %v816_v18  ;;  %v1873_v34 = vmul.bf16 %v4040_v19, %v4175_v4  ;;  %v1307_v8 = vadd.bf16 %v1283_v16, %v1228_v59  ;;  %v1359_v61 = vmul.bf16 %v4029_v10, %v4227_v30  ;;  %v4447_v51 = vld [vmem:[#allocation2 + $0x118] sm:$0xff] }
 0x1bc   : > { %v1896_v49 = vadd.bf16 %v1872_v62, %v1842_v14  ;;  %v950_v40 = vsel %vm917_vm4, %v881_v63, %v882_v55  ;;  %1173 = vst.msk [vmem:[#allocation2 + $0x1f8] sm:$0xff] %vm833_vm3, %v1145_v53  ;;  %v1114_v7 = vsel %vm1081_vm5, %v1047_v17, %v1048_v57  ;;  %v1927_v39 = vmul.bf16 %v4043_v20, %v4171_v23 }
 0x1bd   : > { %v982_v6 = vpack.c.bf16 %v950_v40, %v951_v58  ;;  %v1843_v37 = vadd.bf16 %v1773_v27, %v1689_v12  ;;  %v1383_v62 = vadd.bf16 %v1359_v61, %v1307_v8  ;;  %v1416_v4 = vmul.bf16 %v3997_v44, %v4395_v22  ;;  %v679_v25 = vpop.f32.mrb[44].mxu0  ;;  %v4452_v12 = vld [vmem:[#allocation2 + $0x40] sm:$0xff] }
 0x1be   : > { %v1950_v32 = vadd.bf16 %v1926_v1, %v1896_v49  ;;  %v1471_v38 = vsel %vm1460_vm6, %v4256_v0, %v4349_v36  ;;  %v1984_v28 = vmul.bf16 %v4047_v29, %v4227_v30  ;;  %v1231_v23 = vmul.bf16 %v4026_v9, %v4395_v22  ;;  %v3048_v63 = vpop.f32.mrb[45].mxu0 }
 0x1bf   : > { %1010 = vst.msk [vmem:[#allocation2 + $0x128] sm:$0xff] %vm833_vm3, %v982_v6  ;;  %v1897_v33 = vadd.bf16 %v1873_v34, %v1843_v37  ;;  %v883_v15 = vrot.slane %v679_v25, 7  ;;  %v1049_v1 = vrot.slane %v679_v25, 1  ;;  %v1286_v17 = vmul.bf16 %v3994_v43, %v1255_v50  ;;  %v4433_v14 = vpop.f32.mrb[46].mxu0 }
 0x1c0   : > { %v4414_v35 = vadd.bf16 %v1983_v54, %v1950_v32  ;;  %v1538_v0 = vadd.bf16 %v1471_v38, %v1383_v62  ;;  %v1571_v48 = vmul.bf16 %v4000_v45, %v1255_v50  ;;  %v1625_v30 = vsel %vm1460_vm6, %v4269_v2, %v4351_v56  ;;  %v3049_v58 = vpop.f32.mrb[47].mxu0 }
 0x1c1   : > { %v1951_v54 = vadd.bf16 %v1927_v39, %v1897_v33  ;;  %v1779_v59 = vsel %vm1460_vm6, %v4291_v47, %v4361_v21  ;;  %v949_v13 = vsel %vm917_vm4, %v882_v55, %v883_v15  ;;  %v1113_v24 = vsel %vm1081_vm5, %v1048_v57, %v1049_v1 }
 0x1c2   : > { %2271 = vrot.lane.b32.xlu0 %v4414_v35, %s3557_s23  ;;  %v4439_v27 = vrot.slane %v1416_v4, 4  ;;  %v1692_v16 = vadd.bf16 %v1625_v30, %v1538_v0  ;;  %v1146_v18 = vpack.c.bf16 %v1113_v24, %v1114_v7  ;;  %v1876_v2 = vmul.bf16 %v4040_v19, %v4395_v22  ;;  %v4515_v24 = vld [vmem:[#allocation2 + $0x120] sm:$0xff] }
 0x1c3   : > { %v4441_v5 = vadd.bf16 %v1984_v28, %v1951_v54  ;;  %v1725_v47 = vmul.bf16 %v4032_v11, %v4422_v26  ;;  %v817_v55 = vpack.c.bf16 %v4433_v14, %v679_v25  ;;  %v884_v49 = vrot.slane %v4433_v14, 7  ;;  %v4484_v25 = vld [vmem:[#allocation2 + $0x1f0] sm:$0xff] }
 0x1c4   : > { %v1846_v53 = vadd.bf16 %v1779_v59, %v1692_v16  ;;  %v1050_v57 = vrot.slane %v4433_v14, 1  ;;  %1174 = vst.msk [vmem:[#allocation2 + $0x200] sm:$0xff] %vm833_vm3, %v1146_v18  ;;  %v4457_v22 = vrot.slane %v1571_v48, 4  ;;  %v1930_v40 = vmul.bf16 %v4043_v20, %v1255_v50 }
 0x1c5   : > { %v1987_v34 = vmul.bf16 %v4047_v29, %v4422_v26  ;;  %v4462_v8 = vrot.slane %v1725_v47, 4  ;;  %845 = vst.msk [vmem:[#allocation2 + $0x58] sm:$0xff] %vm833_vm3, %v817_v55  ;;  %v948_v32 = vsel %vm917_vm4, %v883_v15, %v884_v49  ;;  %v1417_v7 = vmul.bf16 %v3997_v44, %v4447_v51  ;;  %v687_v4 = vpop.f32.mrb[48].mxu0  ;;  %v1257_v47 = vld [vmem:[#allocation2 + $0x48] sm:$0xff] }
 0x1c6   : > { %2273 = vrot.lane.b32.xlu0 %v4441_v5, %s3557_s23  ;;  %v1900_v61 = vadd.bf16 %v1876_v2, %v1846_v53  ;;  %v1112_v6 = vsel %vm1081_vm5, %v1049_v1, %v1050_v57  ;;  %v4475_v37 = vadd.bf16 %v1361_v3, %v4321_v41  ;;  %v983_v50 = vpack.c.bf16 %v948_v32, %v949_v13  ;;  %v3052_v41 = vpop.f32.mrb[49].mxu0 }
 0x1c7   : > { %v1473_v39 = vsel %vm1460_vm6, %v4349_v36, %v4439_v27  ;;  %v1572_v62 = vmul.bf16 %v4000_v45, %v4452_v12  ;;  %v1310_v38 = vadd.bf16 %v1286_v17, %v1231_v23  ;;  %v1362_v28 = vmul.bf16 %v4029_v10, %v4422_v26  ;;  %v4498_v1 = vpop.f32.mrb[50].mxu0 }
 0x1c8   : > { %v1954_v33 = vadd.bf16 %v1930_v40, %v1900_v61  ;;  %v1539_v42 = vadd.bf16 %v1473_v39, %v4311_v60  ;;  %1011 = vst.msk [vmem:[#allocation2 + $0x130] sm:$0xff] %vm833_vm3, %v983_v50  ;;  %v1232_v3 = vmul.bf16 %v4026_v9, %v4447_v51  ;;  %v4490_v36 = vrot.slane %v1417_v7, 4  ;;  %v3053_v0 = vpop.f32.mrb[51].mxu0  ;;  %v4540_v50 = vld [vmem:[#allocation2 + $0x1f8] sm:$0xff] }
 0x1c9   : > { %v1627_v23 = vsel %vm1460_vm6, %v4351_v56, %v4457_v22  ;;  %v1781_v15 = vsel %vm1460_vm6, %v4361_v21, %v4462_v8  ;;  %v4502_v60 = vrot.slane %v1572_v62, 4  ;;  %v1877_v26 = vmul.bf16 %v4040_v19, %v4447_v51 }
 0x1ca   : > { %v4500_v63 = vadd.bf16 %v1987_v34, %v1954_v33  ;;  %v1693_v17 = vadd.bf16 %v1627_v23, %v1539_v42  ;;  %v1726_v54 = vmul.bf16 %v4032_v11, %v4484_v25  ;;  %v885_v48 = vrot.slane %v687_v4, 7 }
 0x1cb   : > { %v1051_v56 = vrot.slane %v687_v4, 1  ;;  %v818_v30 = vpack.c.bf16 %v4498_v1, %v687_v4  ;;  %v1931_v59 = vmul.bf16 %v4043_v20, %v4452_v12  ;;  %v886_v14 = vrot.slane %v4498_v1, 7 }
 0x1cc   : > { %2279 = vrot.lane.b32.xlu0 %v4500_v63, %s3557_s23  ;;  %v1847_v21 = vadd.bf16 %v1781_v15, %v1693_v17  ;;  %v1052_v13 = vrot.slane %v4498_v1, 1  ;;  %v1988_v16 = vmul.bf16 %v4047_v29, %v4484_v25  ;;  %v4519_v58 = vrot.slane %v1726_v54, 4 }
 0x1cd   : > { %v947_v18 = vsel %vm917_vm4, %v884_v49, %v885_v48  ;;  %v1111_v2 = vsel %vm1081_vm5, %v1050_v57, %v1051_v56  ;;  %846 = vst.msk [vmem:[#allocation2 + $0x60] sm:$0xff] %vm833_vm3, %v818_v30  ;;  %v946_v55 = vsel %vm917_vm4, %v885_v48, %v886_v14  ;;  %v1287_v34 = vmul.bf16 %v3994_v43, %v4452_v12  ;;  %v695_v32 = vpop.f32.mrb[52].mxu0 }
 0x1ce   : > { %v1901_v51 = vadd.bf16 %v1877_v26, %v1847_v21  ;;  %v1147_v53 = vpack.c.bf16 %v1111_v2, %v1112_v6  ;;  %v1110_v40 = vsel %vm1081_vm5, %v1051_v56, %v1052_v13  ;;  %v984_v61 = vpack.c.bf16 %v946_v55, %v947_v18  ;;  %v3056_v62 = vpop.f32.mrb[53].mxu0  ;;  %v4577_v21 = vld [vmem:[#allocation2 + $0x128] sm:$0xff] }
 0x1cf   : > { %v1418_v49 = vmul.bf16 %v3997_v44, %v4515_v24  ;;  %v1475_v57 = vsel %vm1460_vm6, %v4439_v27, %v4490_v36  ;;  %v4537_v7 = vadd.bf16 %v1362_v28, %v1310_v38  ;;  %v1573_v12 = vmul.bf16 %v4000_v45, %v1257_v47  ;;  %v4553_v28 = vpop.f32.mrb[54].mxu0 }
 0x1d0   : > { %v1955_v6 = vadd.bf16 %v1931_v59, %v1901_v51  ;;  %1175 = vst.msk [vmem:[#allocation2 + $0x208] sm:$0xff] %vm833_vm3, %v1147_v53  ;;  %v1540_v39 = vadd.bf16 %v1475_v57, %v4475_v37  ;;  %v1311_v4 = vadd.bf16 %v1287_v34, %v1232_v3  ;;  %v1363_v33 = vmul.bf16 %v4029_v10, %v4484_v25  ;;  %v3057_v3 = vpop.f32.mrb[55].mxu0  ;;  %v4579_v59 = vld [vmem:[#allocation2 + $0x50] sm:$0xff] }
 0x1d1   : > { %1012 = vst.msk [vmem:[#allocation2 + $0x138] sm:$0xff] %vm833_vm3, %v984_v61  ;;  %v1629_v27 = vsel %vm1460_vm6, %v4457_v22, %v4502_v60  ;;  %v1783_v38 = vsel %vm1460_vm6, %v4462_v8, %v4519_v58  ;;  %v1233_v42 = vmul.bf16 %v4026_v9, %v4515_v24  ;;  %v4559_v41 = vrot.slane %v1418_v49, 4 }
 0x1d2   : > { %v4555_v37 = vadd.bf16 %v1988_v16, %v1955_v6  ;;  %v1694_v25 = vadd.bf16 %v1629_v27, %v1540_v39  ;;  %v4561_v23 = vrot.slane %v1573_v12, 4  ;;  %v1878_v22 = vmul.bf16 %v4040_v19, %v4515_v24  ;;  %v4602_v39 = vld [vmem:[#allocation2 + $0x200] sm:$0xff] }
 0x1d3   : > { %v1727_v15 = vmul.bf16 %v4032_v11, %v4540_v50  ;;  %v887_v8 = vrot.slane %v695_v32, 7  ;;  %v1053_v17 = vrot.slane %v695_v32, 1  ;;  %v819_v26 = vpack.c.bf16 %v4553_v28, %v695_v32 }
 0x1d4   : > { %2281 = vrot.lane.b32.xlu1 %v4555_v37, %s3557_s23  ;;  %v1848_v1 = vadd.bf16 %v1783_v38, %v1694_v25  ;;  %v888_v0 = vrot.slane %v4553_v28, 7  ;;  %v1932_v54 = vmul.bf16 %v4043_v20, %v1257_v47  ;;  %v1989_v48 = vmul.bf16 %v4047_v29, %v4540_v50 }
 0x1d5   : > { %v945_v56 = vsel %vm917_vm4, %v886_v14, %v887_v8  ;;  %v1054_v30 = vrot.slane %v4553_v28, 1  ;;  %v4581_v16 = vrot.slane %v1727_v15, 4  ;;  %v1109_v18 = vsel %vm1081_vm5, %v1052_v13, %v1053_v17  ;;  %847 = vst.msk [vmem:[#allocation2 + $0x68] sm:$0xff] %vm833_vm3, %v819_v26  ;;  %v703_v34 = vpop.f32.mrb[56].mxu0 }
 0x1d6   : > { %v1902_v24 = vadd.bf16 %v1878_v22, %v1848_v1  ;;  %v944_v2 = vsel %vm917_vm4, %v887_v8, %v888_v0  ;;  %v1288_v51 = vmul.bf16 %v3994_v43, %v1257_v47  ;;  %v1148_v14 = vpack.c.bf16 %v1109_v18, %v1110_v40  ;;  %v3060_v32 = vpop.f32.mrb[57].mxu0 }
 0x1d7   : > { %v985_v53 = vpack.c.bf16 %v944_v2, %v945_v56  ;;  %v1108_v55 = vsel %vm1081_vm5, %v1053_v17, %v1054_v30  ;;  %v1419_v49 = vmul.bf16 %v3997_v44, %v4577_v21  ;;  %v1477_v13 = vsel %vm1460_vm6, %v4490_v36, %v4559_v41  ;;  %v4605_v62 = vpop.f32.mrb[58].mxu0  ;;  %v4632_v17 = vld [vmem:[#allocation2 + $0x130] sm:$0xff] }
 0x1d8   : > { %v1956_v61 = vadd.bf16 %v1932_v54, %v1902_v24  ;;  %v1574_v57 = vmul.bf16 %v4000_v45, %v4579_v59  ;;  %v1387_v6 = vadd.bf16 %v1363_v33, %v1311_v4  ;;  %v1312_v47 = vadd.bf16 %v1288_v51, %v1233_v42  ;;  %1176 = vst.msk [vmem:[#allocation2 + $0x210] sm:$0xff] %vm833_vm3, %v1148_v14  ;;  %v3061_v33 = vpop.f32.mrb[59].mxu0 }
 0x1d9   : > { %v1364_v40 = vmul.bf16 %v4029_v10, %v4540_v50  ;;  %1013 = vst.msk [vmem:[#allocation2 + $0x140] sm:$0xff] %vm833_vm3, %v985_v53  ;;  %v1541_v12 = vadd.bf16 %v1477_v13, %v4537_v7  ;;  %v1234_v27 = vmul.bf16 %v4026_v9, %v4577_v21  ;;  %v1631_v4 = vsel %vm1460_vm6, %v4502_v60, %v4561_v23  ;;  %v4657_v13 = vld [vmem:[#allocation2 + $0x208] sm:$0xff] }
 0x1da   : > { %v4607_v36 = vadd.bf16 %v1989_v48, %v1956_v61  ;;  %v1785_v50 = vsel %vm1460_vm6, %v4519_v58, %v4581_v16  ;;  %v4617_v38 = vrot.slane %v1419_v49, 4  ;;  %v4619_v28 = vrot.slane %v1574_v57, 4 }
 0x1db   : > { %v1695_v7 = vadd.bf16 %v1631_v4, %v1541_v12  ;;  %v1879_v42 = vmul.bf16 %v4040_v19, %v4577_v21  ;;  %v1728_v25 = vmul.bf16 %v4032_v11, %v4602_v39  ;;  %v889_v60 = vrot.slane %v703_v34, 7  ;;  %v1259_v21 = vld [vmem:[#allocation2 + $0x58] sm:$0xff] }
 0x1dc   : > { %2283 = vrot.lane.b32.xlu0 %v4607_v36, %s3557_s23  ;;  %v1055_v3 = vrot.slane %v703_v34, 1  ;;  %v820_v22 = vpack.c.bf16 %v4605_v62, %v703_v34  ;;  %v1933_v15 = vmul.bf16 %v4043_v20, %v4579_v59  ;;  %v890_v8 = vrot.slane %v4605_v62, 7 }
 0x1dd   : > { %v1849_v58 = vadd.bf16 %v1785_v50, %v1695_v7  ;;  %v1056_v1 = vrot.slane %v4605_v62, 1  ;;  %v1990_v26 = vmul.bf16 %v4047_v29, %v4602_v39  ;;  %v4636_v54 = vrot.slane %v1728_v25, 4  ;;  %v711_v14 = vpop.f32.mrb[60].mxu0 }
 0x1de   : > { %v943_v48 = vsel %vm917_vm4, %v888_v0, %v889_v60  ;;  %v1107_v56 = vsel %vm1081_vm5, %v1054_v30, %v1055_v3  ;;  %848 = vst.msk [vmem:[#allocation2 + $0x70] sm:$0xff] %vm833_vm3, %v820_v22  ;;  %v942_v2 = vsel %vm917_vm4, %v889_v60, %v890_v8  ;;  %v1289_v53 = vmul.bf16 %v3994_v43, %v4579_v59  ;;  %v3064_v61 = vpop.f32.mrb[61].mxu0 }
 0x1df   : > { %v1903_v24 = vadd.bf16 %v1879_v42, %v1849_v58  ;;  %v1149_v18 = vpack.c.bf16 %v1107_v56, %v1108_v55  ;;  %v1106_v51 = vsel %vm1081_vm5, %v1055_v3, %v1056_v1  ;;  %v986_v34 = vpack.c.bf16 %v942_v2, %v943_v48  ;;  %v4660_v59 = vpop.f32.mrb[62].mxu0 }
 0x1e0   : > { %v1420_v0 = vmul.bf16 %v3997_v44, %v4632_v17  ;;  %v1479_v30 = vsel %vm1460_vm6, %v4559_v41, %v4617_v38  ;;  %v4654_v55 = vadd.bf16 %v1364_v40, %v1312_v47  ;;  %v1575_v32 = vmul.bf16 %v4000_v45, %v1259_v21  ;;  %v3065_v40 = vpop.f32.mrb[63].mxu0 }
 0x1e1   : > { %v1957_v49 = vadd.bf16 %v1933_v15, %v1903_v24  ;;  %1177 = vst.msk [vmem:[#allocation2 + $0x218] sm:$0xff] %vm833_vm3, %v1149_v18  ;;  %v1542_v57 = vadd.bf16 %v1479_v30, %v1387_v6  ;;  %v1313_v12 = vadd.bf16 %v1289_v53, %v1234_v27  ;;  %v1365_v62 = vmul.bf16 %v4029_v10, %v4602_v39 }
 0x1e2   : > { %1014 = vst.msk [vmem:[#allocation2 + $0x148] sm:$0xff] %vm833_vm3, %v986_v34  ;;  %v1633_v41 = vsel %vm1460_vm6, %v4561_v23, %v4619_v28  ;;  %v1787_v47 = vsel %vm1460_vm6, %v4581_v16, %v4636_v54  ;;  %v1235_v4 = vmul.bf16 %v4026_v9, %v4632_v17  ;;  %v4675_v27 = vrot.slane %v1420_v0, 4 }
 0x1e3   : > { %v4671_v6 = vadd.bf16 %v1990_v26, %v1957_v49  ;;  %v1696_v50 = vadd.bf16 %v1633_v41, %v1542_v57  ;;  %v4677_v39 = vrot.slane %v1575_v32, 4  ;;  %v1880_v33 = vmul.bf16 %v4040_v19, %v4632_v17  ;;  %v4693_v17 = vld [vmem:[#allocation2 + $0x138] sm:$0xff]  ;;  %v4695_v26 = vld [vmem:[#allocation2 + $0x60] sm:$0xff] }
 0x1e4   : > { %v1729_v23 = vmul.bf16 %v4032_v11, %v4657_v13  ;;  %v891_v7 = vrot.slane %v711_v14, 7  ;;  %v1057_v42 = vrot.slane %v711_v14, 1  ;;  %v821_v25 = vpack.c.bf16 %v4660_v59, %v711_v14 }
 0x1e5   : > { %2285 = vrot.lane.b32.xlu1 %v4671_v6, %s3557_s23  ;;  %v1850_v16 = vadd.bf16 %v1787_v47, %v1696_v50  ;;  %v892_v60 = vrot.slane %v4660_v59, 7  ;;  %v1934_v3 = vmul.bf16 %v4043_v20, %v1259_v21  ;;  %v1991_v22 = vmul.bf16 %v4047_v29, %v4657_v13  ;;  %v719_v2 = vpop.f32.mrb[64].mxu0 }
 0x1e6   : > { %v941_v58 = vsel %vm917_vm4, %v890_v8, %v891_v7  ;;  %v1058_v15 = vrot.slane %v4660_v59, 1  ;;  %v4697_v56 = vrot.slane %v1729_v23, 4  ;;  %v1105_v24 = vsel %vm1081_vm5, %v1056_v1, %v1057_v42  ;;  %849 = vst.msk [vmem:[#allocation2 + $0x78] sm:$0xff] %vm833_vm3, %v821_v25  ;;  %v3068_v0 = vpop.f32.mrb[65].mxu0  ;;  %v4720_v59 = vld [vmem:[#allocation2 + $0x210] sm:$0xff] }
 0x1e7   : > { %v1904_v48 = vadd.bf16 %v1880_v33, %v1850_v16  ;;  %v940_v18 = vsel %vm917_vm4, %v891_v7, %v892_v60  ;;  %v1290_v8 = vmul.bf16 %v3994_v43, %v1259_v21  ;;  %v1150_v14 = vpack.c.bf16 %v1105_v24, %v1106_v51  ;;  %v4714_v57 = vpop.f32.mrb[66].mxu0  ;;  %v1261_v24 = vld [vmem:[#allocation2 + $0x68] sm:$0xff] }
 0x1e8   : > { %v987_v53 = vpack.c.bf16 %v940_v18, %v941_v58  ;;  %v1104_v34 = vsel %vm1081_vm5, %v1057_v42, %v1058_v15  ;;  %v1421_v61 = vmul.bf16 %v3997_v44, %v4693_v17  ;;  %v1481_v1 = vsel %vm1460_vm6, %v4617_v38, %v4675_v27  ;;  %v3069_v47 = vpop.f32.mrb[67].mxu0 }
 0x1e9   : > { %v1958_v30 = vadd.bf16 %v1934_v3, %v1904_v48  ;;  %v1576_v49 = vmul.bf16 %v4000_v45, %v4695_v26  ;;  %v1389_v21 = vadd.bf16 %v1365_v62, %v1313_v12  ;;  %v1314_v51 = vadd.bf16 %v1290_v8, %v1235_v4  ;;  %1178 = vst.msk [vmem:[#allocation2 + $0x220] sm:$0xff] %vm833_vm3, %v1150_v14  ;;  %v4748_v3 = vld [vmem:[#allocation2 + $0x140] sm:$0xff] }
 0x1ea   : > { %v1366_v32 = vmul.bf16 %v4029_v10, %v4657_v13  ;;  %1015 = vst.msk [vmem:[#allocation2 + $0x150] sm:$0xff] %vm833_vm3, %v987_v53  ;;  %v1543_v41 = vadd.bf16 %v1481_v1, %v4654_v55  ;;  %v1236_v40 = vmul.bf16 %v4026_v9, %v4693_v17  ;;  %v1635_v12 = vsel %vm1460_vm6, %v4619_v28, %v4677_v39 }
 0x1eb   : > { %v4723_v38 = vadd.bf16 %v1991_v22, %v1958_v30  ;;  %v1789_v13 = vsel %vm1460_vm6, %v4636_v54, %v4697_v56  ;;  %v4733_v62 = vrot.slane %v1421_v61, 4  ;;  %v4735_v4 = vrot.slane %v1576_v49, 4 }
 0x1ec   : > { %v1697_v50 = vadd.bf16 %v1635_v12, %v1543_v41  ;;  %v1881_v55 = vmul.bf16 %v4040_v19, %v4693_v17  ;;  %v1730_v33 = vmul.bf16 %v4032_v11, %v4720_v59  ;;  %v893_v23 = vrot.slane %v719_v2, 7 }
 0x1ed   : > { %2287 = vrot.lane.b32.xlu0 %v4723_v38, %s3557_s23  ;;  %v1059_v28 = vrot.slane %v719_v2, 1  ;;  %v822_v7 = vpack.c.bf16 %v4714_v57, %v719_v2  ;;  %v1935_v54 = vmul.bf16 %v4043_v20, %v4695_v26  ;;  %v894_v42 = vrot.slane %v4714_v57, 7  ;;  %v727_v18 = vpop.f32.mrb[68].mxu0 }
 0x1ee   : > { %v1851_v16 = vadd.bf16 %v1789_v13, %v1697_v50  ;;  %v1060_v25 = vrot.slane %v4714_v57, 1  ;;  %v1992_v22 = vmul.bf16 %v4047_v29, %v4720_v59  ;;  %v4752_v58 = vrot.slane %v1730_v33, 4  ;;  %v3072_v0 = vpop.f32.mrb[69].mxu0  ;;  %v4773_v57 = vld [vmem:[#allocation2 + $0x218] sm:$0xff] }
 0x1ef   : > { %v939_v17 = vsel %vm917_vm4, %v892_v60, %v893_v23  ;;  %v1103_v48 = vsel %vm1081_vm5, %v1058_v15, %v1059_v28  ;;  %850 = vst.msk [vmem:[#allocation2 + $0x80] sm:$0xff] %vm833_vm3, %v822_v7  ;;  %v938_v14 = vsel %vm917_vm4, %v893_v23, %v894_v42  ;;  %v1291_v30 = vmul.bf16 %v3994_v43, %v4695_v26  ;;  %v4770_v1 = vpop.f32.mrb[70].mxu0 }
 0x1f0   : > { %v1905_v2 = vadd.bf16 %v1881_v55, %v1851_v16  ;;  %v1151_v8 = vpack.c.bf16 %v1103_v48, %v1104_v34  ;;  %v1102_v53 = vsel %vm1081_vm5, %v1059_v28, %v1060_v25  ;;  %v988_v60 = vpack.c.bf16 %v938_v14, %v939_v17  ;;  %v3073_v26 = vpop.f32.mrb[71].mxu0  ;;  %v4807_v17 = vld [vmem:[#allocation2 + $0x148] sm:$0xff]  ;;  %v4809_v48 = vld [vmem:[#allocation2 + $0x70] sm:$0xff] }
 0x1f1   : > { %v1422_v15 = vmul.bf16 %v3997_v44, %v4748_v3  ;;  %v1483_v61 = vsel %vm1460_vm6, %v4675_v27, %v4733_v62  ;;  %v1390_v34 = vadd.bf16 %v1366_v32, %v1314_v51  ;;  %v1577_v47 = vmul.bf16 %v4000_v45, %v1261_v24 }
 0x1f2   : > { %v1959_v49 = vadd.bf16 %v1935_v54, %v1905_v2  ;;  %1179 = vst.msk [vmem:[#allocation2 + $0x228] sm:$0xff] %vm833_vm3, %v1151_v8  ;;  %v1544_v41 = vadd.bf16 %v1483_v61, %v1389_v21  ;;  %v1315_v12 = vadd.bf16 %v1291_v30, %v1236_v40  ;;  %v1367_v13 = vmul.bf16 %v4029_v10, %v4720_v59 }
 0x1f3   : > { %1016 = vst.msk [vmem:[#allocation2 + $0x158] sm:$0xff] %vm833_vm3, %v988_v60  ;;  %v1637_v27 = vsel %vm1460_vm6, %v4677_v39, %v4735_v4  ;;  %v1791_v51 = vsel %vm1460_vm6, %v4697_v56, %v4752_v58  ;;  %v1237_v21 = vmul.bf16 %v4026_v9, %v4748_v3  ;;  %v4789_v50 = vrot.slane %v1422_v15, 4 }
 0x1f4   : > { %v4785_v32 = vadd.bf16 %v1992_v22, %v1959_v49  ;;  %v1698_v40 = vadd.bf16 %v1637_v27, %v1544_v41  ;;  %v4791_v55 = vrot.slane %v1577_v47, 4  ;;  %v1882_v59 = vmul.bf16 %v4040_v19, %v4748_v3  ;;  %v4832_v27 = vld [vmem:[#allocation2 + $0x220] sm:$0xff] }
 0x1f5   : > { %v1731_v39 = vmul.bf16 %v4032_v11, %v4773_v57  ;;  %v895_v33 = vrot.slane %v727_v18, 7  ;;  %v1061_v23 = vrot.slane %v727_v18, 1  ;;  %v823_v28 = vpack.c.bf16 %v4770_v1, %v727_v18  ;;  %v735_v2 = vpop.f32.mrb[72].mxu0 }
 0x1f6   : > { %2289 = vrot.lane.b32.xlu1 %v4785_v32, %s3557_s23  ;;  %v1852_v56 = vadd.bf16 %v1791_v51, %v1698_v40  ;;  %v896_v7 = vrot.slane %v4770_v1, 7  ;;  %v1936_v16 = vmul.bf16 %v4043_v20, %v1261_v24  ;;  %v1993_v54 = vmul.bf16 %v4047_v29, %v4773_v57  ;;  %v3076_v30 = vpop.f32.mrb[73].mxu0 }
 0x1f7   : > { %v937_v3 = vsel %vm917_vm4, %v894_v42, %v895_v33  ;;  %v1062_v22 = vrot.slane %v4770_v1, 1  ;;  %v4811_v14 = vrot.slane %v1731_v39, 4  ;;  %v1101_v18 = vsel %vm1081_vm5, %v1060_v25, %v1061_v23  ;;  %851 = vst.msk [vmem:[#allocation2 + $0x88] sm:$0xff] %vm833_vm3, %v823_v28  ;;  %v4821_v1 = vpop.f32.mrb[74].mxu0  ;;  %v4870_v30 = vld [vmem:[#allocation2 + $0x78] sm:$0xff] }
 0x1f8   : > { %v1906_v8 = vadd.bf16 %v1882_v59, %v1852_v56  ;;  %v936_v0 = vsel %vm917_vm4, %v895_v33, %v896_v7  ;;  %v1292_v42 = vmul.bf16 %v3994_v43, %v1261_v24  ;;  %v1152_v60 = vpack.c.bf16 %v1101_v18, %v1102_v53  ;;  %v3077_v26 = vpop.f32.mrb[75].mxu0 }
 0x1f9   : > { %v989_v15 = vpack.c.bf16 %v936_v0, %v937_v3  ;;  %v1100_v61 = vsel %vm1081_vm5, %v1061_v23, %v1062_v22  ;;  %v1423_v41 = vmul.bf16 %v3997_v44, %v4807_v17  ;;  %v1485_v25 = vsel %vm1460_vm6, %v4733_v62, %v4789_v50 }
 0x1fa   : > { %v1960_v49 = vadd.bf16 %v1936_v16, %v1906_v8  ;;  %v1578_v47 = vmul.bf16 %v4000_v45, %v4809_v48  ;;  %v1391_v24 = vadd.bf16 %v1367_v13, %v1315_v12  ;;  %v1316_v53 = vadd.bf16 %v1292_v42, %v1237_v21  ;;  %1180 = vst.msk [vmem:[#allocation2 + $0x230] sm:$0xff] %vm833_vm3, %v1152_v60 }
 0x1fb   : > { %1017 = vst.msk [vmem:[#allocation2 + $0x160] sm:$0xff] %vm833_vm3, %v989_v15  ;;  %v1545_v51 = vadd.bf16 %v1485_v25, %v1390_v34  ;;  %v1368_v59 = vmul.bf16 %v4029_v10, %v4773_v57  ;;  %v1639_v62 = vsel %vm1460_vm6, %v4735_v4, %v4791_v55  ;;  %v1793_v12 = vsel %vm1460_vm6, %v4752_v58, %v4811_v14 }
 0x1fc   : > { %v4834_v40 = vadd.bf16 %v1993_v54, %v1960_v49  ;;  %v4844_v13 = vrot.slane %v1423_v41, 4  ;;  %v4846_v21 = vrot.slane %v1578_v47, 4  ;;  %v1883_v34 = vmul.bf16 %v4040_v19, %v4807_v17  ;;  %v4859_v54 = vld [vmem:[#allocation2 + $0x150] sm:$0xff] }
 0x1fd   : > { %v1699_v39 = vadd.bf16 %v1639_v62, %v1545_v51  ;;  %v1732_v57 = vmul.bf16 %v4032_v11, %v4832_v27  ;;  %v897_v33 = vrot.slane %v735_v2, 7  ;;  %v1063_v4 = vrot.slane %v735_v2, 1  ;;  %v743_v3 = vpop.f32.mrb[76].mxu0 }
 0x1fe   : > { %2291 = vrot.lane.b32.xlu0 %v4834_v40, %s3557_s23  ;;  %v824_v56 = vpack.c.bf16 %v4821_v1, %v735_v2  ;;  %v1937_v58 = vmul.bf16 %v4043_v20, %v4809_v48  ;;  %v898_v28 = vrot.slane %v4821_v1, 7  ;;  %v1064_v16 = vrot.slane %v4821_v1, 1  ;;  %v3080_v42 = vpop.f32.mrb[77].mxu0 }
 0x1ff   : > { %v1853_v23 = vadd.bf16 %v1793_v12, %v1699_v39  ;;  %v1994_v8 = vmul.bf16 %v4047_v29, %v4832_v27  ;;  %v4863_v18 = vrot.slane %v1732_v57, 4  ;;  %v935_v0 = vsel %vm917_vm4, %v896_v7, %v897_v33  ;;  %v746_v41 = vpop.f32.mrb[78].mxu0 }
 0x200   : > { %v1099_v2 = vsel %vm1081_vm5, %v1062_v22, %v1063_v4  ;;  %852 = vst.msk [vmem:[#allocation2 + $0x90] sm:$0xff] %vm833_vm3, %v824_v56  ;;  %v934_v1 = vsel %vm917_vm4, %v897_v33, %v898_v28  ;;  %v1098_v49 = vsel %vm1081_vm5, %v1063_v4, %v1064_v16  ;;  %v1424_v7 = vmul.bf16 %v3997_v44, %v4859_v54  ;;  %v3081_v47 = vpop.f32.mrb[79].mxu0 }
 0x201   : > { %v1907_v60 = vadd.bf16 %v1883_v34, %v1853_v23  ;;  %v1153_v15 = vpack.c.bf16 %v1099_v2, %v1100_v61  ;;  %v990_v25 = vpack.c.bf16 %v934_v1, %v935_v0  ;;  %v1487_v22 = vsel %vm1460_vm6, %v4789_v50, %v4844_v13  ;;  %v4884_v61 = vld [vmem:[#allocation2 + $0x228] sm:$0xff]  ;;  %v4926_v47 = vld [vmem:[#allocation2 + $0x80] sm:$0xff] }
 0x202   : > { %v4881_v26 = vadd.bf16 %v1368_v59, %v1316_v53  ;;  %v1546_v62 = vadd.bf16 %v1487_v22, %v1391_v24  ;;  %v1579_v12 = vmul.bf16 %v4000_v45, %v4870_v30  ;;  %v1238_v39 = vmul.bf16 %v4026_v9, %v4807_v17  ;;  %v5577_v1 = vld [vmem:[#allocation16_spill] sm:$0xff]  ;;  %v4924_v22 = vld [vmem:[#allocation2 + $0x158] sm:$0xff] }
 0x203   : > { %v1961_v51 = vadd.bf16 %v1937_v58, %v1907_v60  ;;  %1181 = vst.msk [vmem:[#allocation2 + $0x238] sm:$0xff] %vm833_vm3, %v1153_v15  ;;  %v1293_v34 = vmul.bf16 %v3994_v43, %v4809_v48  ;;  %1018 = vst.msk [vmem:[#allocation2 + $0x168] sm:$0xff] %vm833_vm3, %v990_v25  ;;  %v1641_v50 = vsel %vm1460_vm6, %v4791_v55, %v4846_v21  ;;  %v1488_v59 = vrot.slane %v1424_v7, 4 }
 0x204   : > { %v1795_v53 = vsel %vm1460_vm6, %v4811_v14, %v4863_v18  ;;  %v1700_v57 = vadd.bf16 %v1641_v50, %v1546_v62  ;;  %v1884_v17 = vmul.bf16 %v4040_v19, %v4859_v54  ;;  %v4903_v33 = vrot.slane %v1579_v12, 4 }
 0x205   : > { %v4899_v24 = vadd.bf16 %v1994_v8, %v1961_v51  ;;  %v1938_v48 = vmul.bf16 %v4043_v20, %v4870_v30  ;;  %v1733_v4 = vmul.bf16 %v4032_v11, %v4884_v61  ;;  %v899_v55 = vrot.slane %v743_v3, 7  ;;  %v5579_v51 = vld [vmem:[#allocation17_spill] sm:$0xff] }
 0x206   : > { %v1854_v14 = vadd.bf16 %v1795_v53, %v1700_v57  ;;  %v1065_v56 = vrot.slane %v743_v3, 1  ;;  %v825_v23 = vpack.c.bf16 %v746_v41, %v743_v3  ;;  %v900_v58 = vrot.slane %v746_v41, 7 }
 0x207   : > { %2293 = vrot.lane.b32.xlu1 %v4899_v24, %s3557_s23  ;;  %v1995_v8 = vmul.bf16 %v4047_v29, %v4884_v61  ;;  %v1796_v0 = vrot.slane %v1733_v4, 4  ;;  %v933_v2 = vsel %vm917_vm4, %v898_v28, %v899_v55  ;;  %v1066_v42 = vrot.slane %v746_v41, 1 }
 0x208   : > { %v1908_v60 = vadd.bf16 %v1884_v17, %v1854_v14  ;;  %v1097_v15 = vsel %vm1081_vm5, %v1064_v16, %v1065_v56  ;;  %853 = vst.msk [vmem:[#allocation2 + $0x98] sm:$0xff] %vm833_vm3, %v825_v23  ;;  %v5578_v25 = vrot.slane %v5577_v1, 7  ;;  %v932_v7 = vsel %vm917_vm4, %v899_v55, %v900_v58  ;;  %v1343_v14 = vld [vmem:[#allocation2 + $0x230] sm:$0xff]  ;;  %v4953_v23 = vld [vmem:[#allocation2 + $0x160] sm:$0xff] }
 0x209   : > { %v1154_v28 = vpack.c.bf16 %v1097_v15, %v1098_v49  ;;  %v991_v41 = vpack.c.bf16 %v932_v7, %v933_v2  ;;  %v5580_v16 = vrot.slane %v5577_v1, 1  ;;  %v1369_v50 = vmul.bf16 %v4029_v10, %v4832_v27 }
 0x20a   : > { %v931_v3 = vsel %vm917_vm4, %v900_v58, %v5578_v25  ;;  %v1239_v53 = vmul.bf16 %v4026_v9, %v4859_v54  ;;  %v1962_v57 = vadd.bf16 %v1938_v48, %v1908_v60  ;;  %v1096_v17 = vsel %vm1081_vm5, %v1065_v56, %v1066_v42  ;;  %v4975_v7 = vld [vmem:[#allocation2 + $0x238] sm:$0xff] }
 0x20b   : > { %v992_v62 = vpack.c.bf16 %v5579_v51, %v931_v3  ;;  %v1095_v12 = vsel %vm1081_vm5, %v1066_v42, %v5580_v16  ;;  %1182 = vst.msk [vmem:[#allocation2 + $0x240] sm:$0xff] %vm833_vm3, %v1154_v28  ;;  %1019 = vst.msk [vmem:[#allocation2 + $0x170] sm:$0xff] %vm833_vm3, %v991_v41  ;;  %v1425_v4 = vmul.bf16 %v3997_v44, %v4924_v22 }
 0x20c   : > { %v1155_v49 = vpack.c.bf16 %v1095_v12, %v1096_v17  ;;  %v1489_v27 = vsel %vm1460_vm6, %v4844_v13, %v1488_v59  ;;  %v1580_v54 = vmul.bf16 %v4000_v45, %v4926_v47  ;;  %v1317_v48 = vadd.bf16 %v1293_v34, %v1238_v39  ;;  %v4963_v34 = vld [vmem:[#allocation2 + $0x88] sm:$0xff] }
 0x20d   : > { %1020 = vst.msk [vmem:[#allocation2 + $0x178] sm:$0xff] %vm833_vm3, %v992_v62  ;;  %v1294_v31 = vmul.bf16 %v3994_v43, %v4870_v30  ;;  %v4950_v55 = vadd.bf16 %v1995_v8, %v1962_v57  ;;  %v1547_v56 = vadd.bf16 %v1489_v27, %v4881_v26  ;;  %v1370_v58 = vmul.bf16 %v4029_v10, %v4884_v61 }
 0x20e   : > { %1183 = vst.msk [vmem:[#allocation2 + $0x248] sm:$0xff] %vm833_vm3, %v1155_v49  ;;  %v1490_v13 = vrot.slane %v1425_v4, 4  ;;  %v1643_v39 = vsel %vm1460_vm6, %v4846_v21, %v4903_v33  ;;  %v1797_v30 = vsel %vm1460_vm6, %v4863_v18, %v1796_v0  ;;  %v1644_v26 = vrot.slane %v1580_v54, 4 }
 0x20f   : > { %2295 = vrot.lane.b32.xlu0 %v4950_v55, %s3557_s23  ;;  %v1701_v8 = vadd.bf16 %v1643_v39, %v1547_v56  ;;  %v1393_v2 = vadd.bf16 %v1369_v50, %v1317_v48  ;;  %v1318_v42 = vadd.bf16 %v1294_v31, %v1239_v53  ;;  %v1734_v61 = vmul.bf16 %v4032_v11, %v1343_v14  ;;  %v4982_v50 = vld [vmem:[#allocation2 + $0x168] sm:$0xff]  ;;  %v1266_v48 = vld [vmem:[#allocation2 + $0x90] sm:$0xff] }
 0x210   : > { %v1426_v60 = vmul.bf16 %v3997_v44, %v4953_v23  ;;  %v1885_v21 = vmul.bf16 %v4040_v19, %v4924_v22  ;;  %v1491_v18 = vsel %vm1460_vm6, %v1488_v59, %v1490_v13  ;;  %v1581_v1 = vmul.bf16 %v4000_v45, %v4963_v34 }
 0x211   : > { %v1855_v15 = vadd.bf16 %v1797_v30, %v1701_v8  ;;  %v1394_v25 = vadd.bf16 %v1370_v58, %v1318_v42  ;;  %v1798_v3 = vrot.slane %v1734_v61, 4  ;;  %v1548_v41 = vadd.bf16 %v1491_v18, %v1393_v2 }
 0x212   : > { %v1492_v28 = vrot.slane %v1426_v60, 4  ;;  %v1939_v62 = vmul.bf16 %v4043_v20, %v4926_v47  ;;  %v1996_v16 = vmul.bf16 %v4047_v29, %v1343_v14  ;;  %v1645_v12 = vsel %vm1460_vm6, %v4903_v33, %v1644_v26  ;;  %v1345_v8 = vld [vmem:[#allocation2 + $0x240] sm:$0xff] }
 0x213   : > { %v1909_v51 = vadd.bf16 %v1885_v21, %v1855_v15  ;;  %v1240_v59 = vmul.bf16 %v4026_v9, %v4924_v22  ;;  %v1295_v53 = vmul.bf16 %v3994_v43, %v4926_v47  ;;  %v1702_v57 = vadd.bf16 %v1645_v12, %v1548_v41  ;;  %v1212_v41 = vld [vmem:[#allocation2 + $0x170] sm:$0xff] }
 0x214   : > { %v1799_v17 = vsel %vm1460_vm6, %v1796_v0, %v1798_v3  ;;  %v1371_v4 = vmul.bf16 %v4029_v10, %v1343_v14  ;;  %v1646_v27 = vrot.slane %v1581_v1, 4  ;;  %v1735_v54 = vmul.bf16 %v4032_v11, %v4975_v7 }
 0x215   : > { %v1963_v49 = vadd.bf16 %v1939_v62, %v1909_v51  ;;  %v1856_v33 = vadd.bf16 %v1799_v17, %v1702_v57  ;;  %v1886_v31 = vmul.bf16 %v4040_v19, %v4953_v23  ;;  %v1427_v22 = vmul.bf16 %v3997_v44, %v4982_v50 }
 0x216   : > { %v1493_v47 = vsel %vm1460_vm6, %v1490_v13, %v1492_v28  ;;  %v1940_v0 = vmul.bf16 %v4043_v20, %v4963_v34  ;;  %v1800_v14 = vrot.slane %v1735_v54, 4  ;;  %v1997_v30 = vmul.bf16 %v4047_v29, %v4975_v7 }
 0x217   : > { %v4997_v56 = vadd.bf16 %v1996_v16, %v1963_v49  ;;  %v1549_v58 = vadd.bf16 %v1493_v47, %v1394_v25  ;;  %v1910_v39 = vadd.bf16 %v1886_v31, %v1856_v33  ;;  %v5003_v2 = vrot.slane %v1427_v22, 4  ;;  %v1267_v49 = vld [vmem:[#allocation2 + $0x98] sm:$0xff]  ;;  %v1346_v47 = vld [vmem:[#allocation2 + $0x248] sm:$0xff] }
 0x218   : > { %v1582_v42 = vmul.bf16 %v4000_v45, %v1266_v48  ;;  %v1319_v61 = vadd.bf16 %v1295_v53, %v1240_v59  ;;  %v1647_v13 = vsel %vm1460_vm6, %v1644_v26, %v1646_v27  ;;  %v1801_v60 = vsel %vm1460_vm6, %v1798_v3, %v1800_v14 }
 0x219   : > { %2297 = vrot.lane.b32.xlu1 %v4997_v56, %s3557_s23  ;;  %v1964_v15 = vadd.bf16 %v1940_v0, %v1910_v39  ;;  %v1703_v18 = vadd.bf16 %v1647_v13, %v1549_v58  ;;  %v1736_v25 = vmul.bf16 %v4032_v11, %v1345_v8  ;;  %v1887_v16 = vmul.bf16 %v4040_v19, %v4982_v50  ;;  %v5036_v0 = vld [vmem:[#allocation2 + $0x178] sm:$0xff] }
 0x21a   : > { %v5010_v21 = vrot.slane %v1582_v42, 4  ;;  %v1395_v1 = vadd.bf16 %v1371_v4, %v1319_v61  ;;  %v1495_v12 = vsel %vm1460_vm6, %v1492_v28, %v5003_v2  ;;  %v1241_v26 = vmul.bf16 %v4026_v9, %v4953_v23  ;;  %v5040_v42 = vld [vmem:[#allocation2 + $0xa0] sm:$0xff] }
 0x21b   : > { %v5013_v51 = vadd.bf16 %v1997_v30, %v1964_v15  ;;  %v1857_v62 = vadd.bf16 %v1801_v60, %v1703_v18  ;;  %v1941_v3 = vmul.bf16 %v4043_v20, %v1266_v48  ;;  %v5022_v59 = vrot.slane %v1736_v25, 4  ;;  %v5048_v18 = vld [vmem:[#allocation2 + $0x250] sm:$0xff] }
 0x21c   : > { %v1550_v53 = vadd.bf16 %v1495_v12, %v1395_v1  ;;  %v1998_v17 = vmul.bf16 %v4047_v29, %v1345_v8  ;;  %v1428_v4 = vmul.bf16 %v3997_v44, %v1212_v41  ;;  %v1649_v28 = vsel %vm1460_vm6, %v1646_v27, %v5010_v21 }
 0x21d   : > { %2299 = vrot.lane.b32.xlu0 %v5013_v51, %s3557_s23  ;;  %v1911_v57 = vadd.bf16 %v1887_v16, %v1857_v62  ;;  %v1296_v23 = vmul.bf16 %v3994_v43, %v4963_v34  ;;  %v1803_v33 = vsel %vm1460_vm6, %v1800_v14, %v5022_v59  ;;  %v1242_v31 = vmul.bf16 %v4026_v9, %v4982_v50 }
 0x21e   : > { %v1704_v54 = vadd.bf16 %v1649_v28, %v1550_v53  ;;  %v1888_v30 = vmul.bf16 %v4040_v19, %v1212_v41  ;;  %v1583_v27 = vmul.bf16 %v4000_v45, %v1267_v49  ;;  %v1297_v34 = vmul.bf16 %v3994_v43, %v1266_v48 }
 0x21f   : > { %v1965_v22 = vadd.bf16 %v1941_v3, %v1911_v57  ;;  %v1320_v58 = vadd.bf16 %v1296_v23, %v1241_v26  ;;  %v1373_v14 = vmul.bf16 %v4029_v10, %v1345_v8  ;;  %v1496_v13 = vrot.slane %v1428_v4, 4  ;;  %v1269_v4 = vld [vmem:[#allocation2 + $0xa8] sm:$0xff] }
 0x220   : > { %v1858_v39 = vadd.bf16 %v1803_v33, %v1704_v54  ;;  %v1737_v50 = vmul.bf16 %v4032_v11, %v1346_v47  ;;  %v1942_v15 = vmul.bf16 %v4043_v20, %v1267_v49  ;;  %v1429_v1 = vmul.bf16 %v3997_v44, %v5036_v0 }
 0x221   : > { %v5043_v61 = vadd.bf16 %v1998_v17, %v1965_v22  ;;  %v1372_v25 = vmul.bf16 %v4029_v10, %v4975_v7  ;;  %v1321_v62 = vadd.bf16 %v1297_v34, %v1242_v31  ;;  %v1243_v48 = vmul.bf16 %v4026_v9, %v1212_v41  ;;  %v1214_v17 = vld [vmem:[#allocation2 + $0x180] sm:$0xff] }
 0x222   : > { %v1912_v60 = vadd.bf16 %v1888_v30, %v1858_v39  ;;  %v1584_v8 = vmul.bf16 %v4000_v45, %v5040_v42  ;;  %v1999_v12 = vmul.bf16 %v4047_v29, %v1346_v47  ;;  %v1650_v26 = vrot.slane %v1583_v27, 4  ;;  %v5072_v39 = vld [vmem:[#allocation2 + $0x258] sm:$0xff] }
 0x223   : > { %2301 = vrot.lane.b32.xlu1 %v5043_v61, %s3557_s23  ;;  %v5060_v3 = vrot.slane %v1429_v1, 4  ;;  %v1397_v53 = vadd.bf16 %v1373_v14, %v1321_v62  ;;  %v1298_v57 = vmul.bf16 %v3994_v43, %v1267_v49  ;;  %v2057_v7 = vmul.bf16 1027030327, %v4319_v52 }
 0x224   : > { %v1966_v16 = vadd.bf16 %v1942_v15, %v1912_v60  ;;  %v1738_v28 = vmul.bf16 %v4032_v11, %v5048_v18  ;;  %v1804_v41 = vrot.slane %v1737_v50, 4  ;;  %v5070_v33 = vrot.slane %v1584_v8, 4 }
 0x225   : > { %v1499_v54 = vsel %vm1460_vm6, %v1496_v13, %v5060_v3  ;;  %v1396_v31 = vadd.bf16 %v1372_v25, %v1320_v58  ;;  %v1322_v22 = vadd.bf16 %v1298_v57, %v1243_v48  ;;  %v1245_v30 = vmul.bf16 %v4026_v9, %v1214_v17  ;;  %v5099_v57 = vld [vmem:[#allocation2 + $0x188] sm:$0xff] }
 0x226   : > { %v5066_v23 = vadd.bf16 %v1999_v12, %v1966_v16  ;;  %v1552_v49 = vadd.bf16 %v1499_v54, %v1397_v53  ;;  %v1300_v27 = vmul.bf16 %v3994_v43, %v1269_v4  ;;  %v1653_v34 = vsel %vm1460_vm6, %v1650_v26, %v5070_v33 }
 0x227   : > { %v5080_v14 = vrot.slane %v1738_v28, 4  ;;  %v1374_v50 = vmul.bf16 %v4029_v10, %v1346_v47  ;;  %v5084_v58 = vmul.bf16 %v2057_v7, %v4319_v52  ;;  %v1497_v15 = vsel %vm1460_vm6, %v5003_v2, %v1496_v13 }
 0x228   : > { %2303 = vrot.lane.b32.xlu0 %v5066_v23, %s3557_s23  ;;  %v1706_v60 = vadd.bf16 %v1653_v34, %v1552_v49  ;;  %v1376_v1 = vmul.bf16 %v4029_v10, %v5072_v39  ;;  %v1430_v25 = vmul.bf16 %v3997_v44, %v1214_v17  ;;  %v1551_v48 = vadd.bf16 %v1497_v15, %v1396_v31  ;;  %v1216_v15 = vld [vmem:[#allocation2 + $0x190] sm:$0xff] }
 0x229   : > { %v1807_v62 = vsel %vm1460_vm6, %v1804_v41, %v5080_v14  ;;  %v5093_v8 = vadd.bf16 %v1374_v50, %v1322_v22  ;;  %v1890_v47 = vmul.bf16 %v4040_v19, %v1214_v17  ;;  %v1651_v12 = vsel %vm1460_vm6, %v5010_v21, %v1650_v26  ;;  %v5106_v22 = vld [vmem:[#allocation2 + $0xb0] sm:$0xff] }
 0x22a   : > { %v1860_v16 = vadd.bf16 %v1807_v62, %v1706_v60  ;;  %v1324_v53 = vadd.bf16 %v1300_v27, %v1245_v30  ;;  %v1585_v2 = vmul.bf16 %v4000_v45, %v1269_v4  ;;  %v1705_v13 = vadd.bf16 %v1651_v12, %v1551_v48 }
 0x22b   : > { %v1244_v7 = vmul.bf16 %v4026_v9, %v5036_v0  ;;  %v1944_v54 = vmul.bf16 %v4043_v20, %v1269_v4  ;;  %v1805_v31 = vsel %vm1460_vm6, %v5022_v59, %v1804_v41  ;;  %v1299_v21 = vmul.bf16 %v3994_v43, %v5040_v42 }
 0x22c   : > { %v1914_v28 = vadd.bf16 %v1890_v47, %v1860_v16  ;;  %v1500_v26 = vrot.slane %v1430_v25, 4  ;;  %v2001_v17 = vmul.bf16 %v4047_v29, %v5072_v39  ;;  %v1859_v49 = vadd.bf16 %v1805_v31, %v1705_v13  ;;  %v5120_v25 = vld [vmem:[#allocation2 + $0x260] sm:$0xff]  ;;  %v1271_v16 = vld [vmem:[#allocation2 + $0xb8] sm:$0xff] }
 0x22d   : > { %v1889_v30 = vmul.bf16 %v4040_v19, %v5036_v0  ;;  %v1323_v34 = vadd.bf16 %v1299_v21, %v1244_v7  ;;  %v1375_v4 = vmul.bf16 %v4029_v10, %v5048_v18  ;;  %v1431_v59 = vmul.bf16 %v3997_v44, %v5099_v57 }
 0x22e   : > { %v1968_v27 = vadd.bf16 %v1944_v54, %v1914_v28  ;;  %v1654_v41 = vrot.slane %v1585_v2, 4  ;;  %v1943_v60 = vmul.bf16 %v4043_v20, %v5040_v42  ;;  %v1586_v62 = vmul.bf16 %v4000_v45, %v5106_v22 }
 0x22f   : > { %v1913_v50 = vadd.bf16 %v1889_v30, %v1859_v49  ;;  %v1739_v0 = vmul.bf16 %v4032_v11, %v5072_v39  ;;  %v1399_v47 = vadd.bf16 %v1375_v4, %v1323_v34  ;;  %v5128_v12 = vrot.slane %v1431_v59, 4 }
 0x230   : > { %v5126_v48 = vadd.bf16 %v2001_v17, %v1968_v27  ;;  %v2000_v13 = vmul.bf16 %v4047_v29, %v5048_v18  ;;  %v1247_v42 = vmul.bf16 %v4026_v9, %v1216_v15  ;;  %v1302_v7 = vmul.bf16 %v3994_v43, %v1271_v16  ;;  %v1350_v17 = vld [vmem:[#allocation2 + $0x268] sm:$0xff] }
 0x231   : > { %v1967_v2 = vadd.bf16 %v1943_v60, %v1913_v50  ;;  %v1432_v28 = vmul.bf16 %v3997_v44, %v1216_v15  ;;  %v1503_v39 = vsel %vm1460_vm6, %v1500_v26, %v5128_v12  ;;  %v1656_v54 = vrot.slane %v1586_v62, 4  ;;  %v1866_v50 = vld [vmem:[#allocation2 + $0x1a0] sm:$0xff] }
 0x232   : > { %2307 = vrot.lane.b32.xlu0 %v5126_v48, %s3557_s23  ;;  %v1740_v31 = vmul.bf16 %v4032_v11, %v5120_v25  ;;  %v1554_v49 = vadd.bf16 %v1503_v39, %v1399_v47  ;;  %v1587_v30 = vmul.bf16 %v4000_v45, %v1271_v16  ;;  %v5146_v27 = vadd.bf16 %v1376_v1, %v1324_v53 }
 0x233   : > { %v5143_v18 = vadd.bf16 %v2000_v13, %v1967_v2  ;;  %v1808_v34 = vrot.slane %v1739_v0, 4  ;;  %v1657_v4 = vsel %vm1460_vm6, %v1654_v41, %v1656_v54  ;;  %v1326_v60 = vadd.bf16 %v1302_v7, %v1247_v42  ;;  %v5161_v42 = vld [vmem:[#allocation2 + $0xc0] sm:$0xff]  ;;  %v5163_v7 = vld [vmem:[#allocation2 + $0x270] sm:$0xff] }
 0x234   : > { %v1810_v59 = vrot.slane %v1740_v31, 4  ;;  %v1378_v62 = vmul.bf16 %v4029_v10, %v1350_v17  ;;  %v1708_v2 = vadd.bf16 %v1657_v4, %v1554_v49  ;;  %v1504_v13 = vrot.slane %v1432_v28, 4 }
 0x235   : > { %5581 = vst [vmem:[#allocation16_spill] sm:$0xff] %v5143_v18  ;;  %2305 = vrot.lane.b32.xlu1 %v5143_v18, %s3557_s23  ;;  %v1741_v47 = vmul.bf16 %v4032_v11, %v1350_v17  ;;  %v1501_v1 = vsel %vm1460_vm6, %v5060_v3, %v1500_v26  ;;  %v1658_v53 = vrot.slane %v1587_v30, 4  ;;  %v1892_v31 = vmul.bf16 %v4040_v19, %v1216_v15  ;;  %v5159_v18 = vld [vmem:[#allocation2 + $0x198] sm:$0xff] }
 0x236   : > { %v1811_v39 = vsel %vm1460_vm6, %v1808_v34, %v1810_v59  ;;  %v1553_v21 = vadd.bf16 %v1501_v1, %v5093_v8  ;;  %v1946_v28 = vmul.bf16 %v4043_v20, %v1271_v16  ;;  %v2003_v49 = vmul.bf16 %v4047_v29, %v1350_v17 }
 0x237   : > { %v1862_v0 = vadd.bf16 %v1811_v39, %v1708_v2  ;;  %v1655_v4 = vsel %vm1460_vm6, %v5070_v33, %v1654_v41  ;;  %v1246_v3 = vmul.bf16 %v4026_v9, %v5099_v57  ;;  %v1809_v8 = vsel %vm1460_vm6, %v5080_v14, %v1808_v34 }
 0x238   : > { %v1707_v15 = vadd.bf16 %v1655_v4, %v1553_v21  ;;  %v1301_v30 = vmul.bf16 %v3994_v43, %v5106_v22  ;;  %v1377_v2 = vmul.bf16 %v4029_v10, %v5120_v25  ;;  %v1433_v16 = vmul.bf16 %v3997_v44, %v5159_v18 }
 0x239   : > { %v1916_v26 = vadd.bf16 %v1892_v31, %v1862_v0  ;;  %v1588_v33 = vmul.bf16 %v4000_v45, %v5161_v42  ;;  %v1742_v9 = vmul.bf16 %v4032_v11, %v5163_v7  ;;  %v1891_v14 = vmul.bf16 %v4040_v19, %v5099_v57 }
 0x23a   : > { %v1861_v21 = vadd.bf16 %v1809_v8, %v1707_v15  ;;  %v1325_v17 = vadd.bf16 %v1301_v30, %v1246_v3  ;;  %v1812_v34 = vrot.slane %v1741_v47, 4  ;;  %v1506_v43 = vrot.slane %v1433_v16, 4  ;;  %v1920_v15 = vld [vmem:[#allocation2 + $0xc8] sm:$0xff]  ;;  %v1405_v30 = vld [vmem:[#allocation2 + $0x1a0] sm:$0xf] }
 0x23b   : > { %v1970_v41 = vadd.bf16 %v1946_v28, %v1916_v26  ;;  %v1660_v39 = vrot.slane %v1588_v33, 4  ;;  %v1814_v1 = vrot.slane %v1742_v9, 4  ;;  %v1945_v31 = vmul.bf16 %v4043_v20, %v5106_v22 }
 0x23c   : > { %v1915_v0 = vadd.bf16 %v1891_v14, %v1861_v21  ;;  %v1401_v4 = vadd.bf16 %v1377_v2, %v1325_v17  ;;  %v2002_v28 = vmul.bf16 %v4047_v29, %v5120_v25  ;;  %v1507_v26 = vsel %vm1460_vm6, %v1504_v13, %v1506_v43  ;;  %v1560_v2 = vld [vmem:[#allocation2 + $0xc8] sm:$0xf]  ;;  %v1974_v21 = vld [vmem:[#allocation2 + $0x278] sm:$0xff] }
 0x23d   : > { %v5185_v10 = vadd.bf16 %v2003_v49, %v1970_v41  ;;  %v1661_v57 = vsel %vm1460_vm6, %v1658_v53, %v1660_v39  ;;  %v1505_v47 = vsel %vm1460_vm6, %v5128_v12, %v1504_v13  ;;  %v1659_v8 = vsel %vm1460_vm6, %v1656_v54, %v1658_v53  ;;  %v1714_v12 = vld [vmem:[#allocation2 + $0x278] sm:$0xf] }
 0x23e   : > { %v1969_v49 = vadd.bf16 %v1945_v31, %v1915_v0  ;;  %v1556_v3 = vadd.bf16 %v1507_v26, %v1401_v4  ;;  %v1555_v22 = vadd.bf16 %v1505_v47, %v5146_v27  ;;  %v1402_v25 = vadd.bf16 %v1378_v62, %v1326_v60 }
 0x23f   : > { %2311 = vrot.lane.b32.xlu0 %v5185_v10, %s3557_s23  ;;  %v1815_v16 = vsel %vm1460_vm6, %v1812_v34, %v1814_v1  ;;  %v1894_v33 = vmul.bf16 %v4040_v19, %v1866_v50  ;;  %v1813_v9 = vsel %vm1460_vm6, %v1810_v59, %v1812_v34  ;;  %v1893_v27 = vmul.bf16 %v4040_v19, %v5159_v18 }
 0x240   : > { %v5202_v13 = vadd.bf16 %v2002_v28, %v1969_v49  ;;  %v1710_v41 = vadd.bf16 %v1661_v57, %v1556_v3  ;;  %v1709_v14 = vadd.bf16 %v1659_v8, %v1555_v22  ;;  %v1948_v54 = vmul.bf16 %v4043_v20, %v1920_v15  ;;  %v1867_v57 = vld [vmem:[#allocation2 + $0x1a8] sm:$0xff] }
 0x241   : > { %v2055_v53 = vmul.bf16 1027030327, %v4414_v35  ;;  %v1434_v60 = vmul.bf16 %v3997_v44, %v1405_v30  ;;  %v1589_v62 = vmul.bf16 %v4000_v45, %v1560_v2  ;;  %v1947_v17 = vmul.bf16 %v4043_v20, %v5161_v42 }
 0x242   : > { %2309 = vrot.lane.b32.xlu1 %v5202_v13, %s3557_s23  ;;  %v1864_v59 = vadd.bf16 %v1815_v16, %v1710_v41  ;;  %v1863_v50 = vadd.bf16 %v1813_v9, %v1709_v14  ;;  %v1743_v34 = vmul.bf16 %v4032_v11, %v1714_v12  ;;  %v2005_v18 = vmul.bf16 %v4047_v29, %v1974_v21  ;;  %v1921_v9 = vld [vmem:[#allocation2 + $0xd0] sm:$0xff] }
 0x243   : > { %v2079_v0 = vmul.bf16 %v2055_v53, %v4414_v35  ;;  %v1508_v31 = vrot.slane %v1434_v60, 4  ;;  %v1662_v4 = vrot.slane %v1589_v62, 4  ;;  %v2004_v45 = vmul.bf16 %v4047_v29, %v5163_v7  ;;  %v1975_v53 = vld [vmem:[#allocation2 + $0x280] sm:$0xff] }
 0x244   : > { %v1918_v28 = vadd.bf16 %v1894_v33, %v1864_v59  ;;  %v1917_v44 = vadd.bf16 %v1893_v27, %v1863_v50  ;;  %v1816_v26 = vrot.slane %v1743_v34, 4  ;;  %v5582_v47 = vmul.bf16 1027030327, %v4358_v46 }
 0x245   : > { %v2103_v42 = vmul.bf16 %v2079_v0, %v4414_v35  ;;  %v1509_v11 = vsel %vm1460_vm6, %v1506_v43, %v1508_v31  ;;  %v1663_v3 = vsel %vm1460_vm6, %v1660_v39, %v1662_v4  ;;  %v5583_v30 = vmul.bf16 %v5084_v58, %v4319_v52 }
 0x246   : > { %v2082_v49 = vmul.bf16 %v5582_v47, %v4358_v46  ;;  %v1972_v15 = vadd.bf16 %v1948_v54, %v1918_v28  ;;  %v1971_v22 = vadd.bf16 %v1947_v17, %v1917_v44  ;;  %v1557_v8 = vadd.bf16 %v1509_v11, %v1402_v25 }
 0x247   : > { %v2129_v7 = vadd.bf16 %v5583_v30, %v4319_v52  ;;  %v2127_v2 = vadd.bf16 %v2103_v42, %v4414_v35  ;;  %v1817_v16 = vsel %vm1460_vm6, %v1814_v1, %v1816_v26  ;;  %v1895_v33 = vmul.bf16 %v4040_v19, %v1867_v57 }
 0x248   : > { %v5232_v12 = vadd.bf16 %v2005_v18, %v1972_v15  ;;  %v5234_v43 = vadd.bf16 %v2004_v45, %v1971_v22  ;;  %v1711_v39 = vadd.bf16 %v1663_v3, %v1557_v8  ;;  %v2056_v41 = vmul.bf16 1027030327, %v4441_v5 }
 0x249   : > { %v2106_v25 = vmul.bf16 %v2082_v49, %v4358_v46  ;;  %v2151_v21 = vmul.bf16 1061961548, %v2127_v2  ;;  %v2059_v58 = vmul.bf16 1027030327, %v4500_v63  ;;  %v1949_v1 = vmul.bf16 %v4043_v20, %v1921_v9  ;;  %v2272_v2 = vpop.permute.xlu0 %2271 }
 0x24a   : > { %2315 = vrot.lane.b32.xlu0 %v5232_v12, %s3557_s23  ;;  %2313 = vrot.lane.b32.xlu1 %v5234_v43, %s3557_s23  ;;  %v1865_v19 = vadd.bf16 %v1817_v16, %v1711_v39  ;;  %v2080_v14 = vmul.bf16 %v2056_v41, %v4441_v5  ;;  %v2060_v27 = vmul.bf16 1027030327, %v4555_v37  ;;  %v2153_v54 = vmul.bf16 1061961548, %v2129_v7 }
 0x24b   : > { %3295 = vtanh.bf16 %v2151_v21  ;;  %v2083_v60 = vmul.bf16 %v2059_v58, %v4500_v63  ;;  %v2061_v62 = vmul.bf16 1027030327, %v4607_v36  ;;  %v2130_v17 = vadd.bf16 %v2106_v25, %v4358_v46 }
 0x24c   : > { %v1919_v59 = vadd.bf16 %v1895_v33, %v1865_v19  ;;  %v2104_v50 = vmul.bf16 %v2080_v14, %v4441_v5  ;;  %v2006_v20 = vmul.bf16 %v4047_v29, %v1975_v53  ;;  %v2084_v31 = vmul.bf16 %v2060_v27, %v4555_v37 }
 0x24d   : > { %v2107_v34 = vmul.bf16 %v2083_v60, %v4500_v63  ;;  %3297 = vtanh.bf16 %v2153_v54  ;;  %v2085_v28 = vmul.bf16 %v2061_v62, %v4607_v36  ;;  %v2063_v26 = vmul.bf16 1027030327, %v4723_v38 }
 0x24e   : > { %v1973_v18 = vadd.bf16 %v1949_v1, %v1919_v59  ;;  %v2128_v0 = vadd.bf16 %v2104_v50, %v4441_v5  ;;  %v2154_v57 = vmul.bf16 1061961548, %v2130_v17  ;;  %v2108_v29 = vmul.bf16 %v2084_v31, %v4555_v37  ;;  %v2274_v50 = vpop.permute.xlu0 %2273  ;;  %v2276_v17 = vpop.permute.xlu1 %2275 }
 0x24f   : > { %v2131_v4 = vadd.bf16 %v2107_v34, %v4500_v63  ;;  %v2062_v47 = vmul.bf16 1027030327, %v4671_v6  ;;  %v2109_v42 = vmul.bf16 %v2085_v28, %v4607_v36  ;;  %v2087_v11 = vmul.bf16 %v2063_v26, %v4723_v38 }
 0x250   : > { %v5256_v44 = vadd.bf16 %v2006_v20, %v1973_v18  ;;  %v2152_v45 = vmul.bf16 1061961548, %v2128_v0  ;;  %v2132_v15 = vadd.bf16 %v2108_v29, %v4555_v37  ;;  %v2031_v8 = vmul.bf16 1056980736, %v4414_v35 }
 0x251   : > { %v2155_v49 = vmul.bf16 1061961548, %v2131_v4  ;;  %v2086_v22 = vmul.bf16 %v2062_v47, %v4671_v6  ;;  %v2133_v7 = vadd.bf16 %v2109_v42, %v4607_v36  ;;  %v2064_v16 = vmul.bf16 1027030327, %v4785_v32 }
 0x252   : > { %2317 = vrot.lane.b32.xlu1 %v5256_v44, %s3557_s23  ;;  %3299 = vtanh.bf16 %v2152_v45  ;;  %v2111_v9 = vmul.bf16 %v2087_v11, %v4723_v38  ;;  %v2065_v39 = vmul.bf16 1027030327, %v4834_v40  ;;  %v2156_v25 = vmul.bf16 1061961548, %v2132_v15 }
 0x253   : > { %3301 = vtanh.bf16 %v2154_v57  ;;  %v2110_v21 = vmul.bf16 %v2086_v22, %v4671_v6  ;;  %v2157_v19 = vmul.bf16 1061961548, %v2133_v7  ;;  %v2088_v35 = vmul.bf16 %v2064_v16, %v4785_v32  ;;  %v2278_v22 = vpop.permute.xlu1 %2277  ;;  %v2280_v7 = vpop.permute.xlu0 %2279 }
 0x254   : > { %3303 = vtanh.bf16 %v2155_v49  ;;  %v2135_v27 = vadd.bf16 %v2111_v9, %v4723_v38  ;;  %v2089_v54 = vmul.bf16 %v2065_v39, %v4834_v40  ;;  %v2032_v53 = vmul.bf16 1056980736, %v4441_v5 }
 0x255   : > { %3305 = vtanh.bf16 %v2156_v25  ;;  %v2134_v62 = vadd.bf16 %v2110_v21, %v4671_v6  ;;  %v2033_v59 = vmul.bf16 1056980736, %v4319_v52  ;;  %v2112_v18 = vmul.bf16 %v2088_v35, %v4785_v32 }
 0x256   : > { %v3296_v3 = vpop.eup %3295  ;;  %3307 = vtanh.bf16 %v2157_v19  ;;  %v2066_v20 = vmul.bf16 1027030327, %v4899_v24  ;;  %v2159_v4 = vmul.bf16 1061961548, %v2135_v27  ;;  %v2113_v28 = vmul.bf16 %v2089_v54, %v4834_v40 }
 0x257   : > { %v2199_v30 = vadd.bf16 1065369472, %v3296_v3  ;;  %v2067_v5 = vmul.bf16 1027030327, %v4950_v55  ;;  %v2158_v57 = vmul.bf16 1061961548, %v2134_v62  ;;  %v2136_v47 = vadd.bf16 %v2112_v18, %v4785_v32 }
 0x258   : > { %v3298_v41 = vpop.eup %3297  ;;  %v2090_v49 = vmul.bf16 %v2066_v20, %v4899_v24  ;;  %3309 = vtanh.bf16 %v2159_v4  ;;  %v2137_v11 = vadd.bf16 %v2113_v28, %v4834_v40  ;;  %v2034_v15 = vmul.bf16 1056980736, %v4358_v46 }
 0x259   : > { %v2223_v33 = vmul.bf16 %v2199_v30, %v2031_v8  ;;  %v2201_v14 = vadd.bf16 1065369472, %v3298_v41  ;;  %v2091_v3 = vmul.bf16 %v2067_v5, %v4950_v55  ;;  %3311 = vtanh.bf16 %v2158_v57 }
 0x25a   : > { %v2035_v8 = vmul.bf16 1056980736, %v4500_v63  ;;  %v2114_v16 = vmul.bf16 %v2090_v49, %v4899_v24  ;;  %v2161_v41 = vmul.bf16 1061961548, %v2137_v11  ;;  %v2069_v21 = vmul.bf16 1027030327, %v5013_v51 }
 0x25b   : > { %v2343_v58 = vmul.bf16 %v2272_v2, %v2223_v33  ;;  %v2225_v31 = vmul.bf16 %v2201_v14, %v2033_v59  ;;  %v2160_v2 = vmul.bf16 1061961548, %v2136_v47  ;;  %v2068_v33 = vmul.bf16 1027030327, %v4997_v56 }
 0x25c   : > { %v2115_v25 = vmul.bf16 %v2091_v3, %v4950_v55  ;;  %v2138_v63 = vadd.bf16 %v2114_v16, %v4899_v24  ;;  %v2093_v54 = vmul.bf16 %v2069_v21, %v5013_v51  ;;  %v2037_v62 = vmul.bf16 1056980736, %v4607_v36 }
 0x25d   : > { %v3300_v1 = vpop.eup %3299  ;;  %3112 = vmatprep.mubr.msk.bf16.mxu1 %vm2375_vm7, %v2343_v58  ;;  %v2345_v29 = vmul.bf16 %v2276_v17, %v2225_v31  ;;  %3313 = vtanh.bf16 %v2160_v2  ;;  %v2284_v17 = vpop.permute.xlu0 %2283  ;;  %v2070_v20 = vmul.bf16 1027030327, %v5043_v61  ;;  %v2071_v5 = vmul.bf16 1027030327, %v5066_v23 }
 0x25e   : > { %v2200_v60 = vadd.bf16 1065369472, %v3300_v1  ;;  %v3302_v0 = vpop.eup %3301  ;;  %v2092_v1 = vmul.bf16 %v2068_v33, %v4997_v56  ;;  %3315 = vtanh.bf16 %v2161_v41  ;;  %v2139_v27 = vadd.bf16 %v2115_v25, %v4950_v55 }
 0x25f   : > { %v3304_v45 = vpop.eup %3303  ;;  %v2202_v52 = vadd.bf16 1065369472, %v3302_v0  ;;  %v2117_v28 = vmul.bf16 %v2093_v54, %v5013_v51  ;;  %v2095_v49 = vmul.bf16 %v2071_v5, %v5066_v23 }
 0x260   : > { %v2224_v34 = vmul.bf16 %v2200_v60, %v2032_v53  ;;  %v2203_v42 = vadd.bf16 1065369472, %v3304_v45  ;;  %v3306_v9 = vpop.eup %3305  ;;  %v2036_v53 = vmul.bf16 1056980736, %v4555_v37  ;;  %v2282_v60 = vpop.permute.xlu1 %2281  ;;  %v2116_v18 = vmul.bf16 %v2092_v1, %v4997_v56 }
 0x261   : > { %v2226_v30 = vmul.bf16 %v2202_v52, %v2034_v15  ;;  %v3308_v58 = vpop.eup %3307  ;;  %v2204_v35 = vadd.bf16 1065369472, %v3306_v9  ;;  %v2163_v4 = vmul.bf16 1061961548, %v2139_v27  ;;  %v2039_v52 = vmul.bf16 1056980736, %v4723_v38  ;;  %v2288_v11 = vpop.permute.xlu0 %2287 }
 0x262   : > { %v2344_v26 = vmul.bf16 %v2274_v50, %v2224_v34  ;;  %v2227_v39 = vmul.bf16 %v2203_v42, %v2035_v8  ;;  %v2205_v14 = vadd.bf16 1065369472, %v3308_v58  ;;  %v2162_v34 = vmul.bf16 1061961548, %v2138_v63  ;;  %v5584_v27 = vld [vmem:[#allocation16_spill] sm:$0xff] }
 0x263   : > { %v2346_v46 = vmul.bf16 %v2278_v22, %v2226_v30  ;;  %v3310_v59 = vpop.eup %3309  ;;  %v2228_v50 = vmul.bf16 %v2204_v35, %v2036_v53  ;;  %v2140_v57 = vadd.bf16 %v2116_v18, %v4997_v56  ;;  %v2141_v47 = vadd.bf16 %v2117_v28, %v5013_v51 }
 0x264   : > { %3113 = vmatmul.mubr.msk.bf16.vlgmr.msra.gmra.mrb[28].mxu1 %vm2375_vm7, %v2344_v26  ;;  %v2347_v19 = vmul.bf16 %v2280_v7, %v2227_v39  ;;  %v3312_v0 = vpop.eup %3311  ;;  %v2229_v31 = vmul.bf16 %v2205_v14, %v2037_v62  ;;  %v2207_v26 = vadd.bf16 1065369472, %v3310_v59  ;;  %3317 = vtanh.bf16 %v2162_v34  ;;  %v2286_v15 = vpop.permute.xlu1 %2285 }
 0x265   : > { %3116 = vmatprep.mubr.msk.bf16.mxu1 %vm2375_vm7, %v2345_v29  ;;  %v2348_v45 = vmul.bf16 %v2282_v60, %v2228_v50  ;;  %v2206_v36 = vadd.bf16 1065369472, %v3312_v0  ;;  %v2094_v29 = vmul.bf16 %v2070_v20, %v5043_v61  ;;  %3319 = vtanh.bf16 %v2163_v4 }
 0x266   : > { %v2349_v37 = vmul.bf16 %v2284_v17, %v2229_v31  ;;  %v2038_v42 = vmul.bf16 1056980736, %v4671_v6  ;;  %v2231_v22 = vmul.bf16 %v2207_v26, %v2039_v52  ;;  %v2164_v7 = vmul.bf16 1061961548, %v2140_v57 }
 0x267   : > { %v2118_v2 = vmul.bf16 %v2094_v29, %v5043_v61  ;;  %v2165_v33 = vmul.bf16 1061961548, %v2141_v47  ;;  %v2119_v38 = vmul.bf16 %v2095_v49, %v5066_v23  ;;  %v2040_v6 = vmul.bf16 1056980736, %v4785_v32 }
 0x268   : > { %v3314_v3 = vpop.eup %3313  ;;  %v2230_v30 = vmul.bf16 %v2206_v36, %v2038_v42  ;;  %v2351_v16 = vmul.bf16 %v2288_v11, %v2231_v22  ;;  %3321 = vtanh.bf16 %v2164_v7  ;;  %v2290_v21 = vpop.permute.xlu1 %2289  ;;  %v2041_v58 = vmul.bf16 1056980736, %v4834_v40 }
 0x269   : > { %v3316_v8 = vpop.eup %3315  ;;  %v2208_v39 = vadd.bf16 1065369472, %v3314_v3  ;;  %v2142_v25 = vadd.bf16 %v2118_v2, %v5043_v61  ;;  %3323 = vtanh.bf16 %v2165_v33  ;;  %v2073_v63 = vmul.bf16 1027030327, %v5126_v48 }
 0x26a   : > { %v2350_v9 = vmul.bf16 %v2286_v15, %v2230_v30  ;;  %v2209_v41 = vadd.bf16 1065369472, %v3316_v8  ;;  %v2072_v54 = vmul.bf16 1027030327, %v5584_v27  ;;  %v2042_v18 = vmul.bf16 1056980736, %v4899_v24 }
 0x26b   : > { %v2166_v60 = vmul.bf16 1061961548, %v2142_v25  ;;  %v2097_v17 = vmul.bf16 %v2073_v63, %v5126_v48  ;;  %v2043_v0 = vmul.bf16 1056980736, %v4950_v55  ;;  %v2044_v55 = vmul.bf16 1056980736, %v4997_v56 }
 0x26c   : > { %3117 = vmatmul.mubr.msk.bf16.gmra.mrb[32].mxu1 %vm2375_vm7, %v2346_v46  ;;  %v2143_v46 = vadd.bf16 %v2119_v38, %v5066_v23  ;;  %v2233_v14 = vmul.bf16 %v2209_v41, %v2041_v58  ;;  %v2096_v34 = vmul.bf16 %v2072_v54, %v5584_v27  ;;  %v2045_v42 = vmul.bf16 1056980736, %v5013_v51 }
 0x26d   : > { %3120 = vmatprep.mubr.msk.bf16.mxu1 %vm2375_vm7, %v2347_v19  ;;  %v2232_v19 = vmul.bf16 %v2208_v39, %v2040_v6  ;;  %3325 = vtanh.bf16 %v2166_v60  ;;  %v2121_v28 = vmul.bf16 %v2097_v17, %v5126_v48  ;;  %v2074_v11 = vmul.bf16 1027030327, %v5202_v13 }
 0x26e   : > { %v2167_v59 = vmul.bf16 1061961548, %v2143_v46  ;;  %v2075_v8 = vmul.bf16 1027030327, %v5185_v10  ;;  %v2046_v41 = vmul.bf16 1056980736, %v5043_v61 }
 0x26f   : > { %v3318_v1 = vpop.eup %3317  ;;  %v2352_v53 = vmul.bf16 %v2290_v21, %v2232_v19  ;;  %v2145_v24 = vadd.bf16 %v2121_v28, %v5126_v48  ;;  %v2098_v56 = vmul.bf16 %v2074_v11, %v5202_v13  ;;  %v2047_v25 = vmul.bf16 1056980736, %v5066_v23 }
 0x270   : > { %v2292_v35 = vpop.permute.xlu0 %2291  ;;  %v3320_v32 = vpop.eup %3319  ;;  %v2210_v50 = vadd.bf16 1065369472, %v3318_v1  ;;  %3327 = vtanh.bf16 %v2167_v59  ;;  %v2099_v39 = vmul.bf16 %v2075_v8, %v5185_v10  ;;  %v2076_v58 = vmul.bf16 1027030327, %v5234_v43 }
 0x271   : > { %v2353_v62 = vmul.bf16 %v2292_v35, %v2233_v14  ;;  %v2211_v40 = vadd.bf16 1065369472, %v3320_v32  ;;  %v2169_v22 = vmul.bf16 1061961548, %v2145_v24  ;;  %v2122_v21 = vmul.bf16 %v2098_v56, %v5202_v13 }
 0x272   : > { %v2234_v31 = vmul.bf16 %v2210_v50, %v2042_v18  ;;  %v2123_v19 = vmul.bf16 %v2099_v39, %v5185_v10  ;;  %v2077_v35 = vmul.bf16 1027030327, %v5232_v12  ;;  %v2100_v32 = vmul.bf16 %v2076_v58, %v5234_v43 }
 0x273   : > { %v3322_v5 = vpop.eup %3321  ;;  %3329 = vtanh.bf16 %v2169_v22  ;;  %v2146_v61 = vadd.bf16 %v2122_v21, %v5202_v13  ;;  %v2078_v50 = vmul.bf16 1027030327, %v5256_v44  ;;  %v2052_v39 = vmul.bf16 1056980736, %v5234_v43 }
 0x274   : > { %3121 = vmatmul.mubr.msk.bf16.gmra.mrb[36].mxu1 %vm2375_vm7, %v2348_v45  ;;  %v2235_v45 = vmul.bf16 %v2211_v40, %v2043_v0  ;;  %v3324_v26 = vpop.eup %3323  ;;  %v2212_v29 = vadd.bf16 1065369472, %v3322_v5  ;;  %v2101_v23 = vmul.bf16 %v2077_v35, %v5232_v12  ;;  %v2124_v59 = vmul.bf16 %v2100_v32, %v5234_v43 }
 0x275   : > { %3124 = vmatprep.mubr.msk.bf16.mxu1 %vm2375_vm7, %v2349_v37  ;;  %v2120_v37 = vmul.bf16 %v2096_v34, %v5584_v27  ;;  %v2213_v52 = vadd.bf16 1065369472, %v3324_v26 }
 0x276   : > { %v2236_v3 = vmul.bf16 %v2212_v29, %v2044_v55  ;;  %v2125_v34 = vmul.bf16 %v2101_v23, %v5232_v12  ;;  %v2148_v0 = vadd.bf16 %v2124_v59, %v5234_v43 }
 0x277   : > { %v2144_v47 = vadd.bf16 %v2120_v37, %v5584_v27  ;;  %v2237_v7 = vmul.bf16 %v2213_v52, %v2045_v42 }
 0x278   : > { %v3326_v30 = vpop.eup %3325  ;;  %v2149_v28 = vadd.bf16 %v2125_v34, %v5232_v12 }
 0x279   : > { %v2294_v20 = vpop.permute.xlu1 %2293  ;;  %v2168_v2 = vmul.bf16 1061961548, %v2144_v47 }
 0x27a   : > { %v2354_v36 = vmul.bf16 %v2294_v20, %v2234_v31  ;;  %v2102_v31 = vmul.bf16 %v2078_v50, %v5256_v44  ;;  %v2173_v52 = vmul.bf16 1061961548, %v2149_v28 }
 0x27b   : > { %3331 = vtanh.bf16 %v2168_v2 }
 0x27c   : > { %3125 = vmatmul.mubr.msk.bf16.gmra.mrb[40].mxu1 %vm2375_vm7, %v2350_v9  ;;  %v2214_v9 = vadd.bf16 1065369472, %v3326_v30 }
 0x27d   : > { %3128 = vmatprep.mubr.msk.bf16.mxu1 %vm2375_vm7, %v2351_v16  ;;  %v3328_v16 = vpop.eup %3327 }
 0x27e   : > { %v2215_v51 = vadd.bf16 1065369472, %v3328_v16  ;;  %v2238_v46 = vmul.bf16 %v2214_v9, %v2046_v41  ;;  %v3330_v60 = vpop.eup %3329 }
 0x27f   : > { %v2217_v18 = vadd.bf16 1065369472, %v3330_v60 }
 0x280   : > { %v2239_v63 = vmul.bf16 %v2215_v51, %v2047_v25 }
 0x281   : > { %v2296_v4 = vpop.permute.xlu0 %2295 }
 0x282   : > { %v2355_v57 = vmul.bf16 %v2296_v4, %v2235_v45  ;;  %v2049_v4 = vmul.bf16 1056980736, %v5126_v48  ;;  %v2048_v45 = vmul.bf16 1056980736, %v5584_v27 }
 0x284   : > { %3129 = vmatmul.mubr.msk.bf16.gmra.mrb[44].mxu1 %vm2375_vm7, %v2352_v53  ;;  %v2147_v53 = vadd.bf16 %v2123_v19, %v5185_v10  ;;  %v2241_v37 = vmul.bf16 %v2217_v18, %v2049_v4  ;;  %v2054_v19 = vmul.bf16 1056980736, %v5256_v44 }
 0x285   : > { %3132 = vmatprep.mubr.msk.bf16.mxu1 %vm2375_vm7, %v2353_v62  ;;  %v2170_v62 = vmul.bf16 1061961548, %v2146_v61 }
 0x286   : > { %v3332_v17 = vpop.eup %3331  ;;  %v2171_v40 = vmul.bf16 1061961548, %v2147_v53 }
 0x287   : > { %v2216_v20 = vadd.bf16 1065369472, %v3332_v17  ;;  %3333 = vtanh.bf16 %v2170_v62 }
 0x288   : > { %3335 = vtanh.bf16 %v2171_v40 }
 0x289   : > { %v2240_v26 = vmul.bf16 %v2216_v20, %v2048_v45 }
 0x28b   : > { %v2298_v49 = vpop.permute.xlu1 %2297 }
 0x28c   : > { %3133 = vmatmul.mubr.msk.bf16.gmra.mrb[48].mxu1 %vm2375_vm7, %v2354_v36  ;;  %v2356_v33 = vmul.bf16 %v2298_v49, %v2236_v3  ;;  %v2172_v36 = vmul.bf16 1061961548, %v2148_v0  ;;  %v2050_v3 = vmul.bf16 1056980736, %v5202_v13  ;;  %v2053_v13 = vmul.bf16 1056980736, %v5232_v12 }
 0x28d   : > { %3136 = vmatprep.mubr.msk.bf16.mxu1 %vm2375_vm7, %v2355_v57  ;;  %v2126_v57 = vmul.bf16 %v2102_v31, %v5256_v44 }
 0x28e   : > { %3337 = vtanh.bf16 %v2172_v36 }
 0x28f   : > { %v2300_v15 = vpop.permute.xlu0 %2299  ;;  %v2150_v48 = vadd.bf16 %v2126_v57, %v5256_v44  ;;  %3339 = vtanh.bf16 %v2173_v52 }
 0x290   : > { %v2357_v38 = vmul.bf16 %v2300_v15, %v2237_v7  ;;  %v2051_v15 = vmul.bf16 1056980736, %v5185_v10 }
 0x291   : > { %v2174_v27 = vmul.bf16 1061961548, %v2150_v48 }
 0x292   : > { %v3334_v55 = vpop.eup %3333 }
 0x293   : > { %v3336_v49 = vpop.eup %3335  ;;  %v2218_v42 = vadd.bf16 1065369472, %v3334_v55  ;;  %3341 = vtanh.bf16 %v2174_v27 }
 0x294   : > { %3137 = vmatmul.mubr.msk.bf16.gmra.mrb[52].mxu1 %vm2375_vm7, %v2356_v33  ;;  %v2219_v11 = vadd.bf16 1065369472, %v3336_v49 }
 0x295   : > { %3140 = vmatprep.mubr.msk.bf16.mxu1 %vm2375_vm7, %v2357_v38  ;;  %v2302_v6 = vpop.permute.xlu1 %2301  ;;  %v2242_v8 = vmul.bf16 %v2218_v42, %v2050_v3 }
 0x296   : > { %v2358_v1 = vmul.bf16 %v2302_v6, %v2238_v46  ;;  %v2243_v7 = vmul.bf16 %v2219_v11, %v2051_v15 }
 0x299   : > { %v3338_v30 = vpop.eup %3337 }
 0x29a   : > { %v2304_v14 = vpop.permute.xlu0 %2303  ;;  %v3340_v16 = vpop.eup %3339  ;;  %v2220_v56 = vadd.bf16 1065369472, %v3338_v30 }
 0x29b   : > { %v2359_v54 = vmul.bf16 %v2304_v14, %v2239_v63  ;;  %v2221_v9 = vadd.bf16 1065369472, %v3340_v16 }
 0x29c   : > { %3141 = vmatmul.mubr.msk.bf16.gmra.mrb[56].mxu1 %vm2375_vm7, %v2358_v1  ;;  %v2244_v10 = vmul.bf16 %v2220_v56, %v2052_v39 }
 0x29d   : > { %3144 = vmatprep.mubr.msk.bf16.mxu1 %vm2375_vm7, %v2359_v54  ;;  %v2245_v41 = vmul.bf16 %v2221_v9, %v2053_v13 }
 0x29e   : > { %v3342_v51 = vpop.eup %3341 }
 0x29f   : > { %v2222_v46 = vadd.bf16 1065369472, %v3342_v51 }
 0x2a1   : > { %v2246_v35 = vmul.bf16 %v2222_v46, %v2054_v19 }
 0x2a4   : > { %v2308_v5 = vpop.permute.xlu0 %2307 }
 0x2a5   : > { %v2361_v29 = vmul.bf16 %v2308_v5, %v2241_v37 }
 0x2a7   : > { %v2306_v24 = vpop.permute.xlu1 %2305 }
 0x2a8   : > { %v2360_v47 = vmul.bf16 %v2306_v24, %v2240_v26 }
 0x2aa   : > { %3145 = vmatmul.mubr.msk.bf16.gmra.mrb[60].mxu1 %vm2375_vm7, %v2360_v47 }
 0x2ab   : > { %3148 = vmatprep.mubr.msk.bf16.mxu1 %vm2375_vm7, %v2361_v29 }
 0x2b1   : > { %v2312_v22 = vpop.permute.xlu0 %2311 }
 0x2b2   : > { %v2363_v38 = vmul.bf16 %v2312_v22, %v2243_v7 }
 0x2b4   : > { %v2310_v2 = vpop.permute.xlu1 %2309 }
 0x2b5   : > { %v2362_v33 = vmul.bf16 %v2310_v2, %v2242_v8 }
 0x2b7   : > { %3149 = vmatmul.mubr.msk.bf16.gmra.mrb[64].mxu1 %vm2375_vm7, %v2362_v33 }
 0x2b8   : > { %3152 = vmatprep.mubr.msk.bf16.mxu1 %vm2375_vm7, %v2363_v38 }
 0x2bc   : > { %v2316_v6 = vpop.permute.xlu0 %2315  ;;  %v2314_v25 = vpop.permute.xlu1 %2313 }
 0x2bd   : > { %v2364_v21 = vmul.bf16 %v2314_v25, %v2244_v10  ;;  %v2365_v58 = vmul.bf16 %v2316_v6, %v2245_v41 }
 0x2bf   : > { %3153 = vmatmul.mubr.msk.bf16.gmra.mrb[68].mxu1 %vm2375_vm7, %v2364_v21 }
 0x2c0   : > { %3156 = vmatprep.mubr.msk.bf16.mxu1 %vm2375_vm7, %v2365_v58 }
 0x2c4   : > { %v2318_v63 = vpop.permute.xlu1 %2317 }
 0x2c5   : > { %v2366_v43 = vmul.bf16 %v2318_v63, %v2246_v35 }
 0x2c7   : > { %3157 = vmatmul.mubr.msk.bf16.gmra.mrb[72].mxu1 %vm2375_vm7, %v2366_v43 }
 0x337   : > { %v3114_v12 = vpop.f32.mrb[28].mxu1 }
 0x338   : > { %2675 = vst.msk [vmem:[%s5381_s27 + $0x10] sm:$0xff] %vm471_vm2, %v3114_v12  ;;  %v2482_v44 = vpop.f32.mrb[29].mxu1 }
 0x339   : > { %2673 = vst.msk [vmem:[%s5381_s27] sm:$0xff] %vm471_vm2, %v2482_v44  ;;  %v3115_v1 = vpop.f32.mrb[30].mxu1 }
 0x33a   : > { %2676 = vst.msk [vmem:[%s5381_s27 + $0x18] sm:$0xff] %vm471_vm2, %v3115_v1  ;;  %v2485_v14 = vpop.f32.mrb[31].mxu1 }
 0x33b   : > { %2674 = vst.msk [vmem:[%s5381_s27 + $0x8] sm:$0xff] %vm471_vm2, %v2485_v14 }
 0x33f   : > { %v3118_v54 = vpop.f32.mrb[32].mxu1 }
 0x340   : > { %2679 = vst.msk [vmem:[%s5381_s27 + $0x30] sm:$0xff] %vm471_vm2, %v3118_v54  ;;  %v2498_v61 = vpop.f32.mrb[33].mxu1 }
 0x341   : > { %2677 = vst.msk [vmem:[%s5381_s27 + $0x20] sm:$0xff] %vm471_vm2, %v2498_v61  ;;  %v3119_v32 = vpop.f32.mrb[34].mxu1 }
 0x342   : > { %2680 = vst.msk [vmem:[%s5381_s27 + $0x38] sm:$0xff] %vm471_vm2, %v3119_v32  ;;  %v2501_v53 = vpop.f32.mrb[35].mxu1 }
 0x343   : > { %2678 = vst.msk [vmem:[%s5381_s27 + $0x28] sm:$0xff] %vm471_vm2, %v2501_v53 }
 0x347   : > { %v3122_v23 = vpop.f32.mrb[36].mxu1 }
 0x348   : > { %2683 = vst.msk [vmem:[%s5381_s27 + $0x50] sm:$0xff] %vm471_vm2, %v3122_v23  ;;  %v2514_v60 = vpop.f32.mrb[37].mxu1 }
 0x349   : > { %2681 = vst.msk [vmem:[%s5381_s27 + $0x40] sm:$0xff] %vm471_vm2, %v2514_v60  ;;  %v3123_v62 = vpop.f32.mrb[38].mxu1 }
 0x34a   : > { %2684 = vst.msk [vmem:[%s5381_s27 + $0x58] sm:$0xff] %vm471_vm2, %v3123_v62  ;;  %v2517_v59 = vpop.f32.mrb[39].mxu1 }
 0x34b   : > { %2682 = vst.msk [vmem:[%s5381_s27 + $0x48] sm:$0xff] %vm471_vm2, %v2517_v59 }
 0x34f   : > { %v3126_v50 = vpop.f32.mrb[40].mxu1 }
 0x350   : > { %2687 = vst.msk [vmem:[%s5381_s27 + $0x70] sm:$0xff] %vm471_vm2, %v3126_v50  ;;  %v2530_v17 = vpop.f32.mrb[41].mxu1 }
 0x351   : > { %2685 = vst.msk [vmem:[%s5381_s27 + $0x60] sm:$0xff] %vm471_vm2, %v2530_v17  ;;  %v3127_v40 = vpop.f32.mrb[42].mxu1 }
 0x352   : > { %2688 = vst.msk [vmem:[%s5381_s27 + $0x78] sm:$0xff] %vm471_vm2, %v3127_v40  ;;  %v2533_v34 = vpop.f32.mrb[43].mxu1 }
 0x353   : > { %2686 = vst.msk [vmem:[%s5381_s27 + $0x68] sm:$0xff] %vm471_vm2, %v2533_v34 }
 0x357   : > { %v3130_v18 = vpop.f32.mrb[44].mxu1 }
 0x358   : > { %2691 = vst.msk [vmem:[%s5381_s27 + $0x90] sm:$0xff] %vm471_vm2, %v3130_v18  ;;  %v2546_v20 = vpop.f32.mrb[45].mxu1 }
 0x359   : > { %2689 = vst.msk [vmem:[%s5381_s27 + $0x80] sm:$0xff] %vm471_vm2, %v2546_v20  ;;  %v3131_v0 = vpop.f32.mrb[46].mxu1 }
 0x35a   : > { %2692 = vst.msk [vmem:[%s5381_s27 + $0x98] sm:$0xff] %vm471_vm2, %v3131_v0  ;;  %v2549_v31 = vpop.f32.mrb[47].mxu1 }
 0x35b   : > { %2690 = vst.msk [vmem:[%s5381_s27 + $0x88] sm:$0xff] %vm471_vm2, %v2549_v31 }
 0x35f   : > { %v3134_v4 = vpop.f32.mrb[48].mxu1 }
 0x360   : > { %2695 = vst.msk [vmem:[%s5381_s27 + $0xb0] sm:$0xff] %vm471_vm2, %v3134_v4  ;;  %v2562_v28 = vpop.f32.mrb[49].mxu1 }
 0x361   : > { %2693 = vst.msk [vmem:[%s5381_s27 + $0xa0] sm:$0xff] %vm471_vm2, %v2562_v28  ;;  %v3135_v5 = vpop.f32.mrb[50].mxu1 }
 0x362   : > { %2696 = vst.msk [vmem:[%s5381_s27 + $0xb8] sm:$0xff] %vm471_vm2, %v3135_v5  ;;  %v2565_v45 = vpop.f32.mrb[51].mxu1 }
 0x363   : > { %2694 = vst.msk [vmem:[%s5381_s27 + $0xa8] sm:$0xff] %vm471_vm2, %v2565_v45 }
 0x367   : > { %v3138_v37 = vpop.f32.mrb[52].mxu1 }
 0x368   : > { %2699 = vst.msk [vmem:[%s5381_s27 + $0xd0] sm:$0xff] %vm471_vm2, %v3138_v37  ;;  %v2578_v26 = vpop.f32.mrb[53].mxu1 }
 0x369   : > { %2697 = vst.msk [vmem:[%s5381_s27 + $0xc0] sm:$0xff] %vm471_vm2, %v2578_v26  ;;  %v3139_v36 = vpop.f32.mrb[54].mxu1 }
 0x36a   : > { %2700 = vst.msk [vmem:[%s5381_s27 + $0xd8] sm:$0xff] %vm471_vm2, %v3139_v36  ;;  %v2581_v57 = vpop.f32.mrb[55].mxu1 }
 0x36b   : > { %2698 = vst.msk [vmem:[%s5381_s27 + $0xc8] sm:$0xff] %vm471_vm2, %v2581_v57 }
 0x36f   : > { %v3142_v29 = vpop.f32.mrb[56].mxu1 }
 0x370   : > { %2703 = vst.msk [vmem:[%s5381_s27 + $0xf0] sm:$0xff] %vm471_vm2, %v3142_v29  ;;  %v2594_v24 = vpop.f32.mrb[57].mxu1 }
 0x371   : > { %2701 = vst.msk [vmem:[%s5381_s27 + $0xe0] sm:$0xff] %vm471_vm2, %v2594_v24  ;;  %v3143_v52 = vpop.f32.mrb[58].mxu1 }
 0x372   : > { %2704 = vst.msk [vmem:[%s5381_s27 + $0xf8] sm:$0xff] %vm471_vm2, %v3143_v52  ;;  %v2597_v47 = vpop.f32.mrb[59].mxu1 }
 0x373   : > { %2702 = vst.msk [vmem:[%s5381_s27 + $0xe8] sm:$0xff] %vm471_vm2, %v2597_v47 }
 0x37d   : > { %v3146_v48 = vpop.f32.mrb[60].mxu1 }
 0x37e   : > { %2707 = vst.msk [vmem:[%s5381_s27 + $0x110] sm:$0xff] %vm471_vm2, %v3146_v48  ;;  %v2610_v55 = vpop.f32.mrb[61].mxu1 }
 0x37f   : > { %2705 = vst.msk [vmem:[%s5381_s27 + $0x100] sm:$0xff] %vm471_vm2, %v2610_v55  ;;  %v3147_v49 = vpop.f32.mrb[62].mxu1 }
 0x380   : > { %2708 = vst.msk [vmem:[%s5381_s27 + $0x118] sm:$0xff] %vm471_vm2, %v3147_v49  ;;  %v2613_v27 = vpop.f32.mrb[63].mxu1 }
 0x381   : > { %2706 = vst.msk [vmem:[%s5381_s27 + $0x108] sm:$0xff] %vm471_vm2, %v2613_v27 }
 0x38a   : > { %v3150_v42 = vpop.f32.mrb[64].mxu1 }
 0x38b   : > { %2711 = vst.msk [vmem:[%s5381_s27 + $0x130] sm:$0xff] %vm471_vm2, %v3150_v42  ;;  %v2626_v11 = vpop.f32.mrb[65].mxu1 }
 0x38c   : > { %2709 = vst.msk [vmem:[%s5381_s27 + $0x120] sm:$0xff] %vm471_vm2, %v2626_v11  ;;  %v3151_v3 = vpop.f32.mrb[66].mxu1 }
 0x38d   : > { %2712 = vst.msk [vmem:[%s5381_s27 + $0x138] sm:$0xff] %vm471_vm2, %v3151_v3  ;;  %v2629_v15 = vpop.f32.mrb[67].mxu1 }
 0x38e   : > { %2710 = vst.msk [vmem:[%s5381_s27 + $0x128] sm:$0xff] %vm471_vm2, %v2629_v15 }
 0x392   : > { %v3154_v22 = vpop.f32.mrb[68].mxu1 }
 0x393   : > { %2715 = vst.msk [vmem:[%s5381_s27 + $0x150] sm:$0xff] %vm471_vm2, %v3154_v22  ;;  %v2642_v8 = vpop.f32.mrb[69].mxu1 }
 0x394   : > { %2713 = vst.msk [vmem:[%s5381_s27 + $0x140] sm:$0xff] %vm471_vm2, %v2642_v8  ;;  %v3155_v30 = vpop.f32.mrb[70].mxu1 }
 0x395   : > { %2716 = vst.msk [vmem:[%s5381_s27 + $0x158] sm:$0xff] %vm471_vm2, %v3155_v30  ;;  %v2645_v7 = vpop.f32.mrb[71].mxu1 }
 0x396   : > { %2714 = vst.msk [vmem:[%s5381_s27 + $0x148] sm:$0xff] %vm471_vm2, %v2645_v7 }
 0x39a   : > { %v3158_v2 = vpop.f32.mrb[72].mxu1 }
 0x39b   : > { %2719 = vst.msk [vmem:[%s5381_s27 + $0x170] sm:$0xff] %vm471_vm2, %v3158_v2  ;;  %v2658_v16 = vpop.f32.mrb[73].mxu1 }
 0x39c   : > { %2717 = vst.msk [vmem:[%s5381_s27 + $0x160] sm:$0xff] %vm471_vm2, %v2658_v16  ;;  %v3159_v33 = vpop.f32.mrb[74].mxu1 }
 0x39d   : > { %2720 = vst.msk [vmem:[%s5381_s27 + $0x178] sm:$0xff] %vm471_vm2, %v3159_v33  ;;  %v2661_v38 = vpop.f32.mrb[75].mxu1 }
 0x39e   : > { %2718 = vst.msk [vmem:[%s5381_s27 + $0x168] sm:$0xff] %vm471_vm2, %v2661_v38 }
 0x39f   : > { %3470 = shalt.err (!%p3467_p5)
}
 0x3a0   : > { %s3471_s22 = scalar_lea.hbm %s5478_s8, 6144  ;;  %s3475_s23 = scalar_lea.hbm %s5539_s4, 12288 }
 0x3a1   : > { %p3472_p10 = scmp.ne.s32.totalorder %s5478_s8, %s3471_s22  ;;  %p3476_p3 = scmp.lt.u32.totalorder %s5478_s8, %s5539_s4 }
 0x3a2   : > { %p3477_p7 = scmp.lt.u32.totalorder %s3475_s23, %s3471_s22  ;;  %p3479_p12 = scmp.lt.u32.totalorder %s3471_s22, %s5478_s8 }
 0x3a3   : > { %p3473_p13 = pnand %p3472_p10, %p3736_p2 }
 0x3a4   : > { %p3478_p11 = por %p3477_p7, %p3476_p3 }
 0x3a5   : > { %p3474_p9 = pneg %p3473_p13 }
 0x3a6   : > { %p3480_p1 = por %p3479_p12, %p3478_p11 }
 0x3a8   : > { %p3481_p4 = pnand %p3480_p1, %p3474_p9 }
 0x3aa   : > { %3484 = shalt.err (!%p3481_p4)
}
 0x3ab   : > { %s3559_s21 = smov 128   ;;  %s3560_s9 = smov 8  }
 0x3ac   : > { %3181 = dma.vmem_to_hbm [thread:$0]  (%p3736_p2), %s5482_s7, 6144, %s5478_s8, %s2722_s18, %s3559_s21, %s3559_s21, %s3560_s9  }
 0x3ad PF: > { %s2752_s12 = sand.u32 1, %s3527_s15   ;;  %p5585_p6 = scmp.ne.s32.totalorder %s5557_s26, 0 }
 0x3ae   : > { %p5586_p8 = scmp.ge.s32.totalorder %s3547_s20, 2  ;;  %s2753_s5 = scalar_lea.sflag [#allocation5], %s2752_s12 }
 0x3b0   : > { %p3198_p0 = pnand %p5586_p8, %p5585_p6 }
 0x3b2   : > { %3522 = dma.done.wait (!%p3198_p0), %s2753_s5, 6144  }
 0x3b3   : > { %3524 = vsyncadd (!%p3198_p0), %s2753_s5, 4294961152  ;;  %s22_s20 = sadd.s32 1, %s3547_s20   ;;  %s5587_s15 = smov %s3531_s16 }
 0x3b4   : > { %p19_p5 = scmp.ge.s32.totalorder %s22_s20, 4   ;;  %s5588_s16 = smov %s3535_s17 }
 0x3b5   : > { %s5589_s17 = smov %s3752_s24  ;;  %s5590_s18 = smov %s3543_s19 }
 0x3b6   : > { %s5591_s19 = smov %s5593_s6  ;;  %21 = sbr.rel (!%p19_p5) target bundleno = 8 (0x8), region = 95 }
 0x3bd   :  { %2758 = vsyncpa [#allocation4], 1 }
 0x3be   :  { %2760 = vsyncpa [#allocation4 + $0x1], 1 }
 0x3bf   :  { %2761 = vsyncpa [#allocation7], 1 }
 0x3c0   :  { %2762 = vsyncpa [#allocation10], 1 }
 0x3c1   :  { %2763 = vsyncpa [#allocation5], 1 }
 0x3c2   :  { %2765 = vsyncpa [#allocation5 + $0x1], 1 }

</bundles_post_ra>
